<compile_context>
chip_gen: v7x
topology: tpu7x:2x2x1
jax: 0.10.0
libtpu: 0.0.40
codegen_flags: <defaults>
</compile_context>

<pallas_src>
import functools

import numpy as np
import jax
import jax.numpy as jnp
from jax.experimental import pallas as pl
from jax.experimental.pallas import tpu as pltpu


def _round_up(x, m):
    return (x + m - 1) // m * m


def _rnet_fused_kernel(ids_ref, x_ref, *refs, H, W, c_in):
    """One grid step == one image.  Channels on sublanes, pixels on lanes.

    ids_ref    : (3, H*W) int32   rows = [row_idx, col_idx, flat_idx]
    x_ref      : (1, Cpad, H*W)   input image (channels zero-padded to mult of 8)
    refs[:2L]  : w0, b0, ..., wL-1, bL-1 ; wi (Cout_i, 9*Cin_i) bf16, bi (Cout_i,1) f32
    refs[2L]   : out_ref (1, c_in, H*W)
    refs[2L+1] : patch_ref VMEM (9*Cmax, H*W) bf16   (im2col buffer)
    """
    n_layers = (len(refs) - 2) // 2
    w_refs = refs[0:2 * n_layers:2]
    b_refs = refs[1:2 * n_layers:2]
    out_ref = refs[2 * n_layers]
    patch_ref = refs[2 * n_layers + 1]

    HW = H * W
    ids = ids_ref[...]
    row = ids[0:1, :]
    col = ids[1:2, :]
    pos = ids[2:3, :]

    def rollf(v, s):
        return pltpu.roll(v, s % HW, axis=1)

    # Probe the rotate direction once; if the convention is flipped the select
    # branches below simply swap, so XOR the probe into the boundary masks.
    prev = jnp.where(pos == 0, HW - 1, pos - 1)
    flipped = rollf(pos, 1) != prev          # all-False (np.roll conv.) or all-True

    first_row = (row == 0) != flipped
    last_row = (row == H - 1) != flipped
    first_col = (col == 0) != flipped
    last_col = (col == W - 1) != flipped

    def shift_rows(a):
        # values at rows r-1 / r+1 with reflection at the top/bottom border
        p = rollf(a, HW - W)                 # np convention: a[i + W]
        m = rollf(a, W)                      # np convention: a[i - W]
        up = jnp.where(first_row, p, m)      # row r-1 (row 1 at r == 0)
        dn = jnp.where(last_row, m, p)       # row r+1 (row H-2 at r == H-1)
        return up, dn

    def shift_cols(b):
        p = rollf(b, HW - 1)                 # np convention: b[i + 1]
        m = rollf(b, 1)                      # np convention: b[i - 1]
        left = jnp.where(first_col, p, m)    # col c-1 (col 1 at c == 0)
        right = jnp.where(last_col, m, p)    # col c+1 (col W-2 at c == W-1)
        return left, right

    x_all = x_ref[0].astype(jnp.float32)     # (Cpad, HW)
    x_res = x_all[:c_in, :]                  # residual branch (original channels)

    a = x_all                                # current activation, f32 (Cin, HW)
    for li in range(n_layers):
        cin = a.shape[0]
        up, dn = shift_rows(a)
        # ---- im2col: 9 reflected taps stacked on sublanes, lane-dense stores --
        for dy, rowed in enumerate((up, a, dn)):
            left, right = shift_cols(rowed)
            for dx, tap in enumerate((left, rowed, right)):
                t = dy * 3 + dx
                patch_ref[t * cin:(t + 1) * cin, :] = tap.astype(patch_ref.dtype)

        # ---- one bf16 MXU matmul per layer, f32 accumulate --------------------
        k = 9 * cin
        acc = jnp.dot(w_refs[li][...], patch_ref[:k, :],
                      preferred_element_type=jnp.float32)
        acc = acc + b_refs[li][...]          # (Cout, 1) broadcast along lanes

        if li < n_layers - 1:
            a = jnp.maximum(acc, 0.0)
        else:
            out_ref[0, :, :] = jax.nn.sigmoid(acc + x_res).astype(out_ref.dtype)


def r_net_forward(x_nchw, params):
    """Equivalent of R_net.forward.  x: (N, C, H, W) -> (N, C, H, W)."""
    N, C, H, W = x_nchw.shape
    HW = H * W
    n_layers = len(params)
    c_pad = _round_up(C, 8)

    # Channel-major, flattened-pixel layout: a free reshape of NCHW (no
    # transpose), so kernel I/O DMAs and in-kernel stores are lane-dense.
    x_flat = x_nchw.astype(jnp.float32).reshape(N, C, HW)
    if c_pad != C:
        x_flat = jnp.pad(x_flat, ((0, 0), (0, c_pad - C), (0, 0)))

    # pixel -> (row, col, flat) lookup tables for the reflection boundaries.
    pix = np.arange(HW, dtype=np.int32)
    ids = jnp.asarray(np.stack([pix // W, pix % W, pix]), dtype=jnp.int32)

    flat_inputs = [ids, x_flat]
    in_specs = [
        pl.BlockSpec((3, HW), lambda n: (0, 0)),
        pl.BlockSpec((1, c_pad, HW), lambda n: (n, 0, 0)),
    ]

    cin_list, cout_list = [], []
    for li, (w, b) in enumerate(params):
        cin, cout = w.shape[2], w.shape[3]
        if li == 0 and cin < c_pad:          # sublane-align K = 9*Cin
            w = jnp.pad(w, ((0, 0), (0, 0), (0, c_pad - cin), (0, 0)))
            cin = c_pad
        # (3,3,Cin,Cout) -> (Cout, 9*Cin); rows/cols match the im2col tap order.
        wt = w.reshape(9 * cin, cout).T.astype(jnp.bfloat16)
        flat_inputs += [wt, b.reshape(cout, 1).astype(jnp.float32)]
        in_specs += [pl.BlockSpec((cout, 9 * cin), lambda n: (0, 0)),
                     pl.BlockSpec((cout, 1), lambda n: (0, 0))]
        cin_list.append(cin)
        cout_list.append(cout)

    cmax = max(cin_list)
    kernel = functools.partial(_rnet_fused_kernel, H=H, W=W, c_in=C)

    flops = 2 * N * HW * sum(9 * ci * co for ci, co in zip(cin_list, cout_list))
    bytes_accessed = (4 * N * HW * (c_pad + C)
                      + sum(2 * 9 * ci * co + 4 * co
                            for ci, co in zip(cin_list, cout_list)))

    out_flat = pl.pallas_call(
        kernel,
        out_shape=jax.ShapeDtypeStruct((N, C, HW), x_nchw.dtype),
        grid_spec=pltpu.PrefetchScalarGridSpec(
            num_scalar_prefetch=0,
            grid=(N,),
            in_specs=in_specs,
            out_specs=pl.BlockSpec((1, C, HW), lambda n: (n, 0, 0)),
            scratch_shapes=[pltpu.VMEM((9 * cmax, HW), jnp.bfloat16)],
        ),
        compiler_params=pltpu.CompilerParams(
            dimension_semantics=("parallel",),
            # raise per-generation once spatial H-tiling lands (v5e/v6e: ~112MiB)
            vmem_limit_bytes=32 * 1024 * 1024),
        cost_estimate=pl.CostEstimate(
            flops=int(flops),
            transcendentals=int(N * HW * C),
            bytes_accessed=int(bytes_accessed)),
    )(*flat_inputs)

    return out_flat.reshape(N, C, H, W)


def init_rnet_params(in_channel, key):
    """Deterministic init of the 6 conv layers (shapes from R_net.__init__)."""
    channels = [in_channel, 8, 32, 64, 32, 8, in_channel]
    params = []
    for i in range(6):
        cin, cout = channels[i], channels[i + 1]
        key, kw, kb = jax.random.split(key, 3)
        fan_in = cin * 9
        scale = (1.0 / fan_in) ** 0.5
        w = jax.random.uniform(kw, (3, 3, cin, cout), jnp.float32, -scale, scale)
        b = jax.random.uniform(kb, (cout,), jnp.float32, -scale, scale)
        params.append((w, b))
    return params


def _reference_forward(x_nchw, params):
    """Pure-JAX reference (lax.conv, f32) for the correctness check."""
    x_nhwc = jnp.transpose(x_nchw, (0, 2, 3, 1))

    def conv(h, w, b):
        hp = jnp.pad(h, ((0, 0), (1, 1), (1, 1), (0, 0)), mode="reflect")
        y = jax.lax.conv_general_dilated(
            hp, w, window_strides=(1, 1), padding="VALID",
            dimension_numbers=("NHWC", "HWIO", "NHWC"))
        return y + b[None, None, None, :]

    h = x_nhwc
    for i in range(5):
        w, b = params[i]
        h = jnp.maximum(conv(h, w, b), 0.0)
    w, b = params[5]
    out = jax.nn.sigmoid(conv(h, w, b) + x_nhwc)
    return jnp.transpose(out, (0, 3, 1, 2))


if __name__ == "__main__":
    key = jax.random.PRNGKey(0)
    in_channel = 4
    N, H, W = 2, 16, 16

    key, kx, kp = jax.random.split(key, 3)
    x = jax.random.normal(kx, (N, in_channel, H, W), jnp.float32)
    params = init_rnet_params(in_channel, kp)

    out = jax.block_until_ready(r_net_forward(x, params))
    assert out.shape == (N, in_channel, H, W), out.shape

    ref = jax.block_until_ready(_reference_forward(x, params))
    err = float(jnp.max(jnp.abs(out - ref)))
    # bf16 MXU inputs (f32 accumulate / elementwise) -> ~1e-3-scale agreement.
    assert err < 2e-2, err

    print("KERNEL_OK")
</pallas_src>

<mosaic_0001>
module attributes {stable_mosaic.version = 11 : i64} {
  func.func @_rnet_fused_kernel(%arg0: i32, %arg1: memref<3x256xi32, #tpu.memory_space<vmem>>, %arg2: memref<1x8x256xf32, #tpu.memory_space<vmem>>, %arg3: memref<8x72xbf16, #tpu.memory_space<vmem>>, %arg4: memref<8x1xf32, #tpu.memory_space<vmem>>, %arg5: memref<32x72xbf16, #tpu.memory_space<vmem>>, %arg6: memref<32x1xf32, #tpu.memory_space<vmem>>, %arg7: memref<64x288xbf16, #tpu.memory_space<vmem>>, %arg8: memref<64x1xf32, #tpu.memory_space<vmem>>, %arg9: memref<32x576xbf16, #tpu.memory_space<vmem>>, %arg10: memref<32x1xf32, #tpu.memory_space<vmem>>, %arg11: memref<8x288xbf16, #tpu.memory_space<vmem>>, %arg12: memref<8x1xf32, #tpu.memory_space<vmem>>, %arg13: memref<4x72xbf16, #tpu.memory_space<vmem>>, %arg14: memref<4x1xf32, #tpu.memory_space<vmem>>, %arg15: memref<1x4x256xf32, #tpu.memory_space<vmem>>, %arg16: memref<576x256xbf16, #tpu.memory_space<vmem>>) attributes {dimension_semantics = [#tpu.dimension_semantics<parallel>], iteration_bounds = array<i64: 2>, scalar_prefetch = 0 : i64, scratch_operands = 1 : i64, tpu.core_type = #tpu.core_type<tc>, window_params = [{pipeline_mode = #tpu.pipeline_mode<synchronous>, transform_indices = @transform_0, window_bounds = array<i64: 3, 256>}, {transform_indices = @transform_1, window_bounds = array<i64: 1, 8, 256>}, {pipeline_mode = #tpu.pipeline_mode<synchronous>, transform_indices = @transform_2, window_bounds = array<i64: 8, 72>}, {pipeline_mode = #tpu.pipeline_mode<synchronous>, transform_indices = @transform_3, window_bounds = array<i64: 8, 1>}, {pipeline_mode = #tpu.pipeline_mode<synchronous>, transform_indices = @transform_4, window_bounds = array<i64: 32, 72>}, {pipeline_mode = #tpu.pipeline_mode<synchronous>, transform_indices = @transform_5, window_bounds = array<i64: 32, 1>}, {pipeline_mode = #tpu.pipeline_mode<synchronous>, transform_indices = @transform_6, window_bounds = array<i64: 64, 288>}, {pipeline_mode = #tpu.pipeline_mode<synchronous>, transform_indices = @transform_7, window_bounds = array<i64: 64, 1>}, {pipeline_mode = #tpu.pipeline_mode<synchronous>, transform_indices = @transform_8, window_bounds = array<i64: 32, 576>}, {pipeline_mode = #tpu.pipeline_mode<synchronous>, transform_indices = @transform_9, window_bounds = array<i64: 32, 1>}, {pipeline_mode = #tpu.pipeline_mode<synchronous>, transform_indices = @transform_10, window_bounds = array<i64: 8, 288>}, {pipeline_mode = #tpu.pipeline_mode<synchronous>, transform_indices = @transform_11, window_bounds = array<i64: 8, 1>}, {pipeline_mode = #tpu.pipeline_mode<synchronous>, transform_indices = @transform_12, window_bounds = array<i64: 4, 72>}, {pipeline_mode = #tpu.pipeline_mode<synchronous>, transform_indices = @transform_13, window_bounds = array<i64: 4, 1>}, {transform_indices = @transform_14, window_bounds = array<i64: 1, 4, 256>}]} {
    %c0 = arith.constant 0 : index
    %c0_0 = arith.constant 0 : index
    %0 = vector.load %arg1[%c0, %c0_0] : memref<3x256xi32, #tpu.memory_space<vmem>>, vector<3x256xi32>
    %1 = vector.extract_strided_slice %0 {offsets = [0, 0], sizes = [1, 256], strides = [1, 1]} : vector<3x256xi32> to vector<1x256xi32>
    %2 = vector.extract_strided_slice %0 {offsets = [1, 0], sizes = [1, 256], strides = [1, 1]} : vector<3x256xi32> to vector<1x256xi32>
    %3 = vector.extract_strided_slice %0 {offsets = [2, 0], sizes = [1, 256], strides = [1, 1]} : vector<3x256xi32> to vector<1x256xi32>
    %c0_i32 = arith.constant 0 : i32
    %4 = vector.broadcast %c0_i32 : i32 to vector<1x256xi32>
    %5 = arith.cmpi eq, %3, %4 : vector<1x256xi32>
    %c1_i32 = arith.constant 1 : i32
    %6 = vector.broadcast %c1_i32 : i32 to vector<1x256xi32>
    %7 = arith.subi %3, %6 : vector<1x256xi32>
    %c255_i32 = arith.constant 255 : i32
    %8 = vector.broadcast %c255_i32 : i32 to vector<1x256xi32>
    %9 = arith.select %5, %8, %7 : vector<1x256xi1>, vector<1x256xi32>
    %c1_i32_1 = arith.constant 1 : i32
    %10 = tpu.dynamic_rotate %3 by %c1_i32_1 dim 1 : vector<1x256xi32>, i32 -> vector<1x256xi32>
    %11 = arith.cmpi ne, %10, %9 : vector<1x256xi32>
    %c0_i32_2 = arith.constant 0 : i32
    %12 = vector.broadcast %c0_i32_2 : i32 to vector<1x256xi32>
    %13 = arith.cmpi eq, %1, %12 : vector<1x256xi32>
    %14 = arith.xori %13, %11 : vector<1x256xi1>
    %c15_i32 = arith.constant 15 : i32
    %15 = vector.broadcast %c15_i32 : i32 to vector<1x256xi32>
    %16 = arith.cmpi eq, %1, %15 : vector<1x256xi32>
    %17 = arith.xori %16, %11 : vector<1x256xi1>
    %c0_i32_3 = arith.constant 0 : i32
    %18 = vector.broadcast %c0_i32_3 : i32 to vector<1x256xi32>
    %19 = arith.cmpi eq, %2, %18 : vector<1x256xi32>
    %20 = arith.xori %19, %11 : vector<1x256xi1>
    %c15_i32_4 = arith.constant 15 : i32
    %21 = vector.broadcast %c15_i32_4 : i32 to vector<1x256xi32>
    %22 = arith.cmpi eq, %2, %21 : vector<1x256xi32>
    %23 = arith.xori %22, %11 : vector<1x256xi1>
    %c0_5 = arith.constant 0 : index
    %c0_6 = arith.constant 0 : index
    %c0_7 = arith.constant 0 : index
    %24 = vector.load %arg2[%c0_5, %c0_6, %c0_7] : memref<1x8x256xf32, #tpu.memory_space<vmem>>, vector<1x8x256xf32>
    %25 = vector.shape_cast %24 : vector<1x8x256xf32> to vector<8x256xf32>
    %26 = vector.extract_strided_slice %25 {offsets = [0, 0], sizes = [4, 256], strides = [1, 1]} : vector<8x256xf32> to vector<4x256xf32>
    %c240_i32 = arith.constant 240 : i32
    %27 = tpu.dynamic_rotate %25 by %c240_i32 dim 1 : vector<8x256xf32>, i32 -> vector<8x256xf32>
    %c16_i32 = arith.constant 16 : i32
    %28 = tpu.dynamic_rotate %25 by %c16_i32 dim 1 : vector<8x256xf32>, i32 -> vector<8x256xf32>
    %29 = vector.shape_cast %14 : vector<1x256xi1> to vector<1x256xi1>
    %30 = vector.broadcast %29 : vector<1x256xi1> to vector<8x256xi1>
    %31 = arith.select %30, %27, %28 : vector<8x256xi1>, vector<8x256xf32>
    %32 = vector.shape_cast %17 : vector<1x256xi1> to vector<1x256xi1>
    %33 = vector.broadcast %32 : vector<1x256xi1> to vector<8x256xi1>
    %34 = arith.select %33, %28, %27 : vector<8x256xi1>, vector<8x256xf32>
    %c255_i32_8 = arith.constant 255 : i32
    %35 = tpu.dynamic_rotate %31 by %c255_i32_8 dim 1 : vector<8x256xf32>, i32 -> vector<8x256xf32>
    %c1_i32_9 = arith.constant 1 : i32
    %36 = tpu.dynamic_rotate %31 by %c1_i32_9 dim 1 : vector<8x256xf32>, i32 -> vector<8x256xf32>
    %37 = vector.shape_cast %20 : vector<1x256xi1> to vector<1x256xi1>
    %38 = vector.broadcast %37 : vector<1x256xi1> to vector<8x256xi1>
    %39 = arith.select %38, %35, %36 : vector<8x256xi1>, vector<8x256xf32>
    %40 = vector.shape_cast %23 : vector<1x256xi1> to vector<1x256xi1>
    %41 = vector.broadcast %40 : vector<1x256xi1> to vector<8x256xi1>
    %42 = arith.select %41, %36, %35 : vector<8x256xi1>, vector<8x256xf32>
    %43 = arith.truncf %39 : vector<8x256xf32> to vector<8x256xbf16>
    %c0_10 = arith.constant 0 : index
    %c0_11 = arith.constant 0 : index
    %44 = vector.load %arg16[%c0_10, %c0_11] : memref<576x256xbf16, #tpu.memory_space<vmem>>, vector<8x256xbf16>
    tpu.vector_store %arg16[%c0_10, %c0_11], %43 {strides = array<i32>} : memref<576x256xbf16, #tpu.memory_space<vmem>>, vector<8x256xbf16>,
    %45 = arith.truncf %31 : vector<8x256xf32> to vector<8x256xbf16>
    %c8 = arith.constant 8 : index
    %c0_12 = arith.constant 0 : index
    %46 = vector.load %arg16[%c8, %c0_12] : memref<576x256xbf16, #tpu.memory_space<vmem>>, vector<8x256xbf16>
    tpu.vector_store %arg16[%c8, %c0_12], %45 {strides = array<i32>} : memref<576x256xbf16, #tpu.memory_space<vmem>>, vector<8x256xbf16>,
    %47 = arith.truncf %42 : vector<8x256xf32> to vector<8x256xbf16>
    %c16 = arith.constant 16 : index
    %c0_13 = arith.constant 0 : index
    %48 = vector.load %arg16[%c16, %c0_13] : memref<576x256xbf16, #tpu.memory_space<vmem>>, vector<8x256xbf16>
    tpu.vector_store %arg16[%c16, %c0_13], %47 {strides = array<i32>} : memref<576x256xbf16, #tpu.memory_space<vmem>>, vector<8x256xbf16>,
    %c255_i32_14 = arith.constant 255 : i32
    %49 = tpu.dynamic_rotate %25 by %c255_i32_14 dim 1 : vector<8x256xf32>, i32 -> vector<8x256xf32>
    %c1_i32_15 = arith.constant 1 : i32
    %50 = tpu.dynamic_rotate %25 by %c1_i32_15 dim 1 : vector<8x256xf32>, i32 -> vector<8x256xf32>
    %51 = vector.shape_cast %20 : vector<1x256xi1> to vector<1x256xi1>
    %52 = vector.broadcast %51 : vector<1x256xi1> to vector<8x256xi1>
    %53 = arith.select %52, %49, %50 : vector<8x256xi1>, vector<8x256xf32>
    %54 = vector.shape_cast %23 : vector<1x256xi1> to vector<1x256xi1>
    %55 = vector.broadcast %54 : vector<1x256xi1> to vector<8x256xi1>
    %56 = arith.select %55, %50, %49 : vector<8x256xi1>, vector<8x256xf32>
    %57 = arith.truncf %53 : vector<8x256xf32> to vector<8x256xbf16>
    %c24 = arith.constant 24 : index
    %c0_16 = arith.constant 0 : index
    %58 = vector.load %arg16[%c24, %c0_16] : memref<576x256xbf16, #tpu.memory_space<vmem>>, vector<8x256xbf16>
    tpu.vector_store %arg16[%c24, %c0_16], %57 {strides = array<i32>} : memref<576x256xbf16, #tpu.memory_space<vmem>>, vector<8x256xbf16>,
    %59 = arith.truncf %25 : vector<8x256xf32> to vector<8x256xbf16>
    %c32 = arith.constant 32 : index
    %c0_17 = arith.constant 0 : index
    %60 = vector.load %arg16[%c32, %c0_17] : memref<576x256xbf16, #tpu.memory_space<vmem>>, vector<8x256xbf16>
    tpu.vector_store %arg16[%c32, %c0_17], %59 {strides = array<i32>} : memref<576x256xbf16, #tpu.memory_space<vmem>>, vector<8x256xbf16>,
    %61 = arith.truncf %56 : vector<8x256xf32> to vector<8x256xbf16>
    %c40 = arith.constant 40 : index
    %c0_18 = arith.constant 0 : index
    %62 = vector.load %arg16[%c40, %c0_18] : memref<576x256xbf16, #tpu.memory_space<vmem>>, vector<8x256xbf16>
    tpu.vector_store %arg16[%c40, %c0_18], %61 {strides = array<i32>} : memref<576x256xbf16, #tpu.memory_space<vmem>>, vector<8x256xbf16>,
    %c255_i32_19 = arith.constant 255 : i32
    %63 = tpu.dynamic_rotate %34 by %c255_i32_19 dim 1 : vector<8x256xf32>, i32 -> vector<8x256xf32>
    %c1_i32_20 = arith.constant 1 : i32
    %64 = tpu.dynamic_rotate %34 by %c1_i32_20 dim 1 : vector<8x256xf32>, i32 -> vector<8x256xf32>
    %65 = vector.shape_cast %20 : vector<1x256xi1> to vector<1x256xi1>
    %66 = vector.broadcast %65 : vector<1x256xi1> to vector<8x256xi1>
    %67 = arith.select %66, %63, %64 : vector<8x256xi1>, vector<8x256xf32>
    %68 = vector.shape_cast %23 : vector<1x256xi1> to vector<1x256xi1>
    %69 = vector.broadcast %68 : vector<1x256xi1> to vector<8x256xi1>
    %70 = arith.select %69, %64, %63 : vector<8x256xi1>, vector<8x256xf32>
    %71 = arith.truncf %67 : vector<8x256xf32> to vector<8x256xbf16>
    %c48 = arith.constant 48 : index
    %c0_21 = arith.constant 0 : index
    %72 = vector.load %arg16[%c48, %c0_21] : memref<576x256xbf16, #tpu.memory_space<vmem>>, vector<8x256xbf16>
    tpu.vector_store %arg16[%c48, %c0_21], %71 {strides = array<i32>} : memref<576x256xbf16, #tpu.memory_space<vmem>>, vector<8x256xbf16>,
    %73 = arith.truncf %34 : vector<8x256xf32> to vector<8x256xbf16>
    %c56 = arith.constant 56 : index
    %c0_22 = arith.constant 0 : index
    %74 = vector.load %arg16[%c56, %c0_22] : memref<576x256xbf16, #tpu.memory_space<vmem>>, vector<8x256xbf16>
    tpu.vector_store %arg16[%c56, %c0_22], %73 {strides = array<i32>} : memref<576x256xbf16, #tpu.memory_space<vmem>>, vector<8x256xbf16>,
    %75 = arith.truncf %70 : vector<8x256xf32> to vector<8x256xbf16>
    %c64 = arith.constant 64 : index
    %c0_23 = arith.constant 0 : index
    %76 = vector.load %arg16[%c64, %c0_23] : memref<576x256xbf16, #tpu.memory_space<vmem>>, vector<8x256xbf16>
    tpu.vector_store %arg16[%c64, %c0_23], %75 {strides = array<i32>} : memref<576x256xbf16, #tpu.memory_space<vmem>>, vector<8x256xbf16>,
    %c0_24 = arith.constant 0 : index
    %c0_25 = arith.constant 0 : index
    %77 = vector.load %arg3[%c0_24, %c0_25] : memref<8x72xbf16, #tpu.memory_space<vmem>>, vector<8x72xbf16>
    %c0_26 = arith.constant 0 : index
    %c0_27 = arith.constant 0 : index
    %78 = vector.load %arg16[%c0_26, %c0_27] : memref<576x256xbf16, #tpu.memory_space<vmem>>, vector<72x256xbf16>
    %cst = arith.constant dense<0.000000e+00> : vector<8x256xf32>
    %79 = tpu.matmul %77, %78, %cst {dimension_numbers = #tpu.dot_dimension_numbers<[1], [0], [0], [1], [0, 0, 1, 1], [], []>} : vector<8x72xbf16>, vector<72x256xbf16>, vector<8x256xf32> -> vector<8x256xf32>
    %c0_28 = arith.constant 0 : index
    %c0_29 = arith.constant 0 : index
    %80 = vector.load %arg4[%c0_28, %c0_29] : memref<8x1xf32, #tpu.memory_space<vmem>>, vector<8x1xf32>
    %81 = vector.broadcast %80 : vector<8x1xf32> to vector<8x256xf32>
    %82 = arith.addf %79, %81 : vector<8x256xf32>
    %cst_30 = arith.constant 0.000000e+00 : f32
    %83 = vector.broadcast %cst_30 : f32 to vector<8x256xf32>
    %84 = arith.maximumf %82, %83 : vector<8x256xf32>
    %c240_i32_31 = arith.constant 240 : i32
    %85 = tpu.dynamic_rotate %84 by %c240_i32_31 dim 1 : vector<8x256xf32>, i32 -> vector<8x256xf32>
    %c16_i32_32 = arith.constant 16 : i32
    %86 = tpu.dynamic_rotate %84 by %c16_i32_32 dim 1 : vector<8x256xf32>, i32 -> vector<8x256xf32>
    %87 = vector.shape_cast %14 : vector<1x256xi1> to vector<1x256xi1>
    %88 = vector.broadcast %87 : vector<1x256xi1> to vector<8x256xi1>
    %89 = arith.select %88, %85, %86 : vector<8x256xi1>, vector<8x256xf32>
    %90 = vector.shape_cast %17 : vector<1x256xi1> to vector<1x256xi1>
    %91 = vector.broadcast %90 : vector<1x256xi1> to vector<8x256xi1>
    %92 = arith.select %91, %86, %85 : vector<8x256xi1>, vector<8x256xf32>
    %c255_i32_33 = arith.constant 255 : i32
    %93 = tpu.dynamic_rotate %89 by %c255_i32_33 dim 1 : vector<8x256xf32>, i32 -> vector<8x256xf32>
    %c1_i32_34 = arith.constant 1 : i32
    %94 = tpu.dynamic_rotate %89 by %c1_i32_34 dim 1 : vector<8x256xf32>, i32 -> vector<8x256xf32>
    %95 = vector.shape_cast %20 : vector<1x256xi1> to vector<1x256xi1>
    %96 = vector.broadcast %95 : vector<1x256xi1> to vector<8x256xi1>
    %97 = arith.select %96, %93, %94 : vector<8x256xi1>, vector<8x256xf32>
    %98 = vector.shape_cast %23 : vector<1x256xi1> to vector<1x256xi1>
    %99 = vector.broadcast %98 : vector<1x256xi1> to vector<8x256xi1>
    %100 = arith.select %99, %94, %93 : vector<8x256xi1>, vector<8x256xf32>
    %101 = arith.truncf %97 : vector<8x256xf32> to vector<8x256xbf16>
    %c0_35 = arith.constant 0 : index
    %c0_36 = arith.constant 0 : index
    %102 = vector.load %arg16[%c0_35, %c0_36] : memref<576x256xbf16, #tpu.memory_space<vmem>>, vector<8x256xbf16>
    tpu.vector_store %arg16[%c0_35, %c0_36], %101 {strides = array<i32>} : memref<576x256xbf16, #tpu.memory_space<vmem>>, vector<8x256xbf16>,
    %103 = arith.truncf %89 : vector<8x256xf32> to vector<8x256xbf16>
    %c8_37 = arith.constant 8 : index
    %c0_38 = arith.constant 0 : index
    %104 = vector.load %arg16[%c8_37, %c0_38] : memref<576x256xbf16, #tpu.memory_space<vmem>>, vector<8x256xbf16>
    tpu.vector_store %arg16[%c8_37, %c0_38], %103 {strides = array<i32>} : memref<576x256xbf16, #tpu.memory_space<vmem>>, vector<8x256xbf16>,
    %105 = arith.truncf %100 : vector<8x256xf32> to vector<8x256xbf16>
    %c16_39 = arith.constant 16 : index
    %c0_40 = arith.constant 0 : index
    %106 = vector.load %arg16[%c16_39, %c0_40] : memref<576x256xbf16, #tpu.memory_space<vmem>>, vector<8x256xbf16>
    tpu.vector_store %arg16[%c16_39, %c0_40], %105 {strides = array<i32>} : memref<576x256xbf16, #tpu.memory_space<vmem>>, vector<8x256xbf16>,
    %c255_i32_41 = arith.constant 255 : i32
    %107 = tpu.dynamic_rotate %84 by %c255_i32_41 dim 1 : vector<8x256xf32>, i32 -> vector<8x256xf32>
    %c1_i32_42 = arith.constant 1 : i32
    %108 = tpu.dynamic_rotate %84 by %c1_i32_42 dim 1 : vector<8x256xf32>, i32 -> vector<8x256xf32>
    %109 = vector.shape_cast %20 : vector<1x256xi1> to vector<1x256xi1>
    %110 = vector.broadcast %109 : vector<1x256xi1> to vector<8x256xi1>
    %111 = arith.select %110, %107, %108 : vector<8x256xi1>, vector<8x256xf32>
    %112 = vector.shape_cast %23 : vector<1x256xi1> to vector<1x256xi1>
    %113 = vector.broadcast %112 : vector<1x256xi1> to vector<8x256xi1>
    %114 = arith.select %113, %108, %107 : vector<8x256xi1>, vector<8x256xf32>
    %115 = arith.truncf %111 : vector<8x256xf32> to vector<8x256xbf16>
    %c24_43 = arith.constant 24 : index
    %c0_44 = arith.constant 0 : index
    %116 = vector.load %arg16[%c24_43, %c0_44] : memref<576x256xbf16, #tpu.memory_space<vmem>>, vector<8x256xbf16>
    tpu.vector_store %arg16[%c24_43, %c0_44], %115 {strides = array<i32>} : memref<576x256xbf16, #tpu.memory_space<vmem>>, vector<8x256xbf16>,
    %117 = arith.truncf %84 : vector<8x256xf32> to vector<8x256xbf16>
    %c32_45 = arith.constant 32 : index
    %c0_46 = arith.constant 0 : index
    %118 = vector.load %arg16[%c32_45, %c0_46] : memref<576x256xbf16, #tpu.memory_space<vmem>>, vector<8x256xbf16>
    tpu.vector_store %arg16[%c32_45, %c0_46], %117 {strides = array<i32>} : memref<576x256xbf16, #tpu.memory_space<vmem>>, vector<8x256xbf16>,
    %119 = arith.truncf %114 : vector<8x256xf32> to vector<8x256xbf16>
    %c40_47 = arith.constant 40 : index
    %c0_48 = arith.constant 0 : index
    %120 = vector.load %arg16[%c40_47, %c0_48] : memref<576x256xbf16, #tpu.memory_space<vmem>>, vector<8x256xbf16>
    tpu.vector_store %arg16[%c40_47, %c0_48], %119 {strides = array<i32>} : memref<576x256xbf16, #tpu.memory_space<vmem>>, vector<8x256xbf16>,
    %c255_i32_49 = arith.constant 255 : i32
    %121 = tpu.dynamic_rotate %92 by %c255_i32_49 dim 1 : vector<8x256xf32>, i32 -> vector<8x256xf32>
    %c1_i32_50 = arith.constant 1 : i32
    %122 = tpu.dynamic_rotate %92 by %c1_i32_50 dim 1 : vector<8x256xf32>, i32 -> vector<8x256xf32>
    %123 = vector.shape_cast %20 : vector<1x256xi1> to vector<1x256xi1>
    %124 = vector.broadcast %123 : vector<1x256xi1> to vector<8x256xi1>
    %125 = arith.select %124, %121, %122 : vector<8x256xi1>, vector<8x256xf32>
    %126 = vector.shape_cast %23 : vector<1x256xi1> to vector<1x256xi1>
    %127 = vector.broadcast %126 : vector<1x256xi1> to vector<8x256xi1>
    %128 = arith.select %127, %122, %121 : vector<8x256xi1>, vector<8x256xf32>
    %129 = arith.truncf %125 : vector<8x256xf32> to vector<8x256xbf16>
    %c48_51 = arith.constant 48 : index
    %c0_52 = arith.constant 0 : index
    %130 = vector.load %arg16[%c48_51, %c0_52] : memref<576x256xbf16, #tpu.memory_space<vmem>>, vector<8x256xbf16>
    tpu.vector_store %arg16[%c48_51, %c0_52], %129 {strides = array<i32>} : memref<576x256xbf16, #tpu.memory_space<vmem>>, vector<8x256xbf16>,
    %131 = arith.truncf %92 : vector<8x256xf32> to vector<8x256xbf16>
    %c56_53 = arith.constant 56 : index
    %c0_54 = arith.constant 0 : index
    %132 = vector.load %arg16[%c56_53, %c0_54] : memref<576x256xbf16, #tpu.memory_space<vmem>>, vector<8x256xbf16>
    tpu.vector_store %arg16[%c56_53, %c0_54], %131 {strides = array<i32>} : memref<576x256xbf16, #tpu.memory_space<vmem>>, vector<8x256xbf16>,
    %133 = arith.truncf %128 : vector<8x256xf32> to vector<8x256xbf16>
    %c64_55 = arith.constant 64 : index
    %c0_56 = arith.constant 0 : index
    %134 = vector.load %arg16[%c64_55, %c0_56] : memref<576x256xbf16, #tpu.memory_space<vmem>>, vector<8x256xbf16>
    tpu.vector_store %arg16[%c64_55, %c0_56], %133 {strides = array<i32>} : memref<576x256xbf16, #tpu.memory_space<vmem>>, vector<8x256xbf16>,
    %c0_57 = arith.constant 0 : index
    %c0_58 = arith.constant 0 : index
    %135 = vector.load %arg5[%c0_57, %c0_58] : memref<32x72xbf16, #tpu.memory_space<vmem>>, vector<32x72xbf16>
    %c0_59 = arith.constant 0 : index
    %c0_60 = arith.constant 0 : index
    %136 = vector.load %arg16[%c0_59, %c0_60] : memref<576x256xbf16, #tpu.memory_space<vmem>>, vector<72x256xbf16>
    %cst_61 = arith.constant dense<0.000000e+00> : vector<32x256xf32>
    %137 = tpu.matmul %135, %136, %cst_61 {dimension_numbers = #tpu.dot_dimension_numbers<[1], [0], [0], [1], [0, 0, 1, 1], [], []>} : vector<32x72xbf16>, vector<72x256xbf16>, vector<32x256xf32> -> vector<32x256xf32>
    %c0_62 = arith.constant 0 : index
    %c0_63 = arith.constant 0 : index
    %138 = vector.load %arg6[%c0_62, %c0_63] : memref<32x1xf32, #tpu.memory_space<vmem>>, vector<32x1xf32>
    %139 = vector.broadcast %138 : vector<32x1xf32> to vector<32x256xf32>
    %140 = arith.addf %137, %139 : vector<32x256xf32>
    %cst_64 = arith.constant 0.000000e+00 : f32
    %141 = vector.broadcast %cst_64 : f32 to vector<32x256xf32>
    %142 = arith.maximumf %140, %141 : vector<32x256xf32>
    %c240_i32_65 = arith.constant 240 : i32
    %143 = tpu.dynamic_rotate %142 by %c240_i32_65 dim 1 : vector<32x256xf32>, i32 -> vector<32x256xf32>
    %c16_i32_66 = arith.constant 16 : i32
    %144 = tpu.dynamic_rotate %142 by %c16_i32_66 dim 1 : vector<32x256xf32>, i32 -> vector<32x256xf32>
    %145 = vector.shape_cast %14 : vector<1x256xi1> to vector<1x256xi1>
    %146 = vector.broadcast %145 : vector<1x256xi1> to vector<32x256xi1>
    %147 = arith.select %146, %143, %144 : vector<32x256xi1>, vector<32x256xf32>
    %148 = vector.shape_cast %17 : vector<1x256xi1> to vector<1x256xi1>
    %149 = vector.broadcast %148 : vector<1x256xi1> to vector<32x256xi1>
    %150 = arith.select %149, %144, %143 : vector<32x256xi1>, vector<32x256xf32>
    %c255_i32_67 = arith.constant 255 : i32
    %151 = tpu.dynamic_rotate %147 by %c255_i32_67 dim 1 : vector<32x256xf32>, i32 -> vector<32x256xf32>
    %c1_i32_68 = arith.constant 1 : i32
    %152 = tpu.dynamic_rotate %147 by %c1_i32_68 dim 1 : vector<32x256xf32>, i32 -> vector<32x256xf32>
    %153 = vector.shape_cast %20 : vector<1x256xi1> to vector<1x256xi1>
    %154 = vector.broadcast %153 : vector<1x256xi1> to vector<32x256xi1>
    %155 = arith.select %154, %151, %152 : vector<32x256xi1>, vector<32x256xf32>
    %156 = vector.shape_cast %23 : vector<1x256xi1> to vector<1x256xi1>
    %157 = vector.broadcast %156 : vector<1x256xi1> to vector<32x256xi1>
    %158 = arith.select %157, %152, %151 : vector<32x256xi1>, vector<32x256xf32>
    %159 = arith.truncf %155 : vector<32x256xf32> to vector<32x256xbf16>
    %c0_69 = arith.constant 0 : index
    %c0_70 = arith.constant 0 : index
    %160 = vector.load %arg16[%c0_69, %c0_70] : memref<576x256xbf16, #tpu.memory_space<vmem>>, vector<32x256xbf16>
    tpu.vector_store %arg16[%c0_69, %c0_70], %159 {strides = array<i32>} : memref<576x256xbf16, #tpu.memory_space<vmem>>, vector<32x256xbf16>,
    %161 = arith.truncf %147 : vector<32x256xf32> to vector<32x256xbf16>
    %c32_71 = arith.constant 32 : index
    %c0_72 = arith.constant 0 : index
    %162 = vector.load %arg16[%c32_71, %c0_72] : memref<576x256xbf16, #tpu.memory_space<vmem>>, vector<32x256xbf16>
    tpu.vector_store %arg16[%c32_71, %c0_72], %161 {strides = array<i32>} : memref<576x256xbf16, #tpu.memory_space<vmem>>, vector<32x256xbf16>,
    %163 = arith.truncf %158 : vector<32x256xf32> to vector<32x256xbf16>
    %c64_73 = arith.constant 64 : index
    %c0_74 = arith.constant 0 : index
    %164 = vector.load %arg16[%c64_73, %c0_74] : memref<576x256xbf16, #tpu.memory_space<vmem>>, vector<32x256xbf16>
    tpu.vector_store %arg16[%c64_73, %c0_74], %163 {strides = array<i32>} : memref<576x256xbf16, #tpu.memory_space<vmem>>, vector<32x256xbf16>,
    %c255_i32_75 = arith.constant 255 : i32
    %165 = tpu.dynamic_rotate %142 by %c255_i32_75 dim 1 : vector<32x256xf32>, i32 -> vector<32x256xf32>
    %c1_i32_76 = arith.constant 1 : i32
    %166 = tpu.dynamic_rotate %142 by %c1_i32_76 dim 1 : vector<32x256xf32>, i32 -> vector<32x256xf32>
    %167 = vector.shape_cast %20 : vector<1x256xi1> to vector<1x256xi1>
    %168 = vector.broadcast %167 : vector<1x256xi1> to vector<32x256xi1>
    %169 = arith.select %168, %165, %166 : vector<32x256xi1>, vector<32x256xf32>
    %170 = vector.shape_cast %23 : vector<1x256xi1> to vector<1x256xi1>
    %171 = vector.broadcast %170 : vector<1x256xi1> to vector<32x256xi1>
    %172 = arith.select %171, %166, %165 : vector<32x256xi1>, vector<32x256xf32>
    %173 = arith.truncf %169 : vector<32x256xf32> to vector<32x256xbf16>
    %c96 = arith.constant 96 : index
    %c0_77 = arith.constant 0 : index
    %174 = vector.load %arg16[%c96, %c0_77] : memref<576x256xbf16, #tpu.memory_space<vmem>>, vector<32x256xbf16>
    tpu.vector_store %arg16[%c96, %c0_77], %173 {strides = array<i32>} : memref<576x256xbf16, #tpu.memory_space<vmem>>, vector<32x256xbf16>,
    %175 = arith.truncf %142 : vector<32x256xf32> to vector<32x256xbf16>
    %c128 = arith.constant 128 : index
    %c0_78 = arith.constant 0 : index
    %176 = vector.load %arg16[%c128, %c0_78] : memref<576x256xbf16, #tpu.memory_space<vmem>>, vector<32x256xbf16>
    tpu.vector_store %arg16[%c128, %c0_78], %175 {strides = array<i32>} : memref<576x256xbf16, #tpu.memory_space<vmem>>, vector<32x256xbf16>,
    %177 = arith.truncf %172 : vector<32x256xf32> to vector<32x256xbf16>
    %c160 = arith.constant 160 : index
    %c0_79 = arith.constant 0 : index
    %178 = vector.load %arg16[%c160, %c0_79] : memref<576x256xbf16, #tpu.memory_space<vmem>>, vector<32x256xbf16>
    tpu.vector_store %arg16[%c160, %c0_79], %177 {strides = array<i32>} : memref<576x256xbf16, #tpu.memory_space<vmem>>, vector<32x256xbf16>,
    %c255_i32_80 = arith.constant 255 : i32
    %179 = tpu.dynamic_rotate %150 by %c255_i32_80 dim 1 : vector<32x256xf32>, i32 -> vector<32x256xf32>
    %c1_i32_81 = arith.constant 1 : i32
    %180 = tpu.dynamic_rotate %150 by %c1_i32_81 dim 1 : vector<32x256xf32>, i32 -> vector<32x256xf32>
    %181 = vector.shape_cast %20 : vector<1x256xi1> to vector<1x256xi1>
    %182 = vector.broadcast %181 : vector<1x256xi1> to vector<32x256xi1>
    %183 = arith.select %182, %179, %180 : vector<32x256xi1>, vector<32x256xf32>
    %184 = vector.shape_cast %23 : vector<1x256xi1> to vector<1x256xi1>
    %185 = vector.broadcast %184 : vector<1x256xi1> to vector<32x256xi1>
    %186 = arith.select %185, %180, %179 : vector<32x256xi1>, vector<32x256xf32>
    %187 = arith.truncf %183 : vector<32x256xf32> to vector<32x256xbf16>
    %c192 = arith.constant 192 : index
    %c0_82 = arith.constant 0 : index
    %188 = vector.load %arg16[%c192, %c0_82] : memref<576x256xbf16, #tpu.memory_space<vmem>>, vector<32x256xbf16>
    tpu.vector_store %arg16[%c192, %c0_82], %187 {strides = array<i32>} : memref<576x256xbf16, #tpu.memory_space<vmem>>, vector<32x256xbf16>,
    %189 = arith.truncf %150 : vector<32x256xf32> to vector<32x256xbf16>
    %c224 = arith.constant 224 : index
    %c0_83 = arith.constant 0 : index
    %190 = vector.load %arg16[%c224, %c0_83] : memref<576x256xbf16, #tpu.memory_space<vmem>>, vector<32x256xbf16>
    tpu.vector_store %arg16[%c224, %c0_83], %189 {strides = array<i32>} : memref<576x256xbf16, #tpu.memory_space<vmem>>, vector<32x256xbf16>,
    %191 = arith.truncf %186 : vector<32x256xf32> to vector<32x256xbf16>
    %c256 = arith.constant 256 : index
    %c0_84 = arith.constant 0 : index
    %192 = vector.load %arg16[%c256, %c0_84] : memref<576x256xbf16, #tpu.memory_space<vmem>>, vector<32x256xbf16>
    tpu.vector_store %arg16[%c256, %c0_84], %191 {strides = array<i32>} : memref<576x256xbf16, #tpu.memory_space<vmem>>, vector<32x256xbf16>,
    %c0_85 = arith.constant 0 : index
    %c0_86 = arith.constant 0 : index
    %193 = vector.load %arg7[%c0_85, %c0_86] : memref<64x288xbf16, #tpu.memory_space<vmem>>, vector<64x288xbf16>
    %c0_87 = arith.constant 0 : index
    %c0_88 = arith.constant 0 : index
    %194 = vector.load %arg16[%c0_87, %c0_88] : memref<576x256xbf16, #tpu.memory_space<vmem>>, vector<288x256xbf16>
    %cst_89 = arith.constant dense<0.000000e+00> : vector<64x256xf32>
    %195 = tpu.matmul %193, %194, %cst_89 {dimension_numbers = #tpu.dot_dimension_numbers<[1], [0], [0], [1], [0, 0, 1, 1], [], []>} : vector<64x288xbf16>, vector<288x256xbf16>, vector<64x256xf32> -> vector<64x256xf32>
    %c0_90 = arith.constant 0 : index
    %c0_91 = arith.constant 0 : index
    %196 = vector.load %arg8[%c0_90, %c0_91] : memref<64x1xf32, #tpu.memory_space<vmem>>, vector<64x1xf32>
    %197 = vector.broadcast %196 : vector<64x1xf32> to vector<64x256xf32>
    %198 = arith.addf %195, %197 : vector<64x256xf32>
    %cst_92 = arith.constant 0.000000e+00 : f32
    %199 = vector.broadcast %cst_92 : f32 to vector<64x256xf32>
    %200 = arith.maximumf %198, %199 : vector<64x256xf32>
    %c240_i32_93 = arith.constant 240 : i32
    %201 = tpu.dynamic_rotate %200 by %c240_i32_93 dim 1 : vector<64x256xf32>, i32 -> vector<64x256xf32>
    %c16_i32_94 = arith.constant 16 : i32
    %202 = tpu.dynamic_rotate %200 by %c16_i32_94 dim 1 : vector<64x256xf32>, i32 -> vector<64x256xf32>
    %203 = vector.shape_cast %14 : vector<1x256xi1> to vector<1x256xi1>
    %204 = vector.broadcast %203 : vector<1x256xi1> to vector<64x256xi1>
    %205 = arith.select %204, %201, %202 : vector<64x256xi1>, vector<64x256xf32>
    %206 = vector.shape_cast %17 : vector<1x256xi1> to vector<1x256xi1>
    %207 = vector.broadcast %206 : vector<1x256xi1> to vector<64x256xi1>
    %208 = arith.select %207, %202, %201 : vector<64x256xi1>, vector<64x256xf32>
    %c255_i32_95 = arith.constant 255 : i32
    %209 = tpu.dynamic_rotate %205 by %c255_i32_95 dim 1 : vector<64x256xf32>, i32 -> vector<64x256xf32>
    %c1_i32_96 = arith.constant 1 : i32
    %210 = tpu.dynamic_rotate %205 by %c1_i32_96 dim 1 : vector<64x256xf32>, i32 -> vector<64x256xf32>
    %211 = vector.shape_cast %20 : vector<1x256xi1> to vector<1x256xi1>
    %212 = vector.broadcast %211 : vector<1x256xi1> to vector<64x256xi1>
    %213 = arith.select %212, %209, %210 : vector<64x256xi1>, vector<64x256xf32>
    %214 = vector.shape_cast %23 : vector<1x256xi1> to vector<1x256xi1>
    %215 = vector.broadcast %214 : vector<1x256xi1> to vector<64x256xi1>
    %216 = arith.select %215, %210, %209 : vector<64x256xi1>, vector<64x256xf32>
    %217 = arith.truncf %213 : vector<64x256xf32> to vector<64x256xbf16>
    %c0_97 = arith.constant 0 : index
    %c0_98 = arith.constant 0 : index
    %218 = vector.load %arg16[%c0_97, %c0_98] : memref<576x256xbf16, #tpu.memory_space<vmem>>, vector<64x256xbf16>
    tpu.vector_store %arg16[%c0_97, %c0_98], %217 {strides = array<i32>} : memref<576x256xbf16, #tpu.memory_space<vmem>>, vector<64x256xbf16>,
    %219 = arith.truncf %205 : vector<64x256xf32> to vector<64x256xbf16>
    %c64_99 = arith.constant 64 : index
    %c0_100 = arith.constant 0 : index
    %220 = vector.load %arg16[%c64_99, %c0_100] : memref<576x256xbf16, #tpu.memory_space<vmem>>, vector<64x256xbf16>
    tpu.vector_store %arg16[%c64_99, %c0_100], %219 {strides = array<i32>} : memref<576x256xbf16, #tpu.memory_space<vmem>>, vector<64x256xbf16>,
    %221 = arith.truncf %216 : vector<64x256xf32> to vector<64x256xbf16>
    %c128_101 = arith.constant 128 : index
    %c0_102 = arith.constant 0 : index
    %222 = vector.load %arg16[%c128_101, %c0_102] : memref<576x256xbf16, #tpu.memory_space<vmem>>, vector<64x256xbf16>
    tpu.vector_store %arg16[%c128_101, %c0_102], %221 {strides = array<i32>} : memref<576x256xbf16, #tpu.memory_space<vmem>>, vector<64x256xbf16>,
    %c255_i32_103 = arith.constant 255 : i32
    %223 = tpu.dynamic_rotate %200 by %c255_i32_103 dim 1 : vector<64x256xf32>, i32 -> vector<64x256xf32>
    %c1_i32_104 = arith.constant 1 : i32
    %224 = tpu.dynamic_rotate %200 by %c1_i32_104 dim 1 : vector<64x256xf32>, i32 -> vector<64x256xf32>
    %225 = vector.shape_cast %20 : vector<1x256xi1> to vector<1x256xi1>
    %226 = vector.broadcast %225 : vector<1x256xi1> to vector<64x256xi1>
    %227 = arith.select %226, %223, %224 : vector<64x256xi1>, vector<64x256xf32>
    %228 = vector.shape_cast %23 : vector<1x256xi1> to vector<1x256xi1>
    %229 = vector.broadcast %228 : vector<1x256xi1> to vector<64x256xi1>
    %230 = arith.select %229, %224, %223 : vector<64x256xi1>, vector<64x256xf32>
    %231 = arith.truncf %227 : vector<64x256xf32> to vector<64x256xbf16>
    %c192_105 = arith.constant 192 : index
    %c0_106 = arith.constant 0 : index
    %232 = vector.load %arg16[%c192_105, %c0_106] : memref<576x256xbf16, #tpu.memory_space<vmem>>, vector<64x256xbf16>
    tpu.vector_store %arg16[%c192_105, %c0_106], %231 {strides = array<i32>} : memref<576x256xbf16, #tpu.memory_space<vmem>>, vector<64x256xbf16>,
    %233 = arith.truncf %200 : vector<64x256xf32> to vector<64x256xbf16>
    %c256_107 = arith.constant 256 : index
    %c0_108 = arith.constant 0 : index
    %234 = vector.load %arg16[%c256_107, %c0_108] : memref<576x256xbf16, #tpu.memory_space<vmem>>, vector<64x256xbf16>
    tpu.vector_store %arg16[%c256_107, %c0_108], %233 {strides = array<i32>} : memref<576x256xbf16, #tpu.memory_space<vmem>>, vector<64x256xbf16>,
    %235 = arith.truncf %230 : vector<64x256xf32> to vector<64x256xbf16>
    %c320 = arith.constant 320 : index
    %c0_109 = arith.constant 0 : index
    %236 = vector.load %arg16[%c320, %c0_109] : memref<576x256xbf16, #tpu.memory_space<vmem>>, vector<64x256xbf16>
    tpu.vector_store %arg16[%c320, %c0_109], %235 {strides = array<i32>} : memref<576x256xbf16, #tpu.memory_space<vmem>>, vector<64x256xbf16>,
    %c255_i32_110 = arith.constant 255 : i32
    %237 = tpu.dynamic_rotate %208 by %c255_i32_110 dim 1 : vector<64x256xf32>, i32 -> vector<64x256xf32>
    %c1_i32_111 = arith.constant 1 : i32
    %238 = tpu.dynamic_rotate %208 by %c1_i32_111 dim 1 : vector<64x256xf32>, i32 -> vector<64x256xf32>
    %239 = vector.shape_cast %20 : vector<1x256xi1> to vector<1x256xi1>
    %240 = vector.broadcast %239 : vector<1x256xi1> to vector<64x256xi1>
    %241 = arith.select %240, %237, %238 : vector<64x256xi1>, vector<64x256xf32>
    %242 = vector.shape_cast %23 : vector<1x256xi1> to vector<1x256xi1>
    %243 = vector.broadcast %242 : vector<1x256xi1> to vector<64x256xi1>
    %244 = arith.select %243, %238, %237 : vector<64x256xi1>, vector<64x256xf32>
    %245 = arith.truncf %241 : vector<64x256xf32> to vector<64x256xbf16>
    %c384 = arith.constant 384 : index
    %c0_112 = arith.constant 0 : index
    %246 = vector.load %arg16[%c384, %c0_112] : memref<576x256xbf16, #tpu.memory_space<vmem>>, vector<64x256xbf16>
    tpu.vector_store %arg16[%c384, %c0_112], %245 {strides = array<i32>} : memref<576x256xbf16, #tpu.memory_space<vmem>>, vector<64x256xbf16>,
    %247 = arith.truncf %208 : vector<64x256xf32> to vector<64x256xbf16>
    %c448 = arith.constant 448 : index
    %c0_113 = arith.constant 0 : index
    %248 = vector.load %arg16[%c448, %c0_113] : memref<576x256xbf16, #tpu.memory_space<vmem>>, vector<64x256xbf16>
    tpu.vector_store %arg16[%c448, %c0_113], %247 {strides = array<i32>} : memref<576x256xbf16, #tpu.memory_space<vmem>>, vector<64x256xbf16>,
    %249 = arith.truncf %244 : vector<64x256xf32> to vector<64x256xbf16>
    %c512 = arith.constant 512 : index
    %c0_114 = arith.constant 0 : index
    %250 = vector.load %arg16[%c512, %c0_114] : memref<576x256xbf16, #tpu.memory_space<vmem>>, vector<64x256xbf16>
    tpu.vector_store %arg16[%c512, %c0_114], %249 {strides = array<i32>} : memref<576x256xbf16, #tpu.memory_space<vmem>>, vector<64x256xbf16>,
    %c0_115 = arith.constant 0 : index
    %c0_116 = arith.constant 0 : index
    %251 = vector.load %arg9[%c0_115, %c0_116] : memref<32x576xbf16, #tpu.memory_space<vmem>>, vector<32x576xbf16>
    %c0_117 = arith.constant 0 : index
    %c0_118 = arith.constant 0 : index
    %252 = vector.load %arg16[%c0_117, %c0_118] : memref<576x256xbf16, #tpu.memory_space<vmem>>, vector<576x256xbf16>
    %cst_119 = arith.constant dense<0.000000e+00> : vector<32x256xf32>
    %253 = tpu.matmul %251, %252, %cst_119 {dimension_numbers = #tpu.dot_dimension_numbers<[1], [0], [0], [1], [0, 0, 1, 1], [], []>} : vector<32x576xbf16>, vector<576x256xbf16>, vector<32x256xf32> -> vector<32x256xf32>
    %c0_120 = arith.constant 0 : index
    %c0_121 = arith.constant 0 : index
    %254 = vector.load %arg10[%c0_120, %c0_121] : memref<32x1xf32, #tpu.memory_space<vmem>>, vector<32x1xf32>
    %255 = vector.broadcast %254 : vector<32x1xf32> to vector<32x256xf32>
    %256 = arith.addf %253, %255 : vector<32x256xf32>
    %cst_122 = arith.constant 0.000000e+00 : f32
    %257 = vector.broadcast %cst_122 : f32 to vector<32x256xf32>
    %258 = arith.maximumf %256, %257 : vector<32x256xf32>
    %c240_i32_123 = arith.constant 240 : i32
    %259 = tpu.dynamic_rotate %258 by %c240_i32_123 dim 1 : vector<32x256xf32>, i32 -> vector<32x256xf32>
    %c16_i32_124 = arith.constant 16 : i32
    %260 = tpu.dynamic_rotate %258 by %c16_i32_124 dim 1 : vector<32x256xf32>, i32 -> vector<32x256xf32>
    %261 = vector.shape_cast %14 : vector<1x256xi1> to vector<1x256xi1>
    %262 = vector.broadcast %261 : vector<1x256xi1> to vector<32x256xi1>
    %263 = arith.select %262, %259, %260 : vector<32x256xi1>, vector<32x256xf32>
    %264 = vector.shape_cast %17 : vector<1x256xi1> to vector<1x256xi1>
    %265 = vector.broadcast %264 : vector<1x256xi1> to vector<32x256xi1>
    %266 = arith.select %265, %260, %259 : vector<32x256xi1>, vector<32x256xf32>
    %c255_i32_125 = arith.constant 255 : i32
    %267 = tpu.dynamic_rotate %263 by %c255_i32_125 dim 1 : vector<32x256xf32>, i32 -> vector<32x256xf32>
    %c1_i32_126 = arith.constant 1 : i32
    %268 = tpu.dynamic_rotate %263 by %c1_i32_126 dim 1 : vector<32x256xf32>, i32 -> vector<32x256xf32>
    %269 = vector.shape_cast %20 : vector<1x256xi1> to vector<1x256xi1>
    %270 = vector.broadcast %269 : vector<1x256xi1> to vector<32x256xi1>
    %271 = arith.select %270, %267, %268 : vector<32x256xi1>, vector<32x256xf32>
    %272 = vector.shape_cast %23 : vector<1x256xi1> to vector<1x256xi1>
    %273 = vector.broadcast %272 : vector<1x256xi1> to vector<32x256xi1>
    %274 = arith.select %273, %268, %267 : vector<32x256xi1>, vector<32x256xf32>
    %275 = arith.truncf %271 : vector<32x256xf32> to vector<32x256xbf16>
    %c0_127 = arith.constant 0 : index
    %c0_128 = arith.constant 0 : index
    %276 = vector.load %arg16[%c0_127, %c0_128] : memref<576x256xbf16, #tpu.memory_space<vmem>>, vector<32x256xbf16>
    tpu.vector_store %arg16[%c0_127, %c0_128], %275 {strides = array<i32>} : memref<576x256xbf16, #tpu.memory_space<vmem>>, vector<32x256xbf16>,
    %277 = arith.truncf %263 : vector<32x256xf32> to vector<32x256xbf16>
    %c32_129 = arith.constant 32 : index
    %c0_130 = arith.constant 0 : index
    %278 = vector.load %arg16[%c32_129, %c0_130] : memref<576x256xbf16, #tpu.memory_space<vmem>>, vector<32x256xbf16>
    tpu.vector_store %arg16[%c32_129, %c0_130], %277 {strides = array<i32>} : memref<576x256xbf16, #tpu.memory_space<vmem>>, vector<32x256xbf16>,
    %279 = arith.truncf %274 : vector<32x256xf32> to vector<32x256xbf16>
    %c64_131 = arith.constant 64 : index
    %c0_132 = arith.constant 0 : index
    %280 = vector.load %arg16[%c64_131, %c0_132] : memref<576x256xbf16, #tpu.memory_space<vmem>>, vector<32x256xbf16>
    tpu.vector_store %arg16[%c64_131, %c0_132], %279 {strides = array<i32>} : memref<576x256xbf16, #tpu.memory_space<vmem>>, vector<32x256xbf16>,
    %c255_i32_133 = arith.constant 255 : i32
    %281 = tpu.dynamic_rotate %258 by %c255_i32_133 dim 1 : vector<32x256xf32>, i32 -> vector<32x256xf32>
    %c1_i32_134 = arith.constant 1 : i32
    %282 = tpu.dynamic_rotate %258 by %c1_i32_134 dim 1 : vector<32x256xf32>, i32 -> vector<32x256xf32>
    %283 = vector.shape_cast %20 : vector<1x256xi1> to vector<1x256xi1>
    %284 = vector.broadcast %283 : vector<1x256xi1> to vector<32x256xi1>
    %285 = arith.select %284, %281, %282 : vector<32x256xi1>, vector<32x256xf32>
    %286 = vector.shape_cast %23 : vector<1x256xi1> to vector<1x256xi1>
    %287 = vector.broadcast %286 : vector<1x256xi1> to vector<32x256xi1>
    %288 = arith.select %287, %282, %281 : vector<32x256xi1>, vector<32x256xf32>
    %289 = arith.truncf %285 : vector<32x256xf32> to vector<32x256xbf16>
    %c96_135 = arith.constant 96 : index
    %c0_136 = arith.constant 0 : index
    %290 = vector.load %arg16[%c96_135, %c0_136] : memref<576x256xbf16, #tpu.memory_space<vmem>>, vector<32x256xbf16>
    tpu.vector_store %arg16[%c96_135, %c0_136], %289 {strides = array<i32>} : memref<576x256xbf16, #tpu.memory_space<vmem>>, vector<32x256xbf16>,
    %291 = arith.truncf %258 : vector<32x256xf32> to vector<32x256xbf16>
    %c128_137 = arith.constant 128 : index
    %c0_138 = arith.constant 0 : index
    %292 = vector.load %arg16[%c128_137, %c0_138] : memref<576x256xbf16, #tpu.memory_space<vmem>>, vector<32x256xbf16>
    tpu.vector_store %arg16[%c128_137, %c0_138], %291 {strides = array<i32>} : memref<576x256xbf16, #tpu.memory_space<vmem>>, vector<32x256xbf16>,
    %293 = arith.truncf %288 : vector<32x256xf32> to vector<32x256xbf16>
    %c160_139 = arith.constant 160 : index
    %c0_140 = arith.constant 0 : index
    %294 = vector.load %arg16[%c160_139, %c0_140] : memref<576x256xbf16, #tpu.memory_space<vmem>>, vector<32x256xbf16>
    tpu.vector_store %arg16[%c160_139, %c0_140], %293 {strides = array<i32>} : memref<576x256xbf16, #tpu.memory_space<vmem>>, vector<32x256xbf16>,
    %c255_i32_141 = arith.constant 255 : i32
    %295 = tpu.dynamic_rotate %266 by %c255_i32_141 dim 1 : vector<32x256xf32>, i32 -> vector<32x256xf32>
    %c1_i32_142 = arith.constant 1 : i32
    %296 = tpu.dynamic_rotate %266 by %c1_i32_142 dim 1 : vector<32x256xf32>, i32 -> vector<32x256xf32>
    %297 = vector.shape_cast %20 : vector<1x256xi1> to vector<1x256xi1>
    %298 = vector.broadcast %297 : vector<1x256xi1> to vector<32x256xi1>
    %299 = arith.select %298, %295, %296 : vector<32x256xi1>, vector<32x256xf32>
    %300 = vector.shape_cast %23 : vector<1x256xi1> to vector<1x256xi1>
    %301 = vector.broadcast %300 : vector<1x256xi1> to vector<32x256xi1>
    %302 = arith.select %301, %296, %295 : vector<32x256xi1>, vector<32x256xf32>
    %303 = arith.truncf %299 : vector<32x256xf32> to vector<32x256xbf16>
    %c192_143 = arith.constant 192 : index
    %c0_144 = arith.constant 0 : index
    %304 = vector.load %arg16[%c192_143, %c0_144] : memref<576x256xbf16, #tpu.memory_space<vmem>>, vector<32x256xbf16>
    tpu.vector_store %arg16[%c192_143, %c0_144], %303 {strides = array<i32>} : memref<576x256xbf16, #tpu.memory_space<vmem>>, vector<32x256xbf16>,
    %305 = arith.truncf %266 : vector<32x256xf32> to vector<32x256xbf16>
    %c224_145 = arith.constant 224 : index
    %c0_146 = arith.constant 0 : index
    %306 = vector.load %arg16[%c224_145, %c0_146] : memref<576x256xbf16, #tpu.memory_space<vmem>>, vector<32x256xbf16>
    tpu.vector_store %arg16[%c224_145, %c0_146], %305 {strides = array<i32>} : memref<576x256xbf16, #tpu.memory_space<vmem>>, vector<32x256xbf16>,
    %307 = arith.truncf %302 : vector<32x256xf32> to vector<32x256xbf16>
    %c256_147 = arith.constant 256 : index
    %c0_148 = arith.constant 0 : index
    %308 = vector.load %arg16[%c256_147, %c0_148] : memref<576x256xbf16, #tpu.memory_space<vmem>>, vector<32x256xbf16>
    tpu.vector_store %arg16[%c256_147, %c0_148], %307 {strides = array<i32>} : memref<576x256xbf16, #tpu.memory_space<vmem>>, vector<32x256xbf16>,
    %c0_149 = arith.constant 0 : index
    %c0_150 = arith.constant 0 : index
    %309 = vector.load %arg11[%c0_149, %c0_150] : memref<8x288xbf16, #tpu.memory_space<vmem>>, vector<8x288xbf16>
    %c0_151 = arith.constant 0 : index
    %c0_152 = arith.constant 0 : index
    %310 = vector.load %arg16[%c0_151, %c0_152] : memref<576x256xbf16, #tpu.memory_space<vmem>>, vector<288x256xbf16>
    %cst_153 = arith.constant dense<0.000000e+00> : vector<8x256xf32>
    %311 = tpu.matmul %309, %310, %cst_153 {dimension_numbers = #tpu.dot_dimension_numbers<[1], [0], [0], [1], [0, 0, 1, 1], [], []>} : vector<8x288xbf16>, vector<288x256xbf16>, vector<8x256xf32> -> vector<8x256xf32>
    %c0_154 = arith.constant 0 : index
    %c0_155 = arith.constant 0 : index
    %312 = vector.load %arg12[%c0_154, %c0_155] : memref<8x1xf32, #tpu.memory_space<vmem>>, vector<8x1xf32>
    %313 = vector.broadcast %312 : vector<8x1xf32> to vector<8x256xf32>
    %314 = arith.addf %311, %313 : vector<8x256xf32>
    %cst_156 = arith.constant 0.000000e+00 : f32
    %315 = vector.broadcast %cst_156 : f32 to vector<8x256xf32>
    %316 = arith.maximumf %314, %315 : vector<8x256xf32>
    %c240_i32_157 = arith.constant 240 : i32
    %317 = tpu.dynamic_rotate %316 by %c240_i32_157 dim 1 : vector<8x256xf32>, i32 -> vector<8x256xf32>
    %c16_i32_158 = arith.constant 16 : i32
    %318 = tpu.dynamic_rotate %316 by %c16_i32_158 dim 1 : vector<8x256xf32>, i32 -> vector<8x256xf32>
    %319 = vector.shape_cast %14 : vector<1x256xi1> to vector<1x256xi1>
    %320 = vector.broadcast %319 : vector<1x256xi1> to vector<8x256xi1>
    %321 = arith.select %320, %317, %318 : vector<8x256xi1>, vector<8x256xf32>
    %322 = vector.shape_cast %17 : vector<1x256xi1> to vector<1x256xi1>
    %323 = vector.broadcast %322 : vector<1x256xi1> to vector<8x256xi1>
    %324 = arith.select %323, %318, %317 : vector<8x256xi1>, vector<8x256xf32>
    %c255_i32_159 = arith.constant 255 : i32
    %325 = tpu.dynamic_rotate %321 by %c255_i32_159 dim 1 : vector<8x256xf32>, i32 -> vector<8x256xf32>
    %c1_i32_160 = arith.constant 1 : i32
    %326 = tpu.dynamic_rotate %321 by %c1_i32_160 dim 1 : vector<8x256xf32>, i32 -> vector<8x256xf32>
    %327 = vector.shape_cast %20 : vector<1x256xi1> to vector<1x256xi1>
    %328 = vector.broadcast %327 : vector<1x256xi1> to vector<8x256xi1>
    %329 = arith.select %328, %325, %326 : vector<8x256xi1>, vector<8x256xf32>
    %330 = vector.shape_cast %23 : vector<1x256xi1> to vector<1x256xi1>
    %331 = vector.broadcast %330 : vector<1x256xi1> to vector<8x256xi1>
    %332 = arith.select %331, %326, %325 : vector<8x256xi1>, vector<8x256xf32>
    %333 = arith.truncf %329 : vector<8x256xf32> to vector<8x256xbf16>
    %c0_161 = arith.constant 0 : index
    %c0_162 = arith.constant 0 : index
    %334 = vector.load %arg16[%c0_161, %c0_162] : memref<576x256xbf16, #tpu.memory_space<vmem>>, vector<8x256xbf16>
    tpu.vector_store %arg16[%c0_161, %c0_162], %333 {strides = array<i32>} : memref<576x256xbf16, #tpu.memory_space<vmem>>, vector<8x256xbf16>,
    %335 = arith.truncf %321 : vector<8x256xf32> to vector<8x256xbf16>
    %c8_163 = arith.constant 8 : index
    %c0_164 = arith.constant 0 : index
    %336 = vector.load %arg16[%c8_163, %c0_164] : memref<576x256xbf16, #tpu.memory_space<vmem>>, vector<8x256xbf16>
    tpu.vector_store %arg16[%c8_163, %c0_164], %335 {strides = array<i32>} : memref<576x256xbf16, #tpu.memory_space<vmem>>, vector<8x256xbf16>,
    %337 = arith.truncf %332 : vector<8x256xf32> to vector<8x256xbf16>
    %c16_165 = arith.constant 16 : index
    %c0_166 = arith.constant 0 : index
    %338 = vector.load %arg16[%c16_165, %c0_166] : memref<576x256xbf16, #tpu.memory_space<vmem>>, vector<8x256xbf16>
    tpu.vector_store %arg16[%c16_165, %c0_166], %337 {strides = array<i32>} : memref<576x256xbf16, #tpu.memory_space<vmem>>, vector<8x256xbf16>,
    %c255_i32_167 = arith.constant 255 : i32
    %339 = tpu.dynamic_rotate %316 by %c255_i32_167 dim 1 : vector<8x256xf32>, i32 -> vector<8x256xf32>
    %c1_i32_168 = arith.constant 1 : i32
    %340 = tpu.dynamic_rotate %316 by %c1_i32_168 dim 1 : vector<8x256xf32>, i32 -> vector<8x256xf32>
    %341 = vector.shape_cast %20 : vector<1x256xi1> to vector<1x256xi1>
    %342 = vector.broadcast %341 : vector<1x256xi1> to vector<8x256xi1>
    %343 = arith.select %342, %339, %340 : vector<8x256xi1>, vector<8x256xf32>
    %344 = vector.shape_cast %23 : vector<1x256xi1> to vector<1x256xi1>
    %345 = vector.broadcast %344 : vector<1x256xi1> to vector<8x256xi1>
    %346 = arith.select %345, %340, %339 : vector<8x256xi1>, vector<8x256xf32>
    %347 = arith.truncf %343 : vector<8x256xf32> to vector<8x256xbf16>
    %c24_169 = arith.constant 24 : index
    %c0_170 = arith.constant 0 : index
    %348 = vector.load %arg16[%c24_169, %c0_170] : memref<576x256xbf16, #tpu.memory_space<vmem>>, vector<8x256xbf16>
    tpu.vector_store %arg16[%c24_169, %c0_170], %347 {strides = array<i32>} : memref<576x256xbf16, #tpu.memory_space<vmem>>, vector<8x256xbf16>,
    %349 = arith.truncf %316 : vector<8x256xf32> to vector<8x256xbf16>
    %c32_171 = arith.constant 32 : index
    %c0_172 = arith.constant 0 : index
    %350 = vector.load %arg16[%c32_171, %c0_172] : memref<576x256xbf16, #tpu.memory_space<vmem>>, vector<8x256xbf16>
    tpu.vector_store %arg16[%c32_171, %c0_172], %349 {strides = array<i32>} : memref<576x256xbf16, #tpu.memory_space<vmem>>, vector<8x256xbf16>,
    %351 = arith.truncf %346 : vector<8x256xf32> to vector<8x256xbf16>
    %c40_173 = arith.constant 40 : index
    %c0_174 = arith.constant 0 : index
    %352 = vector.load %arg16[%c40_173, %c0_174] : memref<576x256xbf16, #tpu.memory_space<vmem>>, vector<8x256xbf16>
    tpu.vector_store %arg16[%c40_173, %c0_174], %351 {strides = array<i32>} : memref<576x256xbf16, #tpu.memory_space<vmem>>, vector<8x256xbf16>,
    %c255_i32_175 = arith.constant 255 : i32
    %353 = tpu.dynamic_rotate %324 by %c255_i32_175 dim 1 : vector<8x256xf32>, i32 -> vector<8x256xf32>
    %c1_i32_176 = arith.constant 1 : i32
    %354 = tpu.dynamic_rotate %324 by %c1_i32_176 dim 1 : vector<8x256xf32>, i32 -> vector<8x256xf32>
    %355 = vector.shape_cast %20 : vector<1x256xi1> to vector<1x256xi1>
    %356 = vector.broadcast %355 : vector<1x256xi1> to vector<8x256xi1>
    %357 = arith.select %356, %353, %354 : vector<8x256xi1>, vector<8x256xf32>
    %358 = vector.shape_cast %23 : vector<1x256xi1> to vector<1x256xi1>
    %359 = vector.broadcast %358 : vector<1x256xi1> to vector<8x256xi1>
    %360 = arith.select %359, %354, %353 : vector<8x256xi1>, vector<8x256xf32>
    %361 = arith.truncf %357 : vector<8x256xf32> to vector<8x256xbf16>
    %c48_177 = arith.constant 48 : index
    %c0_178 = arith.constant 0 : index
    %362 = vector.load %arg16[%c48_177, %c0_178] : memref<576x256xbf16, #tpu.memory_space<vmem>>, vector<8x256xbf16>
    tpu.vector_store %arg16[%c48_177, %c0_178], %361 {strides = array<i32>} : memref<576x256xbf16, #tpu.memory_space<vmem>>, vector<8x256xbf16>,
    %363 = arith.truncf %324 : vector<8x256xf32> to vector<8x256xbf16>
    %c56_179 = arith.constant 56 : index
    %c0_180 = arith.constant 0 : index
    %364 = vector.load %arg16[%c56_179, %c0_180] : memref<576x256xbf16, #tpu.memory_space<vmem>>, vector<8x256xbf16>
    tpu.vector_store %arg16[%c56_179, %c0_180], %363 {strides = array<i32>} : memref<576x256xbf16, #tpu.memory_space<vmem>>, vector<8x256xbf16>,
    %365 = arith.truncf %360 : vector<8x256xf32> to vector<8x256xbf16>
    %c64_181 = arith.constant 64 : index
    %c0_182 = arith.constant 0 : index
    %366 = vector.load %arg16[%c64_181, %c0_182] : memref<576x256xbf16, #tpu.memory_space<vmem>>, vector<8x256xbf16>
    tpu.vector_store %arg16[%c64_181, %c0_182], %365 {strides = array<i32>} : memref<576x256xbf16, #tpu.memory_space<vmem>>, vector<8x256xbf16>,
    %c0_183 = arith.constant 0 : index
    %c0_184 = arith.constant 0 : index
    %367 = vector.load %arg13[%c0_183, %c0_184] : memref<4x72xbf16, #tpu.memory_space<vmem>>, vector<4x72xbf16>
    %c0_185 = arith.constant 0 : index
    %c0_186 = arith.constant 0 : index
    %368 = vector.load %arg16[%c0_185, %c0_186] : memref<576x256xbf16, #tpu.memory_space<vmem>>, vector<72x256xbf16>
    %cst_187 = arith.constant dense<0.000000e+00> : vector<4x256xf32>
    %369 = tpu.matmul %367, %368, %cst_187 {dimension_numbers = #tpu.dot_dimension_numbers<[1], [0], [0], [1], [0, 0, 1, 1], [], []>} : vector<4x72xbf16>, vector<72x256xbf16>, vector<4x256xf32> -> vector<4x256xf32>
    %c0_188 = arith.constant 0 : index
    %c0_189 = arith.constant 0 : index
    %370 = vector.load %arg14[%c0_188, %c0_189] : memref<4x1xf32, #tpu.memory_space<vmem>>, vector<4x1xf32>
    %371 = vector.broadcast %370 : vector<4x1xf32> to vector<4x256xf32>
    %372 = arith.addf %369, %371 : vector<4x256xf32>
    %373 = arith.addf %372, %26 : vector<4x256xf32>
    %374 = arith.negf %373 : vector<4x256xf32>
    %375 = math.exp %374 : vector<4x256xf32>
    %cst_190 = arith.constant 1.000000e+00 : f32
    %376 = vector.broadcast %cst_190 : f32 to vector<4x256xf32>
    %377 = arith.addf %376, %375 : vector<4x256xf32>
    %378 = arith.divf %376, %377 : vector<4x256xf32>
    %c0_191 = arith.constant 0 : index
    %c0_192 = arith.constant 0 : index
    %c0_193 = arith.constant 0 : index
    %379 = vector.load %arg15[%c0_191, %c0_192, %c0_193] : memref<1x4x256xf32, #tpu.memory_space<vmem>>, vector<1x4x256xf32>
    %380 = vector.shape_cast %379 : vector<1x4x256xf32> to vector<4x256xf32>
    %381 = vector.shape_cast %378 : vector<4x256xf32> to vector<1x4x256xf32>
    tpu.vector_store %arg15[%c0_191, %c0_192, %c0_193], %381 {strides = array<i32>} : memref<1x4x256xf32, #tpu.memory_space<vmem>>, vector<1x4x256xf32>,
    return
  }
  func.func @transform_0(%arg0: i32) -> (i32, i32) {
    %c0_i32 = arith.constant 0 : i32
    %c0_i32_0 = arith.constant 0 : i32
    %c0_i32_1 = arith.constant 0 : i32
    return %c0_i32, %c0_i32_0 : i32, i32
  }
  func.func @transform_1(%arg0: i32) -> (i32, i32, i32) {
    %c0_i32 = arith.constant 0 : i32
    %c0_i32_0 = arith.constant 0 : i32
    %c0_i32_1 = arith.constant 0 : i32
    return %arg0, %c0_i32, %c0_i32_0 : i32, i32, i32
  }
  func.func @transform_2(%arg0: i32) -> (i32, i32) {
    %c0_i32 = arith.constant 0 : i32
    %c0_i32_0 = arith.constant 0 : i32
    %c0_i32_1 = arith.constant 0 : i32
    return %c0_i32, %c0_i32_0 : i32, i32
  }
  func.func @transform_3(%arg0: i32) -> (i32, i32) {
    %c0_i32 = arith.constant 0 : i32
    %c0_i32_0 = arith.constant 0 : i32
    %c0_i32_1 = arith.constant 0 : i32
    return %c0_i32, %c0_i32_0 : i32, i32
  }
  func.func @transform_4(%arg0: i32) -> (i32, i32) {
    %c0_i32 = arith.constant 0 : i32
    %c0_i32_0 = arith.constant 0 : i32
    %c0_i32_1 = arith.constant 0 : i32
    return %c0_i32, %c0_i32_0 : i32, i32
  }
  func.func @transform_5(%arg0: i32) -> (i32, i32) {
    %c0_i32 = arith.constant 0 : i32
    %c0_i32_0 = arith.constant 0 : i32
    %c0_i32_1 = arith.constant 0 : i32
    return %c0_i32, %c0_i32_0 : i32, i32
  }
  func.func @transform_6(%arg0: i32) -> (i32, i32) {
    %c0_i32 = arith.constant 0 : i32
    %c0_i32_0 = arith.constant 0 : i32
    %c0_i32_1 = arith.constant 0 : i32
    return %c0_i32, %c0_i32_0 : i32, i32
  }
  func.func @transform_7(%arg0: i32) -> (i32, i32) {
    %c0_i32 = arith.constant 0 : i32
    %c0_i32_0 = arith.constant 0 : i32
    %c0_i32_1 = arith.constant 0 : i32
    return %c0_i32, %c0_i32_0 : i32, i32
  }
  func.func @transform_8(%arg0: i32) -> (i32, i32) {
    %c0_i32 = arith.constant 0 : i32
    %c0_i32_0 = arith.constant 0 : i32
    %c0_i32_1 = arith.constant 0 : i32
    return %c0_i32, %c0_i32_0 : i32, i32
  }
  func.func @transform_9(%arg0: i32) -> (i32, i32) {
    %c0_i32 = arith.constant 0 : i32
    %c0_i32_0 = arith.constant 0 : i32
    %c0_i32_1 = arith.constant 0 : i32
    return %c0_i32, %c0_i32_0 : i32, i32
  }
  func.func @transform_10(%arg0: i32) -> (i32, i32) {
    %c0_i32 = arith.constant 0 : i32
    %c0_i32_0 = arith.constant 0 : i32
    %c0_i32_1 = arith.constant 0 : i32
    return %c0_i32, %c0_i32_0 : i32, i32
  }
  func.func @transform_11(%arg0: i32) -> (i32, i32) {
    %c0_i32 = arith.constant 0 : i32
    %c0_i32_0 = arith.constant 0 : i32
    %c0_i32_1 = arith.constant 0 : i32
    return %c0_i32, %c0_i32_0 : i32, i32
  }
  func.func @transform_12(%arg0: i32) -> (i32, i32) {
    %c0_i32 = arith.constant 0 : i32
    %c0_i32_0 = arith.constant 0 : i32
    %c0_i32_1 = arith.constant 0 : i32
    return %c0_i32, %c0_i32_0 : i32, i32
  }
  func.func @transform_13(%arg0: i32) -> (i32, i32) {
    %c0_i32 = arith.constant 0 : i32
    %c0_i32_0 = arith.constant 0 : i32
    %c0_i32_1 = arith.constant 0 : i32
    return %c0_i32, %c0_i32_0 : i32, i32
  }
  func.func @transform_14(%arg0: i32) -> (i32, i32, i32) {
    %c0_i32 = arith.constant 0 : i32
    %c0_i32_0 = arith.constant 0 : i32
    %c0_i32_1 = arith.constant 0 : i32
    return %arg0, %c0_i32, %c0_i32_0 : i32, i32, i32
  }
}

</mosaic_0001>

<bundles_post_ra>
// kernel: tpu_custom_call.1
= control target key start
LH: loop header
LB: loop body
LE: loop exit
PB: predicated region body
PF: predicated region fallthrough
CT: control target
= control target key end

     0   :  { %s7643_s0 = inlined_call_operand.hbm [shape: s32[3,256], index: 0, kind: input, shape index: {}]   ;;  %s7644_s1 = inlined_call_operand.hbm [shape: f32[2,8,256], index: 1, kind: input, shape index: {}]   ;;  %s7645_s2 = inlined_call_operand.hbm [shape: bf16[8,72], index: 2, kind: input, shape index: {}]   ;;  %s7646_s3 = inlined_call_operand.vmem [shape: f32[8,1], index: 3, kind: input, shape index: {}]   ;;  %s7647_s4 = inlined_call_operand.hbm [shape: bf16[32,72], index: 4, kind: input, shape index: {}]   ;;  %s7648_s5 = inlined_call_operand.vmem [shape: f32[32,1], index: 5, kind: input, shape index: {}]   ;;  %s7649_s6 = inlined_call_operand.vmem [shape: bf16[64,288], index: 6, kind: input, shape index: {}]   ;;  %s7650_s7 = inlined_call_operand.vmem [shape: f32[64,1], index: 7, kind: input, shape index: {}]   ;;  %s7651_s8 = inlined_call_operand.vmem [shape: bf16[32,576], index: 8, kind: input, shape index: {}]   ;;  %s7652_s9 = inlined_call_operand.vmem [shape: f32[32,1], index: 9, kind: input, shape index: {}]   ;;  %s7653_s10 = inlined_call_operand.vmem [shape: bf16[8,288], index: 10, kind: input, shape index: {}]   ;;  %s7654_s11 = inlined_call_operand.vmem [shape: f32[8,1], index: 11, kind: input, shape index: {}]   ;;  %s7655_s12 = inlined_call_operand.vmem [shape: bf16[4,72], index: 12, kind: input, shape index: {}]   ;;  %s7656_s13 = inlined_call_operand.vmem [shape: f32[4,1], index: 13, kind: input, shape index: {}]   ;;  %s7657_s14 = inlined_call_operand.hbm [shape: f32[2,4,256], index: 14, kind: output, shape index: {}]  }
   0x1   :  { %7694 = sst [smem:[#allocation31_spill]] %s7643_s0 }
   0x2   :  { %7695 = sst [smem:[#allocation32_spill]] %s7653_s10 }
   0x3   :  { %7696 = sst [smem:[#allocation33_spill]] %s7655_s12 }
   0x4   :  { %7697 = sst [smem:[#allocation34_spill]] %s7656_s13 }
   0x5   :  { %7698 = sst [smem:[#allocation35_spill]] %s7657_s14 }
   0x6   :  { %19 = vsyncpa [#allocation4], 0 }
   0x7   :  { %20 = vsyncpa [#allocation7], 0 }
   0x8   :  { %22 = vsyncpa [#allocation7 + $0x1], 0 }
   0x9   :  { %23 = vsyncpa [#allocation10], 0 }
   0xa   :  { %24 = vsyncpa [#allocation5], 0 }
   0xb   :  { %26 = vsyncpa [#allocation5 + $0x1], 0  ;;  %s4834_s29 = smov 0   ;;  %s4836_s30 = smov 0  }
   0xc   :  { %s4838_s15 = smov 0   ;;  %s4840_s16 = smov 0  }
   0xd LB: > { %7699 = sst [smem:[#allocation17_spill]] %s4733_s29  ;;  %s4855_s17 = sadd.s32 4294967295, %s4745_s16   ;;  %s4745_s16 = sphi %s4840_s16, %s7785_s16   ;;  %s4741_s15 = sphi %s4838_s15, %s7784_s15   ;;  %s4737_s30 = sphi %s4836_s30, %s7783_s30   ;;  %s4733_s29 = sphi %s4834_s29, %s7782_s29  }
   0xe   : > { %s3534_s18 = sadd.s32 4294967294, %s4745_s16   ;;  %p73_p0 = scmp.ne.s32.totalorder %s4737_s30, %s4733_s29 }
   0xf   : > { %p7661_p1 = scmp.eq.s32.totalorder %s4855_s17, 0  ;;  %p355_p3 = scmp.eq.s32.totalorder %s3534_s18, 1 }
  0x10   : > { %p3535_p5 = scmp.ge.s32.totalorder %s4745_s16, 1  ;;  %p362_p7 = scmp.lt.s32.totalorder %s4745_s16, 3 }
  0x11   : > { %p4864_p4 = por %p7661_p1, %p73_p0  ;;  %p4869_p6 = por %p355_p3, %p73_p0 }
  0x12   : > { %p4874_p8 = pnand %p3535_p5, %p362_p7  ;;  %s4747_s22 = smov [#allocation8]  }
  0x13   : > { %s7700_s19 = scalar_select %p4864_p4, 1, 0 }
  0x14   : > { %s7701_s20 = scalar_select %p4869_p6, 1, 0 }
  0x15   : > { %s7703_s21 = scalar_select %p4874_p8, 1, 0 }
  0x16   : > { %7702 = sst [smem:[#allocation18_spill]] %s7701_s20  ;;  %s386_s23 = sshll.u32 %s4747_s22, 4  ;;  %s387_s23 = int_to_ptr.vmem [resolvable:$true] %s386_s23 }
  0x17   : > { %p3678_p10 = pneg %p4874_p8  ;;  %s4748_s24 = smov [#allocation3]  }
  0x18   : > { %s375_s25 = sshll.u32 %s4748_s24, 4  ;;  %s4749_s27 = smov [#allocation9]   ;;  %s4887_s25 = int_to_ptr.vmem [resolvable:$true] %s375_s25 }
  0x19   : > { %p4883_p11 = pnand %p3678_p10, %p7661_p1  ;;  %s399_s28 = sshll.u32 %s4749_s27, 4  ;;  %s4889_s28 = int_to_ptr.vmem [resolvable:$true] %s399_s28 }
  0x1a   : > { %s4553_s20 = scalar_lea.hbm %s7645_s2, 64 }
  0x1b   : > { %p4554_p12 = scmp.ne.s32.totalorder %s7645_s2, %s4553_s20  ;;  %p4899_p13 = pneg %p4883_p11 }
  0x1c   : > { %p4560_p5 = scmp.lt.u32.totalorder %s4553_s20, %s7645_s2 }
  0x1d   : > { %p4556_p0 = pnand %p4899_p13, %p4554_p12 }
  0x1f   : > { %p4557_p3 = pneg %p4556_p0 }
  0x21   : > { %p4562_p7 = pnand %p4560_p5, %p4557_p3 }
  0x23   : > { %4565 = shalt.err (!%p4562_p7)
}
  0x24   : > { %s4566_s18 = scalar_lea.vmem %s387_s23, 64  ;;  %p4574_p2 = scmp.lt.s32.totalorder %s387_s23, %s387_s23 }
  0x25   : > { %p4567_p10 = scmp.ne.s32.totalorder %s387_s23, %s4566_s18  ;;  %p4575_p6 = scmp.lt.s32.totalorder %s4566_s18, %s4566_s18 }
  0x27   : > { %p4569_p9 = pnand %p4567_p10, %p4899_p13  ;;  %p4576_p4 = por %p4575_p6, %p4574_p2 }
  0x29   : > { %p4570_p1 = pneg %p4569_p9 }
  0x2b   : > { %p4577_p8 = pnand %p4576_p4, %p4570_p1 }
  0x2d   : > { %4580 = shalt.err (!%p4577_p8)
}
  0x2e   : > { %3684 = dma.hbm_to_vmem [thread:$0]  (!%p4883_p11), %s7645_s2, 64, %s387_s23, [#allocation7]  }
  0x2f   : > { %s7706_s0 = sld [smem:[#allocation31_spill]] }
  0x35   : > { %s4581_s22 = scalar_lea.hbm %s7706_s0, 128 }
  0x36   : > { %p4582_p9 = scmp.ne.s32.totalorder %s7706_s0, %s4581_s22  ;;  %p4588_p1 = scmp.lt.u32.totalorder %s4581_s22, %s7706_s0 }
  0x38   : > { %p4584_p12 = pnand %p4582_p9, %p4899_p13 }
  0x3a   : > { %p4585_p2 = pneg %p4584_p12 }
  0x3c   : > { %p4590_p4 = pnand %p4588_p1, %p4585_p2 }
  0x3e   : > { %4593 = shalt.err (!%p4590_p4)
}
  0x3f   : > { %s4594_s23 = scalar_lea.vmem %s4887_s25, 128  ;;  %p4602_p3 = scmp.lt.s32.totalorder %s4887_s25, %s4887_s25 }
  0x40   : > { %p4595_p6 = scmp.ne.s32.totalorder %s4887_s25, %s4594_s23  ;;  %p4603_p5 = scmp.lt.s32.totalorder %s4594_s23, %s4594_s23 }
  0x42   : > { %p4597_p8 = pnand %p4595_p6, %p4899_p13  ;;  %p4604_p7 = por %p4603_p5, %p4602_p3 }
  0x44   : > { %p4598_p0 = pneg %p4597_p8 }
  0x46   : > { %p4605_p10 = pnand %p4604_p7, %p4598_p0 }
  0x48   : > { %4608 = shalt.err (!%p4605_p10)
}
  0x49   : > { %3681 = dma.hbm_to_vmem [thread:$0]  (!%p4883_p11), %s7706_s0, 128, %s4887_s25, [#allocation4]  }
  0x4a   : > { %s4609_s12 = scalar_lea.hbm %s7647_s4, 256 }
  0x4b   : > { %p4610_p9 = scmp.ne.s32.totalorder %s7647_s4, %s4609_s12  ;;  %p4616_p1 = scmp.lt.u32.totalorder %s4609_s12, %s7647_s4 }
  0x4d   : > { %p4612_p12 = pnand %p4610_p9, %p4899_p13 }
  0x4f   : > { %p4613_p2 = pneg %p4612_p12 }
  0x51   : > { %p4618_p4 = pnand %p4616_p1, %p4613_p2 }
  0x53   : > { %4621 = shalt.err (!%p4618_p4)
}
  0x54   : > { %s4622_s25 = scalar_lea.vmem %s4889_s28, 256  ;;  %p4630_p3 = scmp.lt.s32.totalorder %s4889_s28, %s4889_s28 }
  0x55   : > { %p4623_p6 = scmp.ne.s32.totalorder %s4889_s28, %s4622_s25  ;;  %p4631_p5 = scmp.lt.s32.totalorder %s4622_s25, %s4622_s25 }
  0x57   : > { %p4625_p8 = pnand %p4623_p6, %p4899_p13  ;;  %p4632_p7 = por %p4631_p5, %p4630_p3 }
  0x59   : > { %p4626_p0 = pneg %p4625_p8 }
  0x5b   : > { %p4633_p10 = pnand %p4632_p7, %p4626_p0 }
  0x5d   : > { %4636 = shalt.err (!%p4633_p10)
}
  0x5e   : > { %s4750_s23 = smov 64   ;;  %s4751_s24 = smov 4  }
  0x5f   : > { %3687 = dma.hbm_to_vmem [thread:$0]  (!%p4883_p11), %s7647_s4, 256, %s4889_s28, [#allocation10], %s4750_s23, %s4750_s23, %s4751_s24  }
  0x60   : > { %s4962_s14 = sadd.s32 1, %s4745_s16   ;;  %s60_s12 = sadd.s32 1, %s4741_s15 }
  0x61   : > { %s57_s29 = ssub.s32 %s4745_s16, %s4962_s14  ;;  %p67_p9 = scmp.ne.s32.totalorder %s4741_s15, %s4737_s30 }
  0x62   : > { %p58_p13 = scmp.eq.s32.totalorder %s57_s29, 0  ;;  %p68_p12 = scmp.eq.s32.totalorder %s4745_s16, 0 }
  0x63   : > { %p3699_p2 = scmp.lt.s32.totalorder %s4745_s16, 2  ;;  %p7707_p4 = scmp.eq.s32.totalorder %s4855_s17, 1 }
  0x64   : > { %s4972_s20 = scalar_select %p58_p13, %s4741_s15, %s60_s12  }
  0x65   : > { %p69_p1 = por %p68_p12, %p67_p9  ;;  %p4976_p6 = por %p7707_p4, %p67_p9 }
  0x66   : > { %s440_s26 = sand.u32 1, %s4745_s16   ;;  %s442_s27 = sand.u32 1, %s4741_s15  }
  0x67   : > { %s3540_s28 = sshll.u32 %s442_s27, 4  ;;  %s3598_s18 = sshll.u32 %s4745_s16, 8 }
  0x68   : > { %s4986_s24 = scalar_lea.hbm %s7644_s1, %s3598_s18  ;;  %s444_s10 = scalar_lea.vmem [#allocation6], %s3540_s28 }
  0x69   : > { %s452_s13 = sshll.u32 %s444_s10, 4  ;;  %p4990_p11 = pnand %p3699_p2, %p69_p1  ;;  %s4988_s13 = int_to_ptr.vmem [resolvable:$true] %s452_s13 }
  0x6a   : > { %s441_s12 = scalar_lea.sflag [#allocation7], %s440_s26  ;;  %s4637_s27 = scalar_lea.hbm %s4986_s24, 256 }
  0x6b   : > { %p4638_p8 = scmp.ne.s32.totalorder %s4986_s24, %s4637_s27  ;;  %p4639_p0 = pneg %p4990_p11 }
  0x6c   : > { %s4642_s25 = scalar_lea.hbm %s7644_s1, 512  ;;  %p4643_p7 = scmp.lt.u32.totalorder %s4986_s24, %s7644_s1 }
  0x6d   : > { %p4640_p3 = pnand %p4639_p0, %p4638_p8  ;;  %p4644_p10 = scmp.lt.u32.totalorder %s4642_s25, %s4637_s27 }
  0x6e   : > { %p4646_p9 = scmp.lt.u32.totalorder %s4637_s27, %s4986_s24 }
  0x6f   : > { %p4641_p5 = pneg %p4640_p3  ;;  %p4645_p13 = por %p4644_p10, %p4643_p7 }
  0x71   : > { %p4647_p12 = por %p4646_p9, %p4645_p13 }
  0x73   : > { %p4648_p2 = pnand %p4647_p12, %p4641_p5 }
  0x75   : > { %4651 = shalt.err (!%p4648_p2)
}
  0x76   : > { %s4652_s26 = scalar_lea.vmem %s4988_s13, 256  ;;  %s4752_s18 = smov [#allocation6]  }
  0x77   : > { %p4653_p1 = scmp.ne.s32.totalorder %s4988_s13, %s4652_s26  ;;  %s4657_s28 = sshll.u32 %s4752_s18, 4  ;;  %s4658_s28 = int_to_ptr.vmem [resolvable:$false] %s4657_s28 }
  0x78   : > { %s4659_s23 = scalar_lea.vmem %s4658_s28, 512  ;;  %p4660_p3 = scmp.lt.s32.totalorder %s4988_s13, %s4658_s28 }
  0x79   : > { %p4655_p4 = pnand %p4653_p1, %p4639_p0  ;;  %p4661_p7 = scmp.lt.s32.totalorder %s4659_s23, %s4652_s26 }
  0x7b   : > { %p4656_p8 = pneg %p4655_p4  ;;  %p4662_p10 = por %p4661_p7, %p4660_p3 }
  0x7d   : > { %p4663_p13 = pnand %p4662_p10, %p4656_p8 }
  0x7f   : > { %4666 = shalt.err (!%p4663_p13)
}
  0x80   : > { %3691 = dma.hbm_to_vmem [thread:$0]  (!%p4990_p11), %s4986_s24, 256, %s4988_s13, %s441_s12  }
  0x81   : > { %p7710_p5 = scmp.ne.s32.totalorder %s7703_s21, 0 }
  0x83   : > { %461 = sbr.rel (%p7710_p5) target bundleno = 3460 (0xd84), region = 76 }
  0x8a   : > { %p7711_p0 = scmp.eq.s32.totalorder %s4855_s17, 0 }
  0x8c   : > { %4712 = dma.done.wait (%p7711_p0), [#allocation4], 128   ;;  %p7712_p9 = pmov %p7711_p0 }
  0x8d   : > { %s467_s27 = sand.u32 1, %s4855_s17   ;;  %s5027_s25 = sand.u32 1, %s4737_s30  }
  0x8e   : > { %4714 = vsyncadd (%p7712_p9), [#allocation4], 4294967168  ;;  %s3545_s29 = sshll.u32 %s5027_s25, 4  ;;  %s468_s10 = scalar_lea.sflag [#allocation7], %s467_s27 }
  0x8f   : > { %s5030_s26 = scalar_lea.vmem [#allocation6], %s3545_s29  ;;  %p7713_p11 = scmp.ne.s32.totalorder %s7700_s19, 0 }
  0x91   : > { %4716 = dma.done.wait (%p7713_p11), %s468_s10, 256  }
  0x92   : > { %4718 = vsyncadd (%p7713_p11), %s468_s10, 4294967040  ;;  %p7714_p12 = pmov %p7711_p0 }
  0x93   : > { %p7715_p2 = pmov %p7711_p0 }
  0x94   : > { %4720 = dma.done.wait (%p7714_p12), [#allocation7], 64  }
  0x95   : > { %4722 = vsyncadd (%p7715_p2), [#allocation7], 4294967232  ;;  %p7716_p1 = pmov %p7711_p0 }
  0x96   : > { %p7717_p4 = pmov %p7711_p0 }
  0x97   : > { %4724 = dma.done.wait (%p7716_p1), [#allocation10], 256  }
  0x98   : > { %4726 = vsyncadd (%p7717_p4), [#allocation10], 4294967040  ;;  %v529_v0 = vlaneseq  ;;  %v7673_v1 = vmov 0   ;;  %v525_v5 = vld [vmem:[#allocation3] sm:$0x77]  ;;  %v567_v6 = vld [vmem:[%s5030_s26] sm:$0xff] }
  0x99   : > { %832 = vmatprep.mubr.bf16.mxu0 %v7673_v1  ;;  %3786 = vset.pattern.permute.xlu0 %v7673_v1  ;;  %v568_v7 = vld [vmem:[%s5030_s26 + $0x8] sm:$0xff]  ;;  %vm526_vm0 = vcmp.eq.s32.totalorder %v525_v5, 0  ;;  %v3549_v9 = vadd.s32 4294967295, %v525_v5  ;;  %v724_v12 = vpack.c.bf16 %v567_v6, %v567_v6  ;;  %s7671_s19 = smov 1   ;;  %s7669_s21 = smov 112   ;;  %vm561_vm5 = vcmp.eq.s32.totalorder %v525_v5, 15 }
  0x9a   : > { %v5046_v2 = vshrl.u32 %v529_v0, 7  ;;  %1059 = vmatprep.mubr.bf16.mxu1 %v7673_v1  ;;  %3827 = vset.pattern.permute.xlu1 %v7673_v1  ;;  %v725_v10 = vpack.c.bf16 %v568_v7, %v568_v7  ;;  %v5054_v11 = vpack.i.bf16 %v568_v7, %v567_v6  ;;  %s7665_s24 = smov 16   ;;  %v5063_v17 = vand.u32 127, %v529_v0  ;;  %s7667_s13 = smov 127  }
  0x9b   : > { %v528_v13 = vsel %vm526_vm0, 255, %v3549_v9  ;;  %726 = vst [vmem:[#allocation2 + $0x20] sm:$0xf] %v724_v12  ;;  %v7720_v54 = vmov 0  ;;  %v7724_v57 = vmov 0  ;;  %s7737_s28 = smov 112  }
  0x9c   : > { %v531_v3 = vsub.s32 2, %v5046_v2  ;;  %v535_v4 = vsub.s32 6, %v5046_v2  ;;  %727 = vst [vmem:[#allocation2 + $0x28] sm:$0xf] %v725_v10  ;;  %3747 = vrot.lane.b32.xlu1 %v5054_v11, %s7669_s21  ;;  %vm543_vm1 = vcmp.lt.s32.totalorder %v5063_v17, 1  ;;  %vm573_vm4 = vcmp.lt.s32.totalorder %v5063_v17, 112 }
  0x9d   : > { %v586_v29 = vsub.s32 0, %v5046_v2  ;;  %v590_v30 = vsub.s32 4, %v5046_v2  ;;  %vm580_vm7 = vcmp.lt.s32.totalorder %v5063_v17, 16  ;;  %v5077_v34 = vsub.s32 1, %v5046_v2  ;;  %s7738_s23 = smov 127   ;;  %s7739_s27 = smov 1  }
  0x9e   : > { %v532_v8 = vrot.slane %v525_v5, %v531_v3  ;;  %v536_v14 = vrot.slane %v525_v5, %v535_v4  ;;  %v549_v15 = vrot.slane %v528_v13, %v531_v3  ;;  %v553_v16 = vrot.slane %v528_v13, %v535_v4  ;;  %s7772_s29 = sld [smem:[#allocation32_spill]]  ;;  %s3599_s18 = sshll.u32 %s4855_s17, 7 }
  0x9f   : > { %v645_v35 = vsub.s32 5, %v5046_v2  ;;  %s4758_s17 = smov [#allocation11]  }
  0xa0   : > { %537 = vrot.lane.b32.xlu0 %v532_v8, %s7671_s19  ;;  %3752 = vrot.lane.b32.xlu1 %v5054_v11, %s7665_s24 }
  0xa4   : > { %539 = vrot.lane.b32.xlu0 %v536_v14, %s7671_s19  ;;  %v783_v14 = vld [vmem:[%s7646_s3] sm:$0xff]  ;;  %s7773_s10 = smov %s7772_s29 }
 0x10e   : > { %v3748_v19 = vpop.permute.xlu1 %3747 }
 0x10f   : > { %v3750_v27 = vunpack.i.h.bf16 %v3748_v19  ;;  %v3749_v28 = vunpack.i.l.bf16 %v3748_v19 }
 0x111   : > { %v574_v37 = vsel %vm573_vm4, %v3749_v28, %v3750_v27  ;;  %v575_v41 = vsel %vm573_vm4, %v3750_v27, %v3749_v28 }
 0x112   : > { %v538_v18 = vpop.permute.xlu0 %537  ;;  %v3753_v25 = vpop.permute.xlu1 %3752 }
 0x113   : > { %v3755_v32 = vunpack.i.h.bf16 %v3753_v25  ;;  %v3754_v33 = vunpack.i.l.bf16 %v3753_v25 }
 0x115   : > { %v581_v45 = vsel %vm580_vm7, %v3754_v33, %v3755_v32  ;;  %v582_v53 = vsel %vm580_vm7, %v3755_v32, %v3754_v33 }
 0x116   : > { %v540_v20 = vpop.permute.xlu0 %539 }
 0x117   : > { %v544_v21 = vsel %vm543_vm1, %v538_v18, %v540_v20  ;;  %v545_v22 = vsel %vm543_vm1, %v540_v20, %v538_v18 }
 0x118   : > { %vm554_vm2 = vcmp.ne.s32.totalorder %v545_v22, %v549_v15  ;;  %vm555_vm3 = vcmp.ne.s32.totalorder %v544_v21, %v553_v16 }
 0x119   : > { %v556_v23 = vsel %vm554_vm2, 1, %v7673_v1  ;;  %v557_v24 = vsel %vm555_vm3, 1, %v7673_v1  ;;  %vm629_vm2 = vcmp.lt.s32.totalorder %v5063_v17, 127 }
 0x11a   : > { %v558_v26 = vcombine.low %v556_v23, %v557_v24 }
 0x11c   : > { %vm559_vm6 = vcmp.ne.s32.totalorder %v558_v26, 0  ;;  %v563_v31 = vrot.slane %v558_v26, 7 }
 0x11d   : > { %vm560_vm8 = vmxor %vm526_vm0, %vm559_vm6 }
 0x11e   : > { %vm562_vm9 = vmxor %vm561_vm5, %vm559_vm6  ;;  %vm564_vm10 = vcmp.ne.s32.totalorder %v563_v31, 0  ;;  %v583_v36 = vsel %vm560_vm8, 1, %v7673_v1 }
 0x11f   : > { %vm565_vm11 = vmxor %vm526_vm0, %vm564_vm10  ;;  %v587_v38 = vrot.slane %v583_v36, %v586_v29  ;;  %v591_v39 = vrot.slane %v583_v36, %v590_v30  ;;  %v604_v40 = vsel %vm562_vm9, 1, %v7673_v1  ;;  %vm793_vm9 = vcmask 1043456  }
 0x120   : > { %vm566_vm12 = vmxor %vm561_vm5, %vm564_vm10  ;;  %v608_v42 = vrot.slane %v604_v40, %v586_v29  ;;  %v612_v43 = vrot.slane %v604_v40, %v590_v30  ;;  %v638_v44 = vsel %vm565_vm11, 1, %v7673_v1  ;;  %vm789_vm10 = vcmask 588800  }
 0x121   : > { %v5093_v46 = vrot.slane %v587_v38, %v586_v29  ;;  %v599_v47 = vrot.slane %v591_v39, %v586_v29  ;;  %v642_v48 = vrot.slane %v638_v44, %v5077_v34  ;;  %v646_v49 = vrot.slane %v638_v44, %v645_v35 }
 0x122   : > { %v5096_v50 = vrot.slane %v608_v42, %v586_v29  ;;  %v620_v51 = vrot.slane %v612_v43, %v586_v29  ;;  %v659_v52 = vsel %vm566_vm12, 1, %v7673_v1  ;;  %vm1576_vm11 = vcmask 261120  }
 0x123   : > { %7718 = vst [vmem:[#allocation19_spill] sm:$0xff] %v5093_v46  ;;  %vm600_vm13 = vcmp.eq.s32.totalorder %v5093_v46, 1  ;;  %vm5102_vm14 = vcmp.eq.s32.totalorder %v599_v47, 1  ;;  %v5107_v55 = vrot.slane %v642_v48, %v5077_v34  ;;  %v654_v56 = vrot.slane %v646_v49, %v5077_v34 }
 0x124   : > { %7719 = vst [vmem:[#allocation20_spill] sm:$0xff] %v5096_v50  ;;  %v7721_v54 = vsel %vm5102_vm14, 4294967295, %v7720_v54  ;;  %vm621_vm15 = vcmp.eq.s32.totalorder %v5096_v50, 1  ;;  %vm5111_vm0 = vcmp.eq.s32.totalorder %v620_v51, 1  ;;  %v663_v58 = vrot.slane %v659_v52, %v5077_v34 }
 0x125   : > { %7722 = vst [vmem:[#allocation21_spill] sm:$0xff] %v7721_v54  ;;  %7723 = vst [vmem:[#allocation22_spill] sm:$0xff] %v5107_v55  ;;  %v7725_v57 = vsel %vm5111_vm0, 4294967295, %v7724_v57  ;;  %v667_v59 = vrot.slane %v659_v52, %v645_v35  ;;  %v602_v60 = vsel %vm600_vm13, %v574_v37, %v582_v53  ;;  %v603_v61 = vsel %vm5102_vm14, %v575_v41, %v581_v45 }
 0x126   : > { %7726 = vst [vmem:[#allocation23_spill] sm:$0xff] %v7725_v57  ;;  %v5121_v62 = vrot.slane %v663_v58, %v5077_v34  ;;  %v685_v0 = vpack.c.bf16 %v603_v61, %v603_v61  ;;  %v3766_v2 = vpack.i.bf16 %v603_v61, %v602_v60  ;;  %v684_v3 = vpack.c.bf16 %v602_v60, %v602_v60 }
 0x127   : > { %v675_v63 = vrot.slane %v667_v59, %v5077_v34  ;;  %v623_v4 = vsel %vm621_vm15, %v582_v53, %v574_v37  ;;  %v624_v5 = vsel %vm5111_vm0, %v581_v45, %v575_v41  ;;  %vm655_vm3 = vcmp.eq.s32.totalorder %v5107_v55, 1 }
 0x128   : > { %v689_v6 = vrot.slane %v685_v0, 4  ;;  %3767 = vrot.lane.b32.xlu1 %v3766_v2, %s7671_s19  ;;  %v759_v7 = vpack.c.bf16 %v624_v5, %v624_v5  ;;  %v688_v8 = vrot.slane %v684_v3, 4  ;;  %3757 = vrot.lane.b32.xlu0 %v3766_v2, %s7667_s13  ;;  %v758_v9 = vpack.c.bf16 %v623_v4, %v623_v4 }
 0x129   : > { %v3781_v13 = vpack.i.bf16 %v624_v5, %v623_v4  ;;  %vm5141_vm5 = vcmp.eq.s32.totalorder %v654_v56, 1  ;;  %vm676_vm6 = vcmp.eq.s32.totalorder %v5121_v62, 1  ;;  %vm5150_vm8 = vcmp.eq.s32.totalorder %v675_v63, 1 }
 0x12a   : > { %693 = vst [vmem:[#allocation2 + $0x8] sm:$0xf0] %v689_v6  ;;  %v763_v10 = vrot.slane %v759_v7, 4  ;;  %692 = vst [vmem:[#allocation2] sm:$0xf0] %v688_v8  ;;  %v762_v12 = vrot.slane %v758_v9, 4 }
 0x12b   : > { %vm2565_vm12 = vcmask 523264  }
 0x12c   : > { %3772 = vrot.lane.b32.xlu1 %v5054_v11, %s7671_s19  ;;  %767 = vst [vmem:[#allocation2 + $0x38] sm:$0xf0] %v763_v10  ;;  %3762 = vrot.lane.b32.xlu0 %v5054_v11, %s7667_s13  ;;  %766 = vst [vmem:[#allocation2 + $0x30] sm:$0xf0] %v762_v12  ;;  %v7727_v11 = vmov 0 }
 0x12d   : > { %v7728_v11 = vsel %vm5141_vm5, 4294967295, %v7727_v11 }
 0x12e   : > { %7729 = vst [vmem:[#allocation24_spill] sm:$0xff] %v7728_v11 }
 0x130   : > { %3782 = vrot.lane.b32.xlu1 %v3781_v13, %s7671_s19  ;;  %3777 = vrot.lane.b32.xlu0 %v3781_v13, %s7667_s13 }
 0x134   : > { %786 = vperm.xlu0 %3786, %v783_v14  }
 0x19a   : > { %v3768_v15 = vpop.permute.xlu1 %3767  ;;  %v3758_v19 = vpop.permute.xlu0 %3757 }
 0x19b   : > { %v3770_v16 = vunpack.i.h.bf16 %v3768_v15  ;;  %v3769_v18 = vunpack.i.l.bf16 %v3768_v15  ;;  %v3760_v20 = vunpack.i.h.bf16 %v3758_v19  ;;  %v3759_v21 = vunpack.i.l.bf16 %v3758_v19 }
 0x19d   : > { %v636_v22 = vsel %vm543_vm1, %v3769_v18, %v3770_v16  ;;  %v637_v23 = vsel %vm543_vm1, %v3770_v16, %v3769_v18  ;;  %v630_v25 = vsel %vm629_vm2, %v3759_v21, %v3760_v20  ;;  %v631_v26 = vsel %vm629_vm2, %v3760_v20, %v3759_v21 }
 0x19e   : > { %v3773_v27 = vpop.permute.xlu1 %3772  ;;  %v657_v28 = vsel %vm655_vm3, %v630_v25, %v637_v23  ;;  %v658_v29 = vsel %vm5141_vm5, %v631_v26, %v636_v22  ;;  %v678_v30 = vsel %vm676_vm6, %v637_v23, %v630_v25  ;;  %v679_v31 = vsel %vm5150_vm8, %v636_v22, %v631_v26  ;;  %v3763_v32 = vpop.permute.xlu0 %3762 }
 0x19f   : > { %v680_v33 = vpack.c.bf16 %v657_v28, %v657_v28  ;;  %v681_v34 = vpack.c.bf16 %v658_v29, %v658_v29  ;;  %v694_v35 = vpack.c.bf16 %v678_v30, %v678_v30  ;;  %v695_v36 = vpack.c.bf16 %v679_v31, %v679_v31 }
 0x1a0   : > { %v3775_v37 = vunpack.i.h.bf16 %v3773_v27  ;;  %v3774_v38 = vunpack.i.l.bf16 %v3773_v27  ;;  %v3765_v39 = vunpack.i.h.bf16 %v3763_v32  ;;  %v3764_v40 = vunpack.i.l.bf16 %v3763_v32  ;;  %v772_v32 = vld [vmem:[#allocation8] sm:$0xf] }
 0x1a1   : > { %682 = vst [vmem:[#allocation2] sm:$0xf] %v680_v33  ;;  %683 = vst [vmem:[#allocation2 + $0x8] sm:$0xf] %v681_v34 }
 0x1a2   : > { %696 = vst [vmem:[#allocation2 + $0x10] sm:$0xf] %v694_v35  ;;  %697 = vst [vmem:[#allocation2 + $0x18] sm:$0xf] %v695_v36  ;;  %v708_v41 = vsel %vm543_vm1, %v3774_v38, %v3775_v37  ;;  %v709_v42 = vsel %vm543_vm1, %v3775_v37, %v3774_v38  ;;  %v702_v43 = vsel %vm629_vm2, %v3764_v40, %v3765_v39  ;;  %v3783_v45 = vpop.permute.xlu1 %3782  ;;  %v3778_v47 = vpop.permute.xlu0 %3777 }
 0x1a3   : > { %v703_v44 = vsel %vm629_vm2, %v3765_v39, %v3764_v40  ;;  %v710_v48 = vsel %vm655_vm3, %v702_v43, %v709_v42  ;;  %v712_v51 = vsel %vm676_vm6, %v709_v42, %v702_v43  ;;  %v3785_v60 = vunpack.i.h.bf16 %v3783_v45 }
 0x1a4   : > { %v711_v49 = vsel %vm5141_vm5, %v703_v44, %v708_v41  ;;  %v713_v52 = vsel %vm5150_vm8, %v708_v41, %v703_v44  ;;  %v714_v53 = vpack.c.bf16 %v710_v48, %v710_v48  ;;  %v728_v58 = vpack.c.bf16 %v712_v51, %v712_v51 }
 0x1a5   : > { %v715_v56 = vpack.c.bf16 %v711_v49, %v711_v49  ;;  %v729_v59 = vpack.c.bf16 %v713_v52, %v713_v52  ;;  %v3784_v61 = vunpack.i.l.bf16 %v3783_v45  ;;  %v3780_v63 = vunpack.i.h.bf16 %v3778_v47 }
 0x1a6   : > { %v3779_v0 = vunpack.i.l.bf16 %v3778_v47  ;;  %v718_v2 = vrot.slane %v714_v53, 4  ;;  %v732_v4 = vrot.slane %v728_v58, 4 }
 0x1a7   : > { %v719_v3 = vrot.slane %v715_v56, 4  ;;  %v733_v5 = vrot.slane %v729_v59, 4  ;;  %v748_v6 = vsel %vm543_vm1, %v3784_v61, %v3785_v60  ;;  %v749_v7 = vsel %vm543_vm1, %v3785_v60, %v3784_v61 }
 0x1a8   : > { %v742_v8 = vsel %vm629_vm2, %v3779_v0, %v3780_v63  ;;  %v743_v9 = vsel %vm629_vm2, %v3780_v63, %v3779_v0  ;;  %722 = vst [vmem:[#allocation2 + $0x10] sm:$0xf0] %v718_v2  ;;  %736 = vst [vmem:[#allocation2 + $0x20] sm:$0xf0] %v732_v4  ;;  %v774_v15 = vld [vmem:[#allocation2 + $0x8] sm:$0xff]  ;;  %v773_v16 = vld [vmem:[#allocation2] sm:$0xff] }
 0x1a9   : > { %723 = vst [vmem:[#allocation2 + $0x18] sm:$0xf0] %v719_v3  ;;  %737 = vst [vmem:[#allocation2 + $0x28] sm:$0xf0] %v733_v5  ;;  %v750_v10 = vsel %vm655_vm3, %v742_v8, %v749_v7  ;;  %v751_v12 = vsel %vm5141_vm5, %v743_v9, %v748_v6  ;;  %v752_v13 = vsel %vm676_vm6, %v749_v7, %v742_v8  ;;  %800 = vmatprep.subr.bf16.mxu0 %v774_v15  ;;  %v982_v15 = vld [vmem:[%s7648_s5 + $0x8] sm:$0xff] }
 0x1aa   : > { %v753_v14 = vsel %vm5150_vm8, %v748_v6, %v743_v9  ;;  %v754_v18 = vpack.c.bf16 %v750_v10, %v750_v10  ;;  %v755_v19 = vpack.c.bf16 %v751_v12, %v751_v12  ;;  %v768_v20 = vpack.c.bf16 %v752_v13, %v752_v13  ;;  %801 = vmatpush1.bf16.msra.mxu0 %v773_v16  ;;  %v981_v13 = vld [vmem:[%s7648_s5] sm:$0xff]  ;;  %v984_v16 = vld [vmem:[%s7648_s5 + $0x18] sm:$0xff] }
 0x1ab   : > { %v769_v21 = vpack.c.bf16 %v753_v14, %v753_v14  ;;  %v983_v14 = vld [vmem:[%s7648_s5 + $0x10] sm:$0xff] }
 0x1ac   : > { %756 = vst [vmem:[#allocation2 + $0x30] sm:$0xf] %v754_v18  ;;  %757 = vst [vmem:[#allocation2 + $0x38] sm:$0xf] %v755_v19 }
 0x1ad   : > { %770 = vst [vmem:[#allocation2 + $0x40] sm:$0xf] %v768_v20  ;;  %771 = vst [vmem:[#allocation2 + $0x48] sm:$0xf] %v769_v21 }
 0x1af   : > { %v775_v23 = vld [vmem:[#allocation2 + $0x10] sm:$0xff]  ;;  %v777_v26 = vld [vmem:[#allocation2 + $0x20] sm:$0xff] }
 0x1b0   : > { %v776_v22 = vld [vmem:[#allocation2 + $0x18] sm:$0xff]  ;;  %v778_v25 = vld [vmem:[#allocation2 + $0x28] sm:$0xff] }
 0x1b1   : > { %802 = vmatprep.subr.bf16.mxu0 %v776_v22 }
 0x1b2   : > { %803 = vmatpush1.bf16.msra.mxu0 %v775_v23 }
 0x1b3   : > { %804 = vmatprep.subr.bf16.mxu0 %v778_v25  ;;  %v780_v27 = vld [vmem:[#allocation2 + $0x38] sm:$0xff]  ;;  %v779_v28 = vld [vmem:[#allocation2 + $0x30] sm:$0xff]  ;;  %v787_v33 = vpop.permute.xlu0 %786 }
 0x1b4   : > { %v782_v29 = vld [vmem:[#allocation2 + $0x48] sm:$0xf]  ;;  %v781_v30 = vld [vmem:[#allocation2 + $0x40] sm:$0xf] }
 0x1b5   : > { %v795_v31 = vsel %vm793_vm9, %v781_v30, 0 }
 0x1b6   : > { %805 = vmatpush1.bf16.msra.mxu0 %v777_v26 }
 0x1b7   : > { %806 = vmatprep.subr.bf16.mxu0 %v780_v27 }
 0x1ba   : > { %807 = vmatpush1.bf16.msra.mxu0 %v779_v28 }
 0x1bb   : > { %3550 = vmatprep.subr.msk.bf16.mxu0 %vm793_vm9, %v782_v29 }
 0x1be   : > { %809 = vmatpush1.bf16.msra.mxu0 %v795_v31 }
 0x1c1   : > { %3551 = vmatmul.mubr.msk.bf16.vlgmr.msra.gmra.mrb[0].mxu0 %vm789_vm10, %v772_v32 }
 0x294   : > { %v834_v34 = vpop.f32.mrb[0].mxu0 }
 0x295   : > { %v835_v35 = vadd.f32 %v834_v34, %v787_v33  ;;  %v836_v36 = vpop.f32.mrb[1].mxu0 }
 0x296   : > { %v837_v37 = vadd.f32 %v836_v36, %v787_v33  ;;  %v838_v38 = vpop.f32.mrb[2].mxu0 }
 0x297   : > { %v841_v39 = vmax.f32 %v835_v35, 0.0  ;;  %v839_v40 = vpop.f32.mrb[3].mxu0 }
 0x298   : > { %v842_v41 = vmax.f32 %v837_v37, 0.0 }
 0x299   : > { %v919_v42 = vpack.c.bf16 %v841_v39, %v841_v39 }
 0x29a   : > { %v920_v43 = vpack.c.bf16 %v842_v41, %v842_v41  ;;  %v3787_v44 = vpack.i.bf16 %v842_v41, %v841_v39 }
 0x29b   : > { %921 = vst [vmem:[#allocation2 + $0x20] sm:$0xf] %v919_v42 }
 0x29c   : > { %922 = vst [vmem:[#allocation2 + $0x28] sm:$0xf] %v920_v43  ;;  %3788 = vrot.lane.b32.xlu1 %v3787_v44, %s7669_s21 }
 0x2a0   : > { %3793 = vrot.lane.b32.xlu1 %v3787_v44, %s7665_s24  ;;  %s7732_s24 = smov 16  }
 0x30e   : > { %v3789_v45 = vpop.permute.xlu1 %3788 }
 0x30f   : > { %v3791_v47 = vunpack.i.h.bf16 %v3789_v45  ;;  %v3790_v48 = vunpack.i.l.bf16 %v3789_v45 }
 0x311   : > { %v847_v53 = vsel %vm573_vm4, %v3790_v48, %v3791_v47  ;;  %v848_v56 = vsel %vm573_vm4, %v3791_v47, %v3790_v48 }
 0x312   : > { %v3794_v49 = vpop.permute.xlu1 %3793 }
 0x313   : > { %v3796_v51 = vunpack.i.h.bf16 %v3794_v49  ;;  %v3795_v52 = vunpack.i.l.bf16 %v3794_v49 }
 0x315   : > { %v853_v58 = vsel %vm580_vm7, %v3795_v52, %v3796_v51  ;;  %v854_v59 = vsel %vm580_vm7, %v3796_v51, %v3795_v52 }
 0x316   : > { %v855_v60 = vsel %vm600_vm13, %v847_v53, %v854_v59  ;;  %v856_v61 = vsel %vm5102_vm14, %v848_v56, %v853_v58  ;;  %v857_v63 = vsel %vm621_vm15, %v854_v59, %v847_v53  ;;  %v858_v0 = vsel %vm5111_vm0, %v853_v58, %v848_v56 }
 0x317   : > { %v880_v2 = vpack.c.bf16 %v856_v61, %v856_v61  ;;  %v3807_v3 = vpack.i.bf16 %v856_v61, %v855_v60  ;;  %v879_v4 = vpack.c.bf16 %v855_v60, %v855_v60  ;;  %v954_v5 = vpack.c.bf16 %v858_v0, %v858_v0 }
 0x318   : > { %v953_v6 = vpack.c.bf16 %v857_v63, %v857_v63  ;;  %v3822_v12 = vpack.i.bf16 %v858_v0, %v857_v63 }
 0x319   : > { %v884_v7 = vrot.slane %v880_v2, 4  ;;  %3808 = vrot.lane.b32.xlu1 %v3807_v3, %s7671_s19  ;;  %v883_v8 = vrot.slane %v879_v4, 4  ;;  %3798 = vrot.lane.b32.xlu0 %v3807_v3, %s7667_s13  ;;  %v958_v9 = vrot.slane %v954_v5, 4 }
 0x31a   : > { %v957_v10 = vrot.slane %v953_v6, 4 }
 0x31b   : > { %888 = vst [vmem:[#allocation2 + $0x8] sm:$0xf0] %v884_v7  ;;  %887 = vst [vmem:[#allocation2] sm:$0xf0] %v883_v8 }
 0x31c   : > { %962 = vst [vmem:[#allocation2 + $0x38] sm:$0xf0] %v958_v9  ;;  %961 = vst [vmem:[#allocation2 + $0x30] sm:$0xf0] %v957_v10 }
 0x31d   : > { %3813 = vrot.lane.b32.xlu1 %v3787_v44, %s7671_s19  ;;  %3803 = vrot.lane.b32.xlu0 %v3787_v44, %s7667_s13 }
 0x321   : > { %3823 = vrot.lane.b32.xlu1 %v3822_v12, %s7671_s19  ;;  %3818 = vrot.lane.b32.xlu0 %v3822_v12, %s7667_s13 }
 0x325   : > { %987 = vperm.xlu0 %3786, %v981_v13   ;;  %992 = vperm.xlu1 %3827, %v982_v15  }
 0x329   : > { %997 = vperm.xlu0 %3786, %v983_v14   ;;  %1002 = vperm.xlu1 %3827, %v984_v16  }
 0x38b   : > { %v3809_v18 = vpop.permute.xlu1 %3808  ;;  %v3799_v19 = vpop.permute.xlu0 %3798 }
 0x38c   : > { %v3811_v20 = vunpack.i.h.bf16 %v3809_v18  ;;  %v3810_v21 = vunpack.i.l.bf16 %v3809_v18  ;;  %v3801_v22 = vunpack.i.h.bf16 %v3799_v19  ;;  %v3800_v23 = vunpack.i.l.bf16 %v3799_v19 }
 0x38e   : > { %v869_v25 = vsel %vm543_vm1, %v3810_v21, %v3811_v20  ;;  %v870_v26 = vsel %vm543_vm1, %v3811_v20, %v3810_v21  ;;  %v863_v27 = vsel %vm629_vm2, %v3800_v23, %v3801_v22  ;;  %v864_v28 = vsel %vm629_vm2, %v3801_v22, %v3800_v23 }
 0x38f   : > { %v871_v29 = vsel %vm655_vm3, %v863_v27, %v870_v26  ;;  %v872_v30 = vsel %vm5141_vm5, %v864_v28, %v869_v25  ;;  %v873_v31 = vsel %vm676_vm6, %v870_v26, %v863_v27  ;;  %v874_v32 = vsel %vm5150_vm8, %v869_v25, %v864_v28  ;;  %v3814_v33 = vpop.permute.xlu1 %3813  ;;  %v3804_v34 = vpop.permute.xlu0 %3803 }
 0x390   : > { %v875_v35 = vpack.c.bf16 %v871_v29, %v871_v29  ;;  %v876_v36 = vpack.c.bf16 %v872_v30, %v872_v30  ;;  %v889_v37 = vpack.c.bf16 %v873_v31, %v873_v31  ;;  %v890_v38 = vpack.c.bf16 %v874_v32, %v874_v32 }
 0x391   : > { %v3816_v39 = vunpack.i.h.bf16 %v3814_v33  ;;  %v3815_v40 = vunpack.i.l.bf16 %v3814_v33  ;;  %v3806_v41 = vunpack.i.h.bf16 %v3804_v34  ;;  %v3805_v42 = vunpack.i.l.bf16 %v3804_v34  ;;  %v4508_v34 = vld [vmem:[#allocation9] sm:$0xff]  }
 0x392   : > { %877 = vst [vmem:[#allocation2] sm:$0xf] %v875_v35  ;;  %878 = vst [vmem:[#allocation2 + $0x8] sm:$0xf] %v876_v36  ;;  %v4509_v35 = vld [vmem:[#allocation9 + $0x8] sm:$0xff]  }
 0x393   : > { %891 = vst [vmem:[#allocation2 + $0x10] sm:$0xf] %v889_v37  ;;  %892 = vst [vmem:[#allocation2 + $0x18] sm:$0xf] %v890_v38  ;;  %v903_v43 = vsel %vm543_vm1, %v3815_v40, %v3816_v39  ;;  %v904_v44 = vsel %vm543_vm1, %v3816_v39, %v3815_v40  ;;  %v897_v45 = vsel %vm629_vm2, %v3805_v42, %v3806_v41  ;;  %v3824_v48 = vpop.permute.xlu1 %3823  ;;  %v3819_v49 = vpop.permute.xlu0 %3818 }
 0x394   : > { %v898_v47 = vsel %vm629_vm2, %v3806_v41, %v3805_v42  ;;  %v905_v51 = vsel %vm655_vm3, %v897_v45, %v904_v44  ;;  %v907_v53 = vsel %vm676_vm6, %v904_v44, %v897_v45  ;;  %v3826_v63 = vunpack.i.h.bf16 %v3824_v48 }
 0x395   : > { %v906_v52 = vsel %vm5141_vm5, %v898_v47, %v903_v43  ;;  %v908_v56 = vsel %vm5150_vm8, %v903_v43, %v898_v47  ;;  %v909_v58 = vpack.c.bf16 %v905_v51, %v905_v51  ;;  %v923_v60 = vpack.c.bf16 %v907_v53, %v907_v53 }
 0x396   : > { %v910_v59 = vpack.c.bf16 %v906_v52, %v906_v52  ;;  %v924_v61 = vpack.c.bf16 %v908_v56, %v908_v56  ;;  %v3825_v0 = vunpack.i.l.bf16 %v3824_v48  ;;  %v3821_v2 = vunpack.i.h.bf16 %v3819_v49 }
 0x397   : > { %v3820_v3 = vunpack.i.l.bf16 %v3819_v49  ;;  %v913_v4 = vrot.slane %v909_v58, 4  ;;  %v927_v6 = vrot.slane %v923_v60, 4 }
 0x398   : > { %v914_v5 = vrot.slane %v910_v59, 4  ;;  %v928_v7 = vrot.slane %v924_v61, 4  ;;  %v943_v8 = vsel %vm543_vm1, %v3825_v0, %v3826_v63  ;;  %v944_v9 = vsel %vm543_vm1, %v3826_v63, %v3825_v0 }
 0x399   : > { %v937_v10 = vsel %vm629_vm2, %v3820_v3, %v3821_v2  ;;  %v938_v12 = vsel %vm629_vm2, %v3821_v2, %v3820_v3  ;;  %917 = vst [vmem:[#allocation2 + $0x10] sm:$0xf0] %v913_v4  ;;  %931 = vst [vmem:[#allocation2 + $0x20] sm:$0xf0] %v927_v6  ;;  %v972_v18 = vld [vmem:[#allocation2 + $0x8] sm:$0xff]  ;;  %v971_v19 = vld [vmem:[#allocation2] sm:$0xff] }
 0x39a   : > { %918 = vst [vmem:[#allocation2 + $0x18] sm:$0xf0] %v914_v5  ;;  %932 = vst [vmem:[#allocation2 + $0x28] sm:$0xf0] %v928_v7  ;;  %v945_v13 = vsel %vm655_vm3, %v937_v10, %v944_v9  ;;  %v946_v14 = vsel %vm5141_vm5, %v938_v12, %v943_v8  ;;  %v947_v15 = vsel %vm676_vm6, %v944_v9, %v937_v10  ;;  %1027 = vmatprep.subr.bf16.mxu1 %v972_v18 }
 0x39b   : > { %v948_v16 = vsel %vm5150_vm8, %v943_v8, %v938_v12  ;;  %v949_v20 = vpack.c.bf16 %v945_v13, %v945_v13  ;;  %v950_v21 = vpack.c.bf16 %v946_v14, %v946_v14  ;;  %v963_v22 = vpack.c.bf16 %v947_v15, %v947_v15  ;;  %1028 = vmatpush1.bf16.msra.mxu1 %v971_v19 }
 0x39c   : > { %v964_v23 = vpack.c.bf16 %v948_v16, %v948_v16 }
 0x39d   : > { %951 = vst [vmem:[#allocation2 + $0x30] sm:$0xf] %v949_v20  ;;  %952 = vst [vmem:[#allocation2 + $0x38] sm:$0xf] %v950_v21 }
 0x39e   : > { %965 = vst [vmem:[#allocation2 + $0x40] sm:$0xf] %v963_v22  ;;  %966 = vst [vmem:[#allocation2 + $0x48] sm:$0xf] %v964_v23 }
 0x3a0   : > { %v973_v26 = vld [vmem:[#allocation2 + $0x10] sm:$0xff]  ;;  %v975_v28 = vld [vmem:[#allocation2 + $0x20] sm:$0xff] }
 0x3a1   : > { %v974_v25 = vld [vmem:[#allocation2 + $0x18] sm:$0xff]  ;;  %v976_v27 = vld [vmem:[#allocation2 + $0x28] sm:$0xff] }
 0x3a2   : > { %1029 = vmatprep.subr.bf16.mxu1 %v974_v25 }
 0x3a3   : > { %1030 = vmatpush1.bf16.msra.mxu1 %v973_v26 }
 0x3a4   : > { %1031 = vmatprep.subr.bf16.mxu1 %v976_v27  ;;  %v978_v29 = vld [vmem:[#allocation2 + $0x38] sm:$0xff]  ;;  %v977_v30 = vld [vmem:[#allocation2 + $0x30] sm:$0xff]  ;;  %v988_v36 = vpop.permute.xlu0 %987  ;;  %v993_v40 = vpop.permute.xlu1 %992 }
 0x3a5   : > { %v980_v31 = vld [vmem:[#allocation2 + $0x48] sm:$0xf]  ;;  %v979_v32 = vld [vmem:[#allocation2 + $0x40] sm:$0xf] }
 0x3a6   : > { %v1022_v33 = vsel %vm793_vm9, %v979_v32, 0 }
 0x3a7   : > { %1032 = vmatpush1.bf16.msra.mxu1 %v975_v28 }
 0x3a8   : > { %1033 = vmatprep.subr.bf16.mxu1 %v978_v29  ;;  %v998_v56 = vpop.permute.xlu0 %997  ;;  %v1003_v0 = vpop.permute.xlu1 %1002 }
 0x3ab   : > { %1034 = vmatpush1.bf16.msra.mxu1 %v977_v30 }
 0x3ac   : > { %3554 = vmatprep.subr.msk.bf16.mxu1 %vm793_vm9, %v980_v31 }
 0x3af   : > { %1036 = vmatpush1.bf16.msra.mxu1 %v1022_v33 }
 0x3b2   : > { %3555 = vmatmul.mubr.msk.bf16.vlgmr.msra.gmra.mrb[0].mxu1 %vm789_vm10, %v4508_v34 }
 0x3b3   : > { %1069 = vmatprep.mubr.bf16.mxu1 %v7673_v1 }
 0x3ba   : > { %3556 = vmatmul.mubr.msk.bf16.gmra.mrb[4].mxu1 %vm789_vm10, %v4509_v35 }
 0x485   : > { %v1061_v37 = vpop.f32.mrb[0].mxu1 }
 0x486   : > { %v1062_v38 = vadd.f32 %v1061_v37, %v988_v36  ;;  %v1063_v39 = vpop.f32.mrb[1].mxu1 }
 0x487   : > { %v1064_v41 = vadd.f32 %v1063_v39, %v988_v36  ;;  %v1065_v42 = vpop.f32.mrb[2].mxu1 }
 0x488   : > { %v1066_v43 = vadd.f32 %v1065_v42, %v993_v40  ;;  %v1067_v44 = vpop.f32.mrb[3].mxu1  ;;  %v1080_v47 = vmax.f32 %v1062_v38, 0.0 }
 0x489   : > { %v1068_v45 = vadd.f32 %v1067_v44, %v993_v40  ;;  %v1081_v49 = vmax.f32 %v1064_v41, 0.0 }
 0x48a   : > { %v1082_v48 = vmax.f32 %v1066_v43, 0.0 }
 0x48b   : > { %v1083_v51 = vmax.f32 %v1068_v45, 0.0 }
 0x48c   : > { %v5290_v52 = vpack.c.bf16 %v1082_v48, %v1080_v47  ;;  %v5292_v53 = vpack.i.bf16 %v1082_v48, %v1080_v47 }
 0x48d   : > { %v5294_v58 = vpack.c.bf16 %v1083_v51, %v1081_v49  ;;  %v1071_v59 = vpop.f32.mrb[4].mxu1  ;;  %v5296_v60 = vpack.i.bf16 %v1083_v51, %v1081_v49 }
 0x48e   : > { %v1072_v61 = vadd.f32 %v1071_v59, %v998_v56  ;;  %v1073_v63 = vpop.f32.mrb[5].mxu1  ;;  %3829 = vrot.lane.b32.xlu0 %v5292_v53, %s7669_s21 }
 0x48f   : > { %v1074_v2 = vadd.f32 %v1073_v63, %v998_v56  ;;  %v1075_v3 = vpop.f32.mrb[6].mxu1  ;;  %3839 = vrot.lane.b32.xlu1 %v5296_v60, %s7669_s21 }
 0x490   : > { %v1076_v4 = vadd.f32 %v1075_v3, %v1003_v0  ;;  %v1077_v5 = vpop.f32.mrb[7].mxu1  ;;  %v1084_v7 = vmax.f32 %v1072_v61, 0.0 }
 0x491   : > { %v1078_v6 = vadd.f32 %v1077_v5, %v1003_v0  ;;  %v1085_v9 = vmax.f32 %v1074_v2, 0.0 }
 0x492   : > { %v1086_v8 = vmax.f32 %v1076_v4, 0.0  ;;  %3834 = vrot.lane.b32.xlu0 %v5292_v53, %s7732_s24 }
 0x493   : > { %v1087_v10 = vmax.f32 %v1078_v6, 0.0  ;;  %3844 = vrot.lane.b32.xlu1 %v5296_v60, %s7732_s24 }
 0x494   : > { %v5306_v12 = vpack.c.bf16 %v1086_v8, %v1084_v7  ;;  %v5308_v13 = vpack.i.bf16 %v1086_v8, %v1084_v7 }
 0x495   : > { %v5310_v14 = vpack.c.bf16 %v1087_v10, %v1085_v9  ;;  %v5312_v15 = vpack.i.bf16 %v1087_v10, %v1085_v9 }
 0x496   : > { %3849 = vrot.lane.b32.xlu0 %v5308_v13, %s7669_s21 }
 0x497   : > { %3859 = vrot.lane.b32.xlu1 %v5312_v15, %s7669_s21  ;;  %s7776_s21 = sld [smem:[#allocation33_spill]] }
 0x49a   : > { %3854 = vrot.lane.b32.xlu0 %v5308_v13, %s7732_s24 }
 0x49b   : > { %3864 = vrot.lane.b32.xlu1 %v5312_v15, %s7732_s24 }
 0x500   : > { %v3830_v16 = vpop.permute.xlu0 %3829 }
 0x501   : > { %v3840_v18 = vpop.permute.xlu1 %3839  ;;  %v3832_v19 = vunpack.i.h.bf16 %v3830_v16  ;;  %v3831_v20 = vunpack.i.l.bf16 %v3830_v16 }
 0x502   : > { %v3842_v21 = vunpack.i.h.bf16 %v3840_v18  ;;  %v3841_v22 = vunpack.i.l.bf16 %v3840_v18 }
 0x504   : > { %v3835_v23 = vpop.permute.xlu0 %3834  ;;  %v1104_v30 = vsel %vm573_vm4, %v3831_v20, %v3841_v22  ;;  %v1105_v31 = vsel %vm573_vm4, %v3832_v19, %v3842_v21  ;;  %v1108_v32 = vsel %vm573_vm4, %v3841_v22, %v3831_v20  ;;  %v1109_v33 = vsel %vm573_vm4, %v3842_v21, %v3832_v19 }
 0x505   : > { %v3837_v25 = vunpack.i.h.bf16 %v3835_v23  ;;  %v3836_v26 = vunpack.i.l.bf16 %v3835_v23  ;;  %v3845_v27 = vpop.permute.xlu1 %3844 }
 0x506   : > { %v3847_v28 = vunpack.i.h.bf16 %v3845_v27  ;;  %v3846_v29 = vunpack.i.l.bf16 %v3845_v27 }
 0x508   : > { %v1128_v34 = vsel %vm580_vm7, %v3836_v26, %v3846_v29  ;;  %v1129_v35 = vsel %vm580_vm7, %v3837_v25, %v3847_v28  ;;  %v1132_v36 = vsel %vm580_vm7, %v3846_v29, %v3836_v26  ;;  %v1133_v37 = vsel %vm580_vm7, %v3847_v28, %v3837_v25  ;;  %v3850_v38 = vpop.permute.xlu0 %3849 }
 0x509   : > { %v3852_v39 = vunpack.i.h.bf16 %v3850_v38  ;;  %v3851_v40 = vunpack.i.l.bf16 %v3850_v38  ;;  %v3860_v41 = vpop.permute.xlu1 %3859  ;;  %v5340_v42 = vsel %vm5102_vm14, %v1108_v32, %v1128_v34  ;;  %v5344_v43 = vsel %vm5102_vm14, %v1109_v33, %v1129_v35 }
 0x50a   : > { %v3862_v44 = vunpack.i.h.bf16 %v3860_v41  ;;  %v3861_v45 = vunpack.i.l.bf16 %v3860_v41  ;;  %v3873_v47 = vpack.i.bf16 %v5344_v43, %v5340_v42  ;;  %v1225_v48 = vpack.c.bf16 %v5344_v43, %v5340_v42  ;;  %v1468_v41 = vld [vmem:[%s7650_s7] sm:$0xff] }
 0x50b   : > { %v5352_v49 = vsel %vm600_vm13, %v1104_v30, %v1132_v36  ;;  %v5356_v51 = vsel %vm600_vm13, %v1105_v31, %v1133_v37  ;;  %v5367_v0 = vsel %vm5111_vm0, %v1128_v34, %v1108_v32  ;;  %v5377_v10 = vsel %vm5111_vm0, %v1129_v35, %v1109_v33 }
 0x50c   : > { %v1106_v56 = vsel %vm573_vm4, %v3851_v40, %v3861_v45  ;;  %v1107_v59 = vsel %vm573_vm4, %v3852_v39, %v3862_v44  ;;  %v1110_v61 = vsel %vm573_vm4, %v3861_v45, %v3851_v40  ;;  %v3855_v63 = vpop.permute.xlu0 %3854  ;;  %3874 = vrot.lane.b32.xlu1 %v3873_v47, %s7667_s13  ;;  %v3868_v4 = vpack.i.bf16 %v5356_v51, %v5352_v49  ;;  %v1470_v45 = vld [vmem:[%s7650_s7 + $0x10] sm:$0xff] }
 0x50d   : > { %v3857_v2 = vunpack.i.h.bf16 %v3855_v63  ;;  %v3856_v3 = vunpack.i.l.bf16 %v3855_v63  ;;  %v1224_v5 = vpack.c.bf16 %v5356_v51, %v5352_v49  ;;  %v3865_v6 = vpop.permute.xlu1 %3864  ;;  %v1111_v7 = vsel %vm573_vm4, %v3862_v44, %v3852_v39  ;;  %v1471_v44 = vld [vmem:[%s7650_s7 + $0x18] sm:$0xff]  ;;  %v4512_v63 = vld [vmem:[%s7649_s6 + $0x4] ss:$12 sps:$4 sm:$0xff]  }
 0x50e   : > { %v3867_v8 = vunpack.i.h.bf16 %v3865_v6  ;;  %v3866_v9 = vunpack.i.l.bf16 %v3865_v6  ;;  %3869 = vrot.lane.b32.xlu0 %v3868_v4, %s7667_s13  ;;  %v1401_v16 = vpack.c.bf16 %v5377_v10, %v5367_v0  ;;  %v5384_v18 = vsel %vm621_vm15, %v1132_v36, %v1104_v30  ;;  %1621 = vmatprep.mubr.bf16.mxu0 %v4512_v63 }
 0x50f   : > { %v5388_v19 = vsel %vm621_vm15, %v1133_v37, %v1105_v31  ;;  %v3953_v40 = vpack.i.bf16 %v5377_v10, %v5367_v0 }
 0x510   : > { %v1130_v20 = vsel %vm580_vm7, %v3856_v3, %v3866_v9  ;;  %v1131_v21 = vsel %vm580_vm7, %v3857_v2, %v3867_v8  ;;  %v1134_v22 = vsel %vm580_vm7, %v3866_v9, %v3856_v3  ;;  %v1135_v23 = vsel %vm580_vm7, %v3867_v8, %v3857_v2  ;;  %3884 = vrot.lane.b32.xlu1 %v3873_v47, %s7671_s19  ;;  %v1473_v47 = vld [vmem:[%s7650_s7 + $0x28] sm:$0xff] }
 0x511   : > { %v5401_v25 = vsel %vm5102_vm14, %v1110_v61, %v1130_v20  ;;  %v5405_v26 = vsel %vm5102_vm14, %v1111_v7, %v1131_v21  ;;  %v5409_v27 = vsel %vm600_vm13, %v1106_v56, %v1134_v22  ;;  %v5413_v28 = vsel %vm600_vm13, %v1107_v59, %v1135_v23 }
 0x512   : > { %v3893_v29 = vpack.i.bf16 %v5405_v26, %v5401_v25  ;;  %v1227_v30 = vpack.c.bf16 %v5405_v26, %v5401_v25  ;;  %v1226_v31 = vpack.c.bf16 %v5413_v28, %v5409_v27  ;;  %3879 = vrot.lane.b32.xlu0 %v3868_v4, %s7671_s19  ;;  %v3888_v32 = vpack.i.bf16 %v5413_v28, %v5409_v27 }
 0x513   : > { %v5429_v34 = vsel %vm5111_vm0, %v1130_v20, %v1110_v61  ;;  %v5433_v35 = vsel %vm5111_vm0, %v1131_v21, %v1111_v7  ;;  %v5439_v37 = vsel %vm621_vm15, %v1134_v22, %v1106_v56  ;;  %v5443_v38 = vsel %vm621_vm15, %v1135_v23, %v1107_v59  ;;  %v1472_v56 = vld [vmem:[%s7650_s7 + $0x20] sm:$0xff]  ;;  %v1475_v59 = vld [vmem:[%s7650_s7 + $0x38] sm:$0xff]  ;;  %v1474_v61 = vld [vmem:[%s7650_s7 + $0x30] sm:$0xff] }
 0x514   : > { %3894 = vrot.lane.b32.xlu1 %v3893_v29, %s7667_s13 }
 0x516   : > { %3889 = vrot.lane.b32.xlu0 %v3888_v32, %s7667_s13 }
 0x518   : > { %3904 = vrot.lane.b32.xlu1 %v3893_v29, %s7671_s19 }
 0x51a   : > { %3899 = vrot.lane.b32.xlu0 %v3888_v32, %s7671_s19 }
 0x51c   : > { %3914 = vrot.lane.b32.xlu1 %v5296_v60, %s7667_s13 }
 0x51e   : > { %3909 = vrot.lane.b32.xlu0 %v5292_v53, %s7667_s13 }
 0x520   : > { %3924 = vrot.lane.b32.xlu1 %v5296_v60, %s7671_s19  ;;  %v3973_v60 = vpack.i.bf16 %v5433_v35, %v5429_v34 }
 0x522   : > { %3919 = vrot.lane.b32.xlu0 %v5292_v53, %s7671_s19  ;;  %v3948_v53 = vpack.i.bf16 %v5388_v19, %v5384_v18 }
 0x524   : > { %3934 = vrot.lane.b32.xlu1 %v5312_v15, %s7667_s13 }
 0x526   : > { %3929 = vrot.lane.b32.xlu0 %v5308_v13, %s7667_s13 }
 0x528   : > { %3944 = vrot.lane.b32.xlu1 %v5312_v15, %s7671_s19  ;;  %v3968_v15 = vpack.i.bf16 %v5443_v38, %v5439_v37 }
 0x52a   : > { %3939 = vrot.lane.b32.xlu0 %v5308_v13, %s7671_s19  ;;  %v1469_v13 = vld [vmem:[%s7650_s7 + $0x8] sm:$0xff] }
 0x52c   : > { %3954 = vrot.lane.b32.xlu1 %v3953_v40, %s7667_s13 }
 0x52e   : > { %3949 = vrot.lane.b32.xlu0 %v3948_v53, %s7667_s13 }
 0x530   : > { %3964 = vrot.lane.b32.xlu1 %v3953_v40, %s7671_s19 }
 0x532   : > { %3959 = vrot.lane.b32.xlu0 %v3948_v53, %s7671_s19 }
 0x534   : > { %3974 = vrot.lane.b32.xlu1 %v3973_v60, %s7667_s13 }
 0x536   : > { %3969 = vrot.lane.b32.xlu0 %v3968_v15, %s7667_s13  ;;  %s7775_s13 = sld [smem:[#allocation34_spill]] }
 0x538   : > { %3984 = vrot.lane.b32.xlu1 %v3973_v60, %s7671_s19 }
 0x53a   : > { %3979 = vrot.lane.b32.xlu0 %v3968_v15, %s7671_s19  ;;  %s3548_s19 = sshll.u32 %s5027_s25, 3 }
 0x53c   : > { %1483 = vperm.xlu1 %3827, %v1469_v13  }
 0x53e   : > { %1478 = vperm.xlu0 %3786, %v1468_v41  }
 0x540   : > { %1493 = vperm.xlu1 %3827, %v1471_v44  }
 0x542   : > { %1488 = vperm.xlu0 %3786, %v1470_v45  }
 0x544   : > { %1503 = vperm.xlu1 %3827, %v1473_v47  }
 0x546   : > { %1498 = vperm.xlu0 %3786, %v1472_v56  }
 0x548   : > { %1513 = vperm.xlu1 %3827, %v1475_v59  }
 0x54a   : > { %1508 = vperm.xlu0 %3786, %v1474_v61  }
 0x57e   : > { %v3875_v2 = vpop.permute.xlu1 %3874 }
 0x57f   : > { %v3877_v6 = vunpack.i.h.bf16 %v3875_v2  ;;  %v3876_v7 = vunpack.i.l.bf16 %v3875_v2 }
 0x580   : > { %v3870_v3 = vpop.permute.xlu0 %3869 }
 0x581   : > { %v3872_v8 = vunpack.i.h.bf16 %v3870_v3  ;;  %v3871_v9 = vunpack.i.l.bf16 %v3870_v3 }
 0x582   : > { %v3885_v4 = vpop.permute.xlu1 %3884 }
 0x583   : > { %v3887_v20 = vunpack.i.h.bf16 %v3885_v4  ;;  %v3886_v21 = vunpack.i.l.bf16 %v3885_v4  ;;  %v1169_v40 = vsel %vm629_vm2, %v3872_v8, %v3877_v6  ;;  %v5513_v53 = vsel %vm629_vm2, %v3877_v6, %v3872_v8 }
 0x584   : > { %v3880_v22 = vpop.permute.xlu0 %3879  ;;  %v1168_v60 = vsel %vm629_vm2, %v3871_v9, %v3876_v7  ;;  %v5519_v15 = vsel %vm629_vm2, %v3876_v7, %v3871_v9 }
 0x585   : > { %v3882_v23 = vunpack.i.h.bf16 %v3880_v22  ;;  %v3881_v29 = vunpack.i.l.bf16 %v3880_v22 }
 0x586   : > { %v3895_v32 = vpop.permute.xlu1 %3894 }
 0x587   : > { %v5523_v13 = vsel %vm543_vm1, %v3882_v23, %v3887_v20  ;;  %v1197_v41 = vsel %vm543_vm1, %v3887_v20, %v3882_v23  ;;  %v1192_v44 = vsel %vm543_vm1, %v3881_v29, %v3886_v21  ;;  %v1196_v45 = vsel %vm543_vm1, %v3886_v21, %v3881_v29 }
 0x588   : > { %v1200_v47 = vsel %vm655_vm3, %v1168_v60, %v1196_v45  ;;  %v1201_v56 = vsel %vm5141_vm5, %v5519_v15, %v1192_v44  ;;  %v1202_v59 = vsel %vm655_vm3, %v1169_v40, %v1197_v41  ;;  %v1203_v61 = vsel %vm5141_vm5, %v5513_v53, %v5523_v13  ;;  %v3890_v63 = vpop.permute.xlu0 %3889 }
 0x589   : > { %v1216_v3 = vpack.c.bf16 %v1202_v59, %v1200_v47  ;;  %v1217_v4 = vpack.c.bf16 %v1203_v61, %v1201_v56  ;;  %v3897_v6 = vunpack.i.h.bf16 %v3895_v32  ;;  %v3896_v7 = vunpack.i.l.bf16 %v3895_v32 }
 0x58a   : > { %v3905_v2 = vpop.permute.xlu1 %3904  ;;  %v3892_v8 = vunpack.i.h.bf16 %v3890_v63  ;;  %v3891_v9 = vunpack.i.l.bf16 %v3890_v63  ;;  %v1208_v36 = vsel %vm676_vm6, %v1196_v45, %v1168_v60  ;;  %v1209_v33 = vsel %vm5150_vm8, %v1192_v44, %v5519_v15 }
 0x58b   : > { %v3907_v20 = vunpack.i.h.bf16 %v3905_v2  ;;  %v3906_v21 = vunpack.i.l.bf16 %v3905_v2  ;;  %1589 = vmatprep.subr.bf16.mxu0 %v1217_v4 }
 0x58c   : > { %v3900_v22 = vpop.permute.xlu0 %3899  ;;  %1590 = vmatpush1.bf16.msra.mxu0 %v1216_v3  ;;  %v1171_v39 = vsel %vm629_vm2, %v3892_v8, %v3897_v6  ;;  %v1175_v47 = vsel %vm629_vm2, %v3897_v6, %v3892_v8  ;;  %v1170_v32 = vsel %vm629_vm2, %v3891_v9, %v3896_v7  ;;  %v1174_v56 = vsel %vm629_vm2, %v3896_v7, %v3891_v9 }
 0x58d   : > { %v3902_v29 = vunpack.i.h.bf16 %v3900_v22  ;;  %v3901_v1 = vunpack.i.l.bf16 %v3900_v22 }
 0x58e   : > { %v5542_v23 = vpop.permute.xlu1 %3914 }
 0x58f   : > { %v1195_v59 = vsel %vm543_vm1, %v3902_v29, %v3907_v20  ;;  %v1199_v61 = vsel %vm543_vm1, %v3907_v20, %v3902_v29  ;;  %v1194_v63 = vsel %vm543_vm1, %v3901_v1, %v3906_v21  ;;  %v1198_v2 = vsel %vm543_vm1, %v3906_v21, %v3901_v1 }
 0x590   : > { %v5560_v3 = vpop.permute.xlu0 %3909  ;;  %v1204_v4 = vsel %vm655_vm3, %v1170_v32, %v1198_v2  ;;  %v1205_v6 = vsel %vm5141_vm5, %v1174_v56, %v1194_v63  ;;  %v1206_v7 = vsel %vm655_vm3, %v1171_v39, %v1199_v61  ;;  %v1207_v8 = vsel %vm5141_vm5, %v1175_v47, %v1195_v59 }
 0x591   : > { %v1218_v20 = vpack.c.bf16 %v1206_v7, %v1204_v4  ;;  %v1219_v22 = vpack.c.bf16 %v1207_v8, %v1205_v6  ;;  %v1210_v4 = vsel %vm676_vm6, %v1197_v41, %v1169_v40  ;;  %v1211_v6 = vsel %vm5150_vm8, %v5523_v13, %v5513_v53 }
 0x592   : > { %v3925_v9 = vpop.permute.xlu1 %3924  ;;  %v3917_v60 = vunpack.i.h.bf16 %v5542_v23  ;;  %v3916_v40 = vunpack.i.l.bf16 %v5542_v23  ;;  %v3912_v15 = vunpack.i.h.bf16 %v5560_v3  ;;  %v3911_v53 = vunpack.i.l.bf16 %v5560_v3 }
 0x593   : > { %1591 = vmatprep.subr.bf16.mxu0 %v1219_v22  ;;  %v3927_v7 = vunpack.i.h.bf16 %v3925_v9  ;;  %v3926_v42 = vunpack.i.l.bf16 %v3925_v9  ;;  %v1232_v44 = vpack.c.bf16 %v1210_v4, %v1208_v36  ;;  %v1233_v45 = vpack.c.bf16 %v1211_v6, %v1209_v33 }
 0x594   : > { %v3920_v29 = vpop.permute.xlu0 %3919  ;;  %1592 = vmatpush1.bf16.msra.mxu0 %v1218_v20  ;;  %v1213_v49 = vsel %vm5150_vm8, %v1194_v63, %v1174_v56  ;;  %v1215_v51 = vsel %vm5150_vm8, %v1195_v59, %v1175_v47  ;;  %v1214_v25 = vsel %vm676_vm6, %v1199_v61, %v1171_v39  ;;  %v5619_v39 = vsel %vm629_vm2, %v3917_v60, %v3912_v15 }
 0x595   : > { %1593 = vmatprep.subr.bf16.mxu0 %v1225_v48  ;;  %v3922_v43 = vunpack.i.h.bf16 %v3920_v29  ;;  %v3921_v48 = vunpack.i.l.bf16 %v3920_v29  ;;  %v1260_v56 = vsel %vm629_vm2, %v3916_v40, %v3911_v53  ;;  %v1256_v20 = vsel %vm629_vm2, %v3911_v53, %v3916_v40 }
 0x596   : > { %v5570_v1 = vpop.permute.xlu1 %3934 }
 0x597   : > { %v5608_v26 = vsel %vm543_vm1, %v3922_v43, %v3927_v7  ;;  %v1284_v59 = vsel %vm543_vm1, %v3926_v42, %v3921_v48  ;;  %v3937_v61 = vunpack.i.h.bf16 %v5570_v1  ;;  %v3936_v27 = vunpack.i.l.bf16 %v5570_v1 }
 0x598   : > { %v5575_v21 = vpop.permute.xlu0 %3929  ;;  %1594 = vmatpush1.bf16.msra.mxu0 %v1224_v5  ;;  %v1212_v5 = vsel %vm676_vm6, %v1198_v2, %v1170_v32  ;;  %v1235_v32 = vpack.c.bf16 %v1215_v51, %v1213_v49  ;;  %v1285_v63 = vsel %vm543_vm1, %v3927_v7, %v3922_v43  ;;  %v1291_v3 = vsel %vm5141_vm5, %v5619_v39, %v5608_v26 }
 0x599   : > { %1595 = vmatprep.subr.bf16.mxu0 %v1227_v30  ;;  %v5612_v30 = vsel %vm543_vm1, %v3921_v48, %v3926_v42  ;;  %v3932_v28 = vunpack.i.h.bf16 %v5575_v21  ;;  %v1234_v1 = vpack.c.bf16 %v1214_v25, %v1212_v5  ;;  %v1288_v4 = vsel %vm655_vm3, %v1256_v20, %v1284_v59 }
 0x59a   : > { %v3945_v13 = vpop.permute.xlu1 %3944  ;;  %v1289_v2 = vsel %vm5141_vm5, %v1260_v56, %v5612_v30 }
 0x59b   : > { %v3947_v33 = vunpack.i.h.bf16 %v3945_v13  ;;  %v3946_v36 = vunpack.i.l.bf16 %v3945_v13  ;;  %v1305_v7 = vpack.c.bf16 %v1291_v3, %v1289_v2  ;;  %v1263_v42 = vsel %vm629_vm2, %v3937_v61, %v3932_v28 }
 0x59c   : > { %v3940_v41 = vpop.permute.xlu0 %3939  ;;  %1596 = vmatpush1.bf16.msra.mxu0 %v1226_v31  ;;  %v3931_v31 = vunpack.i.l.bf16 %v5575_v21  ;;  %v1257_v21 = vsel %vm629_vm2, %v3912_v15, %v3917_v60  ;;  %v1259_v13 = vsel %vm629_vm2, %v3932_v28, %v3937_v61  ;;  %v1299_v61 = vsel %vm5150_vm8, %v5608_v26, %v5619_v39 }
 0x59d   : > { %v3942_v23 = vunpack.i.h.bf16 %v3940_v41  ;;  %v3941_v47 = vunpack.i.l.bf16 %v3940_v41  ;;  %1597 = vmatprep.subr.bf16.mxu0 %v1233_v45  ;;  %v1290_v6 = vsel %vm655_vm3, %v1257_v21, %v1285_v63 }
 0x59e   : > { %v5638_v8 = vpop.permute.xlu1 %3954  ;;  %v1262_v43 = vsel %vm629_vm2, %v3936_v27, %v3931_v31  ;;  %v1304_v53 = vpack.c.bf16 %v1290_v6, %v1288_v4  ;;  %v1258_v41 = vsel %vm629_vm2, %v3931_v31, %v3936_v27 }
 0x59f   : > { %v1283_v22 = vsel %vm543_vm1, %v3942_v23, %v3947_v33  ;;  %v1282_v29 = vsel %vm543_vm1, %v3941_v47, %v3946_v36  ;;  %v1287_v48 = vsel %vm543_vm1, %v3947_v33, %v3942_v23  ;;  %v1286_v40 = vsel %vm543_vm1, %v3946_v36, %v3941_v47 }
 0x5a0   : > { %v5640_v9 = vpop.permute.xlu0 %3949  ;;  %1598 = vmatpush1.bf16.msra.mxu0 %v1232_v44  ;;  %v1293_v60 = vsel %vm5141_vm5, %v1262_v43, %v1282_v29  ;;  %v1295_v15 = vsel %vm5141_vm5, %v1263_v42, %v1283_v22  ;;  %v1292_v49 = vsel %vm655_vm3, %v1258_v41, %v1286_v40  ;;  %v1294_v51 = vsel %vm655_vm3, %v1259_v13, %v1287_v48 }
 0x5a1   : > { %1599 = vmatprep.subr.bf16.mxu0 %v1235_v32  ;;  %v1307_v5 = vpack.c.bf16 %v1295_v15, %v1293_v60  ;;  %v1306_v25 = vpack.c.bf16 %v1294_v51, %v1292_v49  ;;  %v1296_v23 = vsel %vm676_vm6, %v1284_v59, %v1256_v20  ;;  %v1297_v47 = vsel %vm5150_vm8, %v5612_v30, %v1260_v56 }
 0x5a2   : > { %v3965_v44 = vpop.permute.xlu1 %3964  ;;  %v1298_v32 = vsel %vm676_vm6, %v1285_v63, %v1257_v21  ;;  %v3956_v30 = vunpack.i.l.bf16 %v5638_v8  ;;  %v3952_v56 = vunpack.i.h.bf16 %v5640_v9  ;;  %v3951_v59 = vunpack.i.l.bf16 %v5640_v9 }
 0x5a3   : > { %v3967_v27 = vunpack.i.h.bf16 %v3965_v44  ;;  %v3966_v28 = vunpack.i.l.bf16 %v3965_v44  ;;  %v1320_v20 = vpack.c.bf16 %v1298_v32, %v1296_v23  ;;  %v1321_v26 = vpack.c.bf16 %v1299_v61, %v1297_v47 }
 0x5a4   : > { %1600 = vmatpush1.bf16.msra.mxu0 %v1234_v1  ;;  %v3960_v45 = vpop.permute.xlu0 %3959  ;;  %v1301_v39 = vsel %vm5150_vm8, %v1282_v29, %v1262_v43 }
 0x5a5   : > { %1601 = vmatprep.subr.bf16.mxu0 %v1305_v7  ;;  %v3962_v31 = vunpack.i.h.bf16 %v3960_v45  ;;  %v3961_v2 = vunpack.i.l.bf16 %v3960_v45 }
 0x5a6   : > { %v5674_v33 = vpop.permute.xlu1 %3974 }
 0x5a7   : > { %v1369_v1 = vsel %vm543_vm1, %v3962_v31, %v3967_v27  ;;  %v1368_v9 = vsel %vm543_vm1, %v3961_v2, %v3966_v28  ;;  %v1372_v43 = vsel %vm543_vm1, %v3966_v28, %v3961_v2  ;;  %v1373_v15 = vsel %vm543_vm1, %v3967_v27, %v3962_v31 }
 0x5a8   : > { %1602 = vmatpush1.bf16.msra.mxu0 %v1304_v53  ;;  %v5676_v36 = vpop.permute.xlu0 %3969 }
 0x5a9   : > { %1603 = vmatprep.subr.bf16.mxu0 %v1307_v5  ;;  %v3971_v60 = vunpack.i.l.bf16 %v5676_v36 }
 0x5aa   : > { %v3985_v63 = vpop.permute.xlu1 %3984 }
 0x5ab   : > { %v3987_v21 = vunpack.i.h.bf16 %v3985_v63  ;;  %v3986_v4 = vunpack.i.l.bf16 %v3985_v63 }
 0x5ac   : > { %1604 = vmatpush1.bf16.msra.mxu0 %v1306_v25  ;;  %v3980_v3 = vpop.permute.xlu0 %3979 }
 0x5ad   : > { %1605 = vmatprep.subr.bf16.mxu0 %v5294_v58  ;;  %v3957_v58 = vunpack.i.h.bf16 %v5638_v8  ;;  %v1302_v8 = vsel %vm676_vm6, %v1287_v48, %v1259_v13  ;;  %v3982_v29 = vunpack.i.h.bf16 %v3980_v3  ;;  %v3981_v6 = vunpack.i.l.bf16 %v3980_v3 }
 0x5ae   : > { %v3977_v48 = vunpack.i.h.bf16 %v5674_v33 }
 0x5af   : > { %v1349_v7 = vsel %vm629_vm2, %v3957_v58, %v3952_v56  ;;  %v1371_v44 = vsel %vm543_vm1, %v3982_v29, %v3987_v21  ;;  %v1370_v45 = vsel %vm543_vm1, %v3981_v6, %v3986_v4  ;;  %v1345_v51 = vsel %vm629_vm2, %v3952_v56, %v3957_v58 }
 0x5b0   : > { %1606 = vmatpush1.bf16.msra.mxu0 %v5290_v52  ;;  %v1303_v52 = vsel %vm5150_vm8, %v1283_v22, %v1263_v42  ;;  %v1348_v42 = vsel %vm629_vm2, %v3956_v30, %v3951_v59  ;;  %v1379_v13 = vsel %vm5141_vm5, %v1349_v7, %v1369_v1  ;;  %v1378_v25 = vsel %vm655_vm3, %v1345_v51, %v1373_v15 }
 0x5b1   : > { %1607 = vmatprep.subr.bf16.mxu0 %v5310_v14  ;;  %v1300_v14 = vsel %vm676_vm6, %v1286_v40, %v1258_v41  ;;  %v1323_v22 = vpack.c.bf16 %v1303_v52, %v1301_v39  ;;  %v3976_v40 = vunpack.i.l.bf16 %v5674_v33  ;;  %v1377_v53 = vsel %vm5141_vm5, %v1348_v42, %v1368_v9 }
 0x5b2   : > { %v1344_v41 = vsel %vm629_vm2, %v3951_v59, %v3956_v30  ;;  %v1322_v49 = vpack.c.bf16 %v1302_v8, %v1300_v14  ;;  %v1393_v33 = vpack.c.bf16 %v1379_v13, %v1377_v53  ;;  %v1375_v47 = vsel %vm543_vm1, %v3987_v21, %v3982_v29  ;;  %v4518_v21 = vld [vmem:[%s7649_s6 + $0x30] ss:$12 sps:$4 sm:$0xff]   ;;  %v4521_v29 = vld [vmem:[%s7649_s6 + $0x48] ss:$12 sps:$4 sm:$0xff]  }
 0x5b3   : > { %v1376_v5 = vsel %vm655_vm3, %v1344_v41, %v1372_v43  ;;  %v1350_v23 = vsel %vm629_vm2, %v3976_v40, %v3971_v60  ;;  %v1374_v32 = vsel %vm543_vm1, %v3986_v4, %v3981_v6  ;;  %v1346_v2 = vsel %vm629_vm2, %v3971_v60, %v3976_v40  ;;  %v4519_v4 = vld [vmem:[%s7649_s6 + $0x4c] ss:$12 sps:$4 sm:$0xff]  }
 0x5b4   : > { %1608 = vmatpush1.bf16.msra.mxu0 %v5306_v12  ;;  %v3972_v12 = vunpack.i.h.bf16 %v5676_v36  ;;  %v1381_v61 = vsel %vm5141_vm5, %v1350_v23, %v1370_v45  ;;  %v1392_v28 = vpack.c.bf16 %v1378_v25, %v1376_v5  ;;  %v1380_v58 = vsel %vm655_vm3, %v1346_v2, %v1374_v32 }
 0x5b5   : > { %1609 = vmatprep.subr.bf16.mxu0 %v1321_v26  ;;  %v1385_v63 = vsel %vm5150_vm8, %v1368_v9, %v1348_v42  ;;  %v1387_v3 = vsel %vm5150_vm8, %v1369_v1, %v1349_v7  ;;  %v7734_v26 = vpack.c.bf16 %v5433_v35, %v5429_v34  ;;  %v1384_v39 = vsel %vm676_vm6, %v1372_v43, %v1344_v41  ;;  %v4513_v34 = vld [vmem:[%s7649_s6 + $0x1c] ss:$12 sps:$4 sm:$0xff]   ;;  %v4523_v7 = vld [vmem:[%s7649_s6 + $0x20] ss:$12 sps:$4 sm:$0xff]   ;;  %v4524_v42 = vld [vmem:[%s7649_s6 + $0x38] ss:$12 sps:$4 sm:$0xff]  }
 0x5b6   : > { %v1351_v36 = vsel %vm629_vm2, %v3977_v48, %v3972_v12  ;;  %v1347_v31 = vsel %vm629_vm2, %v3972_v12, %v3977_v48  ;;  %v1386_v0 = vsel %vm676_vm6, %v1373_v15, %v1345_v51  ;;  %v1409_v10 = vpack.c.bf16 %v1387_v3, %v1385_v63  ;;  %v4525_v43 = vld [vmem:[%s7649_s6 + $0x50] ss:$12 sps:$4 sm:$0xff]  }
 0x5b7   : > { %v1383_v27 = vsel %vm5141_vm5, %v1351_v36, %v1371_v44  ;;  %v1382_v30 = vsel %vm655_vm3, %v1347_v31, %v1375_v47  ;;  %v1389_v52 = vsel %vm5150_vm8, %v1370_v45, %v1350_v23  ;;  %v1408_v35 = vpack.c.bf16 %v1386_v0, %v1384_v39 }
 0x5b8   : > { %1610 = vmatpush1.bf16.msra.mxu0 %v1320_v20  ;;  %v1395_v56 = vpack.c.bf16 %v1383_v27, %v1381_v61  ;;  %v1394_v59 = vpack.c.bf16 %v1382_v30, %v1380_v58  ;;  %v7733_v20 = vpack.c.bf16 %v5388_v19, %v5384_v18  ;;  %v1391_v18 = vsel %vm5150_vm8, %v1371_v44, %v1351_v36 }
 0x5b9   : > { %1611 = vmatprep.subr.bf16.mxu0 %v1323_v22  ;;  %v7735_v19 = vpack.c.bf16 %v5443_v38, %v5439_v37  ;;  %v1388_v14 = vsel %vm676_vm6, %v1374_v32, %v1346_v2  ;;  %v1390_v8 = vsel %vm676_vm6, %v1375_v47, %v1347_v31  ;;  %v1411_v1 = vpack.c.bf16 %v1391_v18, %v1389_v52  ;;  %v4515_v37 = vld [vmem:[%s7649_s6 + $0x18] ss:$12 sps:$4 sm:$0xff]   ;;  %v4516_v38 = vld [vmem:[%s7649_s6 + $0x34] ss:$12 sps:$4 sm:$0xff]  }
 0x5ba   : > { %v1410_v9 = vpack.c.bf16 %v1390_v8, %v1388_v14  ;;  %v7736_v6 = vmov 0   ;;  %v4522_v22 = vld [vmem:[%s7649_s6 + $0x8] ss:$12 sps:$4 sm:$0xff]  }
 0x5bb   : > { %v1484_v15 = vpop.permute.xlu1 %1483 }
 0x5bc   : > { %1612 = vmatpush1.bf16.msra.mxu0 %v1322_v49 }
 0x5bd   : > { %1613 = vmatprep.subr.bf16.mxu0 %v1393_v33  ;;  %v1479_v48 = vpop.permute.xlu0 %1478 }
 0x5bf   : > { %v1494_v31 = vpop.permute.xlu1 %1493 }
 0x5c0   : > { %1614 = vmatpush1.bf16.msra.mxu0 %v1392_v28 }
 0x5c1   : > { %1615 = vmatprep.subr.bf16.mxu0 %v1395_v56  ;;  %v1489_v23 = vpop.permute.xlu0 %1488 }
 0x5c4   : > { %1616 = vmatpush1.bf16.msra.mxu0 %v1394_v59 }
 0x5c5   : > { %1617 = vmatprep.subr.bf16.mxu0 %v1401_v16  ;;  %v4510_v16 = vld [vmem:[%s7649_s6] ss:$12 sps:$4 sm:$0xff]  }
 0x5c8   : > { %1618 = vmatpush1.bf16.msra.mxu0 %v7733_v20 }
 0x5c9   : > { %1619 = vmatprep.subr.bf16.mxu0 %v7734_v26 }
 0x5cc   : > { %1620 = vmatpush1.bf16.msra.mxu0 %v7735_v19 }
 0x5cd   : > { %1662 = vmatprep.subr.bf16.mxu0 %v1409_v10  ;;  %v1499_v10 = vpop.permute.xlu0 %1498 }
 0x5cf   : > { %1622 = vmatmul.mubr.bf16.vlgmr.msra.gmra.mrb[4].mxu0 %v4510_v16 }
 0x5d0   : > { %1663 = vmatpush1.bf16.msra.mxu0 %v1408_v35  ;;  %1631 = vmatprep.mubr.bf16.mxu0 %v4513_v34  ;;  %v1504_v35 = vpop.permute.xlu1 %1503 }
 0x5d1   : > { %1664 = vmatprep.subr.bf16.mxu0 %v1411_v1 }
 0x5d4   : > { %1665 = vmatpush1.bf16.msra.mxu0 %v1410_v9 }
 0x5d7   : > { %1632 = vmatmul.mubr.bf16.gmra.mrb[8].mxu0 %v4515_v37 }
 0x5d8   : > { %1641 = vmatprep.mubr.bf16.mxu0 %v4516_v38 }
 0x5df   : > { %1642 = vmatmul.mubr.bf16.gmra.mrb[12].mxu0 %v4518_v21 }
 0x5e0   : > { %1651 = vmatprep.mubr.bf16.mxu0 %v4519_v4 }
 0x5e7   : > { %1652 = vmatmul.mubr.bf16.gmra.mrb[16].mxu0 %v4521_v29 }
 0x5e8   : > { %1694 = vmatprep.mubr.bf16.mxu0 %v7736_v6 }
 0x5ef   : > { %3569 = vmatmul.mubr.msk.bf16.vlgmr.msra.gmra.mrb[4].mxu0 %vm1576_vm11, %v4522_v22 }
 0x5f0   : > { %1704 = vmatprep.mubr.bf16.mxu0 %v7736_v6 }
 0x5f7   : > { %3570 = vmatmul.mubr.msk.bf16.gmra.mrb[8].mxu0 %vm1576_vm11, %v4523_v7 }
 0x5f8   : > { %1714 = vmatprep.mubr.bf16.mxu0 %v7736_v6 }
 0x5ff   : > { %3571 = vmatmul.mubr.msk.bf16.gmra.mrb[12].mxu0 %vm1576_vm11, %v4524_v42  ;;  %v1509_v42 = vpop.permute.xlu0 %1508 }
 0x600   : > { %1724 = vmatprep.mubr.bf16.mxu0 %v7736_v6 }
 0x607   : > { %3572 = vmatmul.mubr.msk.bf16.gmra.mrb[16].mxu0 %vm1576_vm11, %v4525_v43 }
 0x6c2   : > { %v1696_v40 = vpop.f32.mrb[4].mxu0 }
 0x6c3   : > { %v3600_v12 = vadd.f32 %v1696_v40, %v1479_v48  ;;  %v1698_v60 = vpop.f32.mrb[5].mxu0 }
 0x6c4   : > { %v3601_v53 = vadd.f32 %v1698_v60, %v1479_v48  ;;  %v1700_v13 = vpop.f32.mrb[6].mxu0 }
 0x6c5   : > { %v3602_v41 = vadd.f32 %v1700_v13, %v1484_v15  ;;  %v1702_v44 = vpop.f32.mrb[7].mxu0  ;;  %v1735_v49 = vmax.f32 %v3600_v12, 0.0 }
 0x6c6   : > { %v3603_v45 = vadd.f32 %v1702_v44, %v1484_v15  ;;  %v1736_v5 = vmax.f32 %v3601_v53, 0.0  ;;  %v1514_v15 = vpop.permute.xlu1 %1513 }
 0x6c7   : > { %v1737_v51 = vmax.f32 %v3602_v41, 0.0 }
 0x6c8   : > { %v1738_v25 = vmax.f32 %v3603_v45, 0.0 }
 0x6c9   : > { %v2199_v33 = vpack.c.bf16 %v1737_v51, %v1735_v49  ;;  %v5826_v36 = vpack.i.bf16 %v1737_v51, %v1735_v49 }
 0x6ca   : > { %v2200_v47 = vpack.c.bf16 %v1738_v25, %v1736_v5  ;;  %v1706_v32 = vpop.f32.mrb[8].mxu0  ;;  %v5828_v61 = vpack.i.bf16 %v1738_v25, %v1736_v5 }
 0x6cb   : > { %2207 = vst [vmem:[#allocation2 + $0x100] sm:$0xff] %v2199_v33  ;;  %v3604_v27 = vadd.f32 %v1706_v32, %v1489_v23  ;;  %v1708_v28 = vpop.f32.mrb[9].mxu0  ;;  %3989 = vrot.lane.b32.xlu0 %v5826_v36, %s7737_s28 }
 0x6cc   : > { %2208 = vst [vmem:[#allocation2 + $0x108] sm:$0xff] %v2200_v47  ;;  %v3605_v2 = vadd.f32 %v1708_v28, %v1489_v23  ;;  %v1710_v58 = vpop.f32.mrb[10].mxu0  ;;  %3999 = vrot.lane.b32.xlu1 %v5828_v61, %s7737_s28 }
 0x6cd   : > { %v3606_v30 = vadd.f32 %v1710_v58, %v1494_v31  ;;  %v1712_v56 = vpop.f32.mrb[11].mxu0  ;;  %v1739_v63 = vmax.f32 %v3604_v27, 0.0 }
 0x6ce   : > { %v3607_v59 = vadd.f32 %v1712_v56, %v1494_v31  ;;  %v1740_v20 = vmax.f32 %v3605_v2, 0.0 }
 0x6cf   : > { %v1741_v3 = vmax.f32 %v3606_v30, 0.0  ;;  %3994 = vrot.lane.b32.xlu0 %v5826_v36, %s7732_s24 }
 0x6d0   : > { %v1742_v26 = vmax.f32 %v3607_v59, 0.0  ;;  %4004 = vrot.lane.b32.xlu1 %v5828_v61, %s7732_s24 }
 0x6d1   : > { %v2201_v39 = vpack.c.bf16 %v1741_v3, %v1739_v63  ;;  %v5838_v0 = vpack.i.bf16 %v1741_v3, %v1739_v63 }
 0x6d2   : > { %v2202_v16 = vpack.c.bf16 %v1742_v26, %v1740_v20  ;;  %v1716_v52 = vpop.f32.mrb[12].mxu0  ;;  %v5840_v18 = vpack.i.bf16 %v1742_v26, %v1740_v20 }
 0x6d3   : > { %2209 = vst [vmem:[#allocation2 + $0x110] sm:$0xff] %v2201_v39  ;;  %v3608_v19 = vadd.f32 %v1716_v52, %v1499_v10  ;;  %v1718_v34 = vpop.f32.mrb[13].mxu0  ;;  %4009 = vrot.lane.b32.xlu0 %v5838_v0, %s7737_s28 }
 0x6d4   : > { %2210 = vst [vmem:[#allocation2 + $0x118] sm:$0xff] %v2202_v16  ;;  %v3609_v14 = vadd.f32 %v1718_v34, %v1499_v10  ;;  %v1720_v8 = vpop.f32.mrb[14].mxu0  ;;  %4019 = vrot.lane.b32.xlu1 %v5840_v18, %s7737_s28 }
 0x6d5   : > { %v3610_v1 = vadd.f32 %v1720_v8, %v1504_v35  ;;  %v1722_v9 = vpop.f32.mrb[15].mxu0  ;;  %v1743_v38 = vmax.f32 %v3608_v19, 0.0 }
 0x6d6   : > { %v3611_v37 = vadd.f32 %v1722_v9, %v1504_v35  ;;  %v1744_v4 = vmax.f32 %v3609_v14, 0.0 }
 0x6d7   : > { %v1745_v21 = vmax.f32 %v3610_v1, 0.0  ;;  %4014 = vrot.lane.b32.xlu0 %v5838_v0, %s7732_s24 }
 0x6d8   : > { %v1746_v29 = vmax.f32 %v3611_v37, 0.0  ;;  %4024 = vrot.lane.b32.xlu1 %v5840_v18, %s7732_s24 }
 0x6d9   : > { %v2203_v22 = vpack.c.bf16 %v1745_v21, %v1743_v38  ;;  %v5850_v7 = vpack.i.bf16 %v1745_v21, %v1743_v38 }
 0x6da   : > { %v2204_v43 = vpack.c.bf16 %v1746_v29, %v1744_v4  ;;  %v1726_v48 = vpop.f32.mrb[16].mxu0  ;;  %v5852_v40 = vpack.i.bf16 %v1746_v29, %v1744_v4 }
 0x6db   : > { %2211 = vst [vmem:[#allocation2 + $0x120] sm:$0xff] %v2203_v22  ;;  %v3612_v12 = vadd.f32 %v1726_v48, %v1509_v42  ;;  %v1728_v60 = vpop.f32.mrb[17].mxu0  ;;  %4029 = vrot.lane.b32.xlu0 %v5850_v7, %s7737_s28 }
 0x6dc   : > { %2212 = vst [vmem:[#allocation2 + $0x128] sm:$0xff] %v2204_v43  ;;  %v3613_v53 = vadd.f32 %v1728_v60, %v1509_v42  ;;  %v1730_v13 = vpop.f32.mrb[18].mxu0  ;;  %4039 = vrot.lane.b32.xlu1 %v5852_v40, %s7737_s28 }
 0x6dd   : > { %v3614_v41 = vadd.f32 %v1730_v13, %v1514_v15  ;;  %v1732_v44 = vpop.f32.mrb[19].mxu0  ;;  %v1747_v49 = vmax.f32 %v3612_v12, 0.0 }
 0x6de   : > { %v3615_v45 = vadd.f32 %v1732_v44, %v1514_v15  ;;  %v1748_v5 = vmax.f32 %v3613_v53, 0.0 }
 0x6df   : > { %v1749_v51 = vmax.f32 %v3614_v41, 0.0  ;;  %4034 = vrot.lane.b32.xlu0 %v5850_v7, %s7732_s24 }
 0x6e0   : > { %v1750_v25 = vmax.f32 %v3615_v45, 0.0  ;;  %4044 = vrot.lane.b32.xlu1 %v5852_v40, %s7732_s24 }
 0x6e1   : > { %v2205_v33 = vpack.c.bf16 %v1749_v51, %v1747_v49  ;;  %v5862_v23 = vpack.i.bf16 %v1749_v51, %v1747_v49 }
 0x6e2   : > { %v2206_v47 = vpack.c.bf16 %v1750_v25, %v1748_v5  ;;  %v5864_v32 = vpack.i.bf16 %v1750_v25, %v1748_v5 }
 0x6e3   : > { %2213 = vst [vmem:[#allocation2 + $0x130] sm:$0xff] %v2205_v33  ;;  %4049 = vrot.lane.b32.xlu0 %v5862_v23, %s7737_s28 }
 0x6e4   : > { %2214 = vst [vmem:[#allocation2 + $0x138] sm:$0xff] %v2206_v47  ;;  %4059 = vrot.lane.b32.xlu1 %v5864_v32, %s7737_s28 }
 0x6e7   : > { %4054 = vrot.lane.b32.xlu0 %v5862_v23, %s7732_s24 }
 0x6e8   : > { %4064 = vrot.lane.b32.xlu1 %v5864_v32, %s7732_s24 }
 0x73d   : > { %v3990_v27 = vpop.permute.xlu0 %3989 }
 0x73e   : > { %v4000_v28 = vpop.permute.xlu1 %3999  ;;  %v3992_v31 = vunpack.i.h.bf16 %v3990_v27  ;;  %v3991_v2 = vunpack.i.l.bf16 %v3990_v27 }
 0x73f   : > { %v4002_v58 = vunpack.i.h.bf16 %v4000_v28  ;;  %v4001_v30 = vunpack.i.l.bf16 %v4000_v28 }
 0x741   : > { %v3995_v56 = vpop.permute.xlu0 %3994  ;;  %v1783_v39 = vsel %vm573_vm4, %v3991_v2, %v4001_v30  ;;  %v1784_v10 = vsel %vm573_vm4, %v3992_v31, %v4002_v58  ;;  %v1791_v16 = vsel %vm573_vm4, %v4001_v30, %v3991_v2  ;;  %v1792_v52 = vsel %vm573_vm4, %v4002_v58, %v3992_v31 }
 0x742   : > { %v3997_v59 = vunpack.i.h.bf16 %v3995_v56  ;;  %v3996_v63 = vunpack.i.l.bf16 %v3995_v56  ;;  %v4005_v3 = vpop.permute.xlu1 %4004 }
 0x743   : > { %v4007_v20 = vunpack.i.h.bf16 %v4005_v3  ;;  %v4006_v26 = vunpack.i.l.bf16 %v4005_v3 }
 0x745   : > { %v1831_v19 = vsel %vm580_vm7, %v3996_v63, %v4006_v26  ;;  %v1832_v34 = vsel %vm580_vm7, %v3997_v59, %v4007_v20  ;;  %v1839_v35 = vsel %vm580_vm7, %v4006_v26, %v3996_v63  ;;  %v1840_v14 = vsel %vm580_vm7, %v4007_v20, %v3997_v59  ;;  %v4010_v8 = vpop.permute.xlu0 %4009 }
 0x746   : > { %v4012_v1 = vunpack.i.h.bf16 %v4010_v8  ;;  %v4011_v9 = vunpack.i.l.bf16 %v4010_v8  ;;  %v4020_v37 = vpop.permute.xlu1 %4019  ;;  %v5892_v38 = vsel %vm5102_vm14, %v1791_v16, %v1831_v19  ;;  %v5896_v21 = vsel %vm5102_vm14, %v1792_v52, %v1832_v34 }
 0x747   : > { %v4022_v4 = vunpack.i.h.bf16 %v4020_v37  ;;  %v4021_v29 = vunpack.i.l.bf16 %v4020_v37  ;;  %v4073_v22 = vpack.i.bf16 %v5896_v21, %v5892_v38  ;;  %v5904_v43 = vsel %vm600_vm13, %v1783_v39, %v1839_v35 }
 0x748   : > { %v5908_v48 = vsel %vm600_vm13, %v1784_v10, %v1840_v14  ;;  %v1864_v15 = vsel %vm5111_vm0, %v1831_v19, %v1791_v16  ;;  %v1866_v25 = vsel %vm5111_vm0, %v1832_v34, %v1792_v52 }
 0x749   : > { %v5912_v12 = vsel %vm573_vm4, %v4011_v9, %v4021_v29  ;;  %v4015_v60 = vpop.permute.xlu0 %4014  ;;  %4074 = vrot.lane.b32.xlu1 %v4073_v22, %s7738_s23  ;;  %v4068_v41 = vpack.i.bf16 %v5908_v48, %v5904_v43  ;;  %v5923_v49 = vsel %vm573_vm4, %v4012_v1, %v4022_v4  ;;  %v1793_v33 = vsel %vm573_vm4, %v4021_v29, %v4011_v9 }
 0x74a   : > { %v4017_v53 = vunpack.i.h.bf16 %v4015_v60  ;;  %v4016_v13 = vunpack.i.l.bf16 %v4015_v60  ;;  %v4025_v45 = vpop.permute.xlu1 %4024  ;;  %v1794_v47 = vsel %vm573_vm4, %v4022_v4, %v4012_v1  ;;  %v2376_v27 = vpack.c.bf16 %v1866_v25, %v1864_v15 }
 0x74b   : > { %v4027_v51 = vunpack.i.h.bf16 %v4025_v45  ;;  %v4026_v5 = vunpack.i.l.bf16 %v4025_v45  ;;  %4069 = vrot.lane.b32.xlu0 %v4068_v41, %s7738_s23  ;;  %v5972_v1 = vsel %vm621_vm15, %v1839_v35, %v1783_v39  ;;  %v5976_v9 = vsel %vm621_vm15, %v1840_v14, %v1784_v10 }
 0x74c   : > { %2384 = vst [vmem:[#allocation2 + $0x1c8] sm:$0xff] %v2376_v27 }
 0x74d   : > { %v1833_v28 = vsel %vm580_vm7, %v4016_v13, %v4026_v5  ;;  %v1834_v31 = vsel %vm580_vm7, %v4017_v53, %v4027_v51  ;;  %v5938_v2 = vsel %vm580_vm7, %v4026_v5, %v4016_v13  ;;  %v5942_v58 = vsel %vm580_vm7, %v4027_v51, %v4017_v53  ;;  %v4030_v30 = vpop.permute.xlu0 %4029  ;;  %4084 = vrot.lane.b32.xlu1 %v4073_v22, %s7739_s27 }
 0x74e   : > { %v4032_v56 = vunpack.i.h.bf16 %v4030_v30  ;;  %v4031_v59 = vunpack.i.l.bf16 %v4030_v30  ;;  %v4040_v63 = vpop.permute.xlu1 %4039  ;;  %v5947_v3 = vsel %vm5102_vm14, %v1793_v33, %v1833_v28  ;;  %v5951_v20 = vsel %vm5102_vm14, %v1794_v47, %v1834_v31 }
 0x74f   : > { %v4042_v26 = vunpack.i.h.bf16 %v4040_v63  ;;  %v4041_v16 = vunpack.i.l.bf16 %v4040_v63  ;;  %v4093_v52 = vpack.i.bf16 %v5951_v20, %v5947_v3  ;;  %4079 = vrot.lane.b32.xlu0 %v4068_v41, %s7739_s27  ;;  %v5962_v34 = vsel %vm600_vm13, %v5912_v12, %v5938_v2 }
 0x750   : > { %v5968_v8 = vsel %vm600_vm13, %v5923_v49, %v5942_v58  ;;  %v2375_v13 = vpack.c.bf16 %v5976_v9, %v5972_v1  ;;  %v6000_v51 = vpack.i.bf16 %v1866_v25, %v1864_v15 }
 0x751   : > { %v5980_v37 = vsel %vm573_vm4, %v4031_v59, %v4041_v16  ;;  %v4035_v4 = vpop.permute.xlu0 %4034  ;;  %4094 = vrot.lane.b32.xlu1 %v4093_v52, %s7738_s23  ;;  %v4088_v60 = vpack.i.bf16 %v5968_v8, %v5962_v34  ;;  %v5989_v10 = vsel %vm573_vm4, %v4032_v56, %v4042_v26  ;;  %v1795_v41 = vsel %vm573_vm4, %v4041_v16, %v4031_v59 }
 0x752   : > { %v4037_v29 = vunpack.i.h.bf16 %v4035_v4  ;;  %v4036_v22 = vunpack.i.l.bf16 %v4035_v4  ;;  %v4045_v35 = vpop.permute.xlu1 %4044  ;;  %v5997_v45 = vsel %vm573_vm4, %v4042_v26, %v4032_v56  ;;  %2383 = vst [vmem:[#allocation2 + $0x1c0] sm:$0xff] %v2375_v13  ;;  %v6050_v13 = vsel %vm5111_vm0, %v1834_v31, %v1794_v47 }
 0x753   : > { %v4047_v14 = vunpack.i.h.bf16 %v4045_v35  ;;  %v4046_v53 = vunpack.i.l.bf16 %v4045_v35  ;;  %4089 = vrot.lane.b32.xlu0 %v4088_v60, %s7738_s23 }
 0x755   : > { %v1835_v5 = vsel %vm580_vm7, %v4036_v22, %v4046_v53  ;;  %v6006_v27 = vsel %vm580_vm7, %v4037_v29, %v4047_v14  ;;  %v6010_v30 = vsel %vm580_vm7, %v4046_v53, %v4036_v22  ;;  %v6014_v59 = vsel %vm580_vm7, %v4047_v14, %v4037_v29  ;;  %v4050_v56 = vpop.permute.xlu0 %4049  ;;  %4104 = vrot.lane.b32.xlu1 %v4093_v52, %s7739_s27 }
 0x756   : > { %v4052_v15 = vunpack.i.h.bf16 %v4050_v56  ;;  %v4051_v25 = vunpack.i.l.bf16 %v4050_v56  ;;  %v4060_v63 = vpop.permute.xlu1 %4059  ;;  %v6019_v26 = vsel %vm5102_vm14, %v1795_v41, %v1835_v5  ;;  %v6025_v16 = vsel %vm5102_vm14, %v5997_v45, %v6006_v27 }
 0x757   : > { %v4062_v4 = vunpack.i.h.bf16 %v4060_v63  ;;  %v4061_v29 = vunpack.i.l.bf16 %v4060_v63  ;;  %v4113_v22 = vpack.i.bf16 %v6025_v16, %v6019_v26  ;;  %4099 = vrot.lane.b32.xlu0 %v4088_v60, %s7739_s27  ;;  %v6036_v35 = vsel %vm600_vm13, %v5980_v37, %v6010_v30 }
 0x758   : > { %v6042_v14 = vsel %vm600_vm13, %v5989_v10, %v6014_v59  ;;  %v6046_v53 = vsel %vm5111_vm0, %v1833_v28, %v1793_v33 }
 0x759   : > { %v1789_v60 = vsel %vm573_vm4, %v4051_v25, %v4061_v29  ;;  %v1790_v56 = vsel %vm573_vm4, %v4052_v15, %v4062_v4  ;;  %v1797_v63 = vsel %vm573_vm4, %v4061_v29, %v4051_v25  ;;  %v4055_v52 = vpop.permute.xlu0 %4054  ;;  %4114 = vrot.lane.b32.xlu1 %v4113_v22, %s7738_s23  ;;  %v4108_v33 = vpack.i.bf16 %v6042_v14, %v6036_v35 }
 0x75a   : > { %v4057_v39 = vunpack.i.h.bf16 %v4055_v52  ;;  %v4056_v19 = vunpack.i.l.bf16 %v4055_v52  ;;  %v4065_v28 = vpop.permute.xlu1 %4064  ;;  %v1798_v31 = vsel %vm573_vm4, %v4062_v4, %v4052_v15  ;;  %v2378_v25 = vpack.c.bf16 %v6050_v13, %v6046_v53 }
 0x75b   : > { %v4067_v44 = vunpack.i.h.bf16 %v4065_v28  ;;  %v4066_v42 = vunpack.i.l.bf16 %v4065_v28  ;;  %4109 = vrot.lane.b32.xlu0 %v4108_v33, %s7738_s23  ;;  %v6072_v29 = vsel %vm621_vm15, %v5938_v2, %v5912_v12  ;;  %v6078_v52 = vsel %vm621_vm15, %v5942_v58, %v5923_v49 }
 0x75c   : > { %v6082_v15 = vsel %vm5111_vm0, %v1835_v5, %v1795_v41  ;;  %2386 = vst [vmem:[#allocation2 + $0x1d8] sm:$0xff] %v2378_v25 }
 0x75d   : > { %v1837_v4 = vsel %vm580_vm7, %v4056_v19, %v4066_v42  ;;  %v1838_v28 = vsel %vm580_vm7, %v4057_v39, %v4067_v44  ;;  %v1845_v12 = vsel %vm580_vm7, %v4066_v42, %v4056_v19  ;;  %v1846_v2 = vsel %vm580_vm7, %v4067_v44, %v4057_v39  ;;  %4124 = vrot.lane.b32.xlu1 %v4113_v22, %s7739_s27 }
 0x75e   : > { %v1875_v49 = vsel %vm621_vm15, %v1845_v12, %v1789_v60  ;;  %v1876_v58 = vsel %vm5111_vm0, %v1837_v4, %v1797_v63  ;;  %v1877_v41 = vsel %vm621_vm15, %v1846_v2, %v1790_v56  ;;  %v1878_v5 = vsel %vm5111_vm0, %v1838_v28, %v1798_v31 }
 0x75f   : > { %v2381_v47 = vpack.c.bf16 %v1877_v41, %v1875_v49  ;;  %v2382_v42 = vpack.c.bf16 %v1878_v5, %v1876_v58  ;;  %v6103_v44 = vsel %vm5102_vm14, %v1797_v63, %v1837_v4  ;;  %v6107_v19 = vsel %vm5102_vm14, %v1798_v31, %v1838_v28  ;;  %4119 = vrot.lane.b32.xlu0 %v4108_v33, %s7739_s27 }
 0x760   : > { %7740 = vst [vmem:[#allocation25_spill] sm:$0xff] %v6103_v44  ;;  %7741 = vst [vmem:[#allocation26_spill] sm:$0xff] %v6107_v19  ;;  %v4133_v39 = vpack.i.bf16 %v6107_v19, %v6103_v44  ;;  %v6116_v25 = vsel %vm600_vm13, %v1789_v60, %v1845_v12  ;;  %v6120_v63 = vsel %vm600_vm13, %v1790_v56, %v1846_v2 }
 0x761   : > { %7742 = vst [vmem:[#allocation27_spill] sm:$0xff] %v6116_v25  ;;  %7743 = vst [vmem:[#allocation28_spill] sm:$0xff] %v6120_v63  ;;  %v4128_v31 = vpack.i.bf16 %v6120_v63, %v6116_v25  ;;  %v2377_v4 = vpack.c.bf16 %v6078_v52, %v6072_v29  ;;  %v1874_v60 = vsel %vm5111_vm0, %v6006_v27, %v5997_v45 }
 0x762   : > { %2389 = vst [vmem:[#allocation2 + $0x1f0] sm:$0xff] %v2381_v47  ;;  %2390 = vst [vmem:[#allocation2 + $0x1f8] sm:$0xff] %v2382_v42  ;;  %4134 = vrot.lane.b32.xlu1 %v4133_v39, %s7738_s23  ;;  %v2380_v56 = vpack.c.bf16 %v1874_v60, %v6082_v15  ;;  %v1871_v47 = vsel %vm621_vm15, %v6010_v30, %v5980_v37  ;;  %v1873_v28 = vsel %vm621_vm15, %v6014_v59, %v5989_v10 }
 0x763   : > { %4129 = vrot.lane.b32.xlu0 %v4128_v31, %s7738_s23  ;;  %2385 = vst [vmem:[#allocation2 + $0x1d0] sm:$0xff] %v2377_v4  ;;  %v2379_v12 = vpack.c.bf16 %v1873_v28, %v1871_v47  ;;  %v4293_v2 = vpack.i.bf16 %v1878_v5, %v1876_v58  ;;  %v4288_v42 = vpack.i.bf16 %v1877_v41, %v1875_v49 }
 0x764   : > { %2388 = vst [vmem:[#allocation2 + $0x1e8] sm:$0xff] %v2380_v56 }
 0x765   : > { %2387 = vst [vmem:[#allocation2 + $0x1e0] sm:$0xff] %v2379_v12 }
 0x766   : > { %4144 = vrot.lane.b32.xlu1 %v4133_v39, %s7739_s27 }
 0x767   : > { %4139 = vrot.lane.b32.xlu0 %v4128_v31, %s7739_s27 }
 0x76a   : > { %4154 = vrot.lane.b32.xlu1 %v5828_v61, %s7738_s23 }
 0x76b   : > { %4149 = vrot.lane.b32.xlu0 %v5826_v36, %s7738_s23 }
 0x76e   : > { %4164 = vrot.lane.b32.xlu1 %v5828_v61, %s7739_s27  ;;  %v4253_v61 = vpack.i.bf16 %v6050_v13, %v6046_v53 }
 0x76f   : > { %4159 = vrot.lane.b32.xlu0 %v5826_v36, %s7739_s27  ;;  %v4228_v36 = vpack.i.bf16 %v5976_v9, %v5972_v1  ;;  %v2494_v1 = vld [vmem:[%s7652_s9 + $0x18] sm:$0xff]  ;;  %v2493_v9 = vld [vmem:[%s7652_s9 + $0x10] sm:$0xff] }
 0x772   : > { %4174 = vrot.lane.b32.xlu1 %v5840_v18, %s7738_s23 }
 0x773   : > { %4169 = vrot.lane.b32.xlu0 %v5838_v0, %s7738_s23 }
 0x776   : > { %4184 = vrot.lane.b32.xlu1 %v5840_v18, %s7739_s27  ;;  %v4273_v18 = vpack.i.bf16 %v1874_v60, %v6082_v15 }
 0x777   : > { %4179 = vrot.lane.b32.xlu0 %v5838_v0, %s7739_s27  ;;  %v4248_v0 = vpack.i.bf16 %v6078_v52, %v6072_v29 }
 0x77a   : > { %4194 = vrot.lane.b32.xlu1 %v5852_v40, %s7738_s23 }
 0x77b   : > { %4189 = vrot.lane.b32.xlu0 %v5850_v7, %s7738_s23 }
 0x77e   : > { %4204 = vrot.lane.b32.xlu1 %v5852_v40, %s7739_s27  ;;  %v4528_v40 = vld [vmem:[%s7651_s8 + $0x4] ss:$20 sps:$4 sm:$0xff]  }
 0x77f   : > { %4199 = vrot.lane.b32.xlu0 %v5850_v7, %s7739_s27  ;;  %v4268_v7 = vpack.i.bf16 %v1873_v28, %v1871_v47  ;;  %2604 = vmatprep.mubr.bf16.mxu1 %v4528_v40 }
 0x782   : > { %4214 = vrot.lane.b32.xlu1 %v5864_v32, %s7738_s23 }
 0x783   : > { %4209 = vrot.lane.b32.xlu0 %v5862_v23, %s7738_s23 }
 0x786   : > { %4224 = vrot.lane.b32.xlu1 %v5864_v32, %s7739_s27  ;;  %v2491_v32 = vld [vmem:[%s7652_s9] sm:$0xff] }
 0x787   : > { %4219 = vrot.lane.b32.xlu0 %v5862_v23, %s7739_s27  ;;  %v2492_v23 = vld [vmem:[%s7652_s9 + $0x8] sm:$0xff] }
 0x78a   : > { %4234 = vrot.lane.b32.xlu1 %v6000_v51, %s7738_s23 }
 0x78b   : > { %4229 = vrot.lane.b32.xlu0 %v4228_v36, %s7738_s23 }
 0x78e   : > { %4244 = vrot.lane.b32.xlu1 %v6000_v51, %s7739_s27 }
 0x78f   : > { %4239 = vrot.lane.b32.xlu0 %v4228_v36, %s7739_s27 }
 0x792   : > { %4254 = vrot.lane.b32.xlu1 %v4253_v61, %s7738_s23 }
 0x793   : > { %4249 = vrot.lane.b32.xlu0 %v4248_v0, %s7738_s23 }
 0x796   : > { %4264 = vrot.lane.b32.xlu1 %v4253_v61, %s7739_s27 }
 0x797   : > { %4259 = vrot.lane.b32.xlu0 %v4248_v0, %s7739_s27 }
 0x79a   : > { %4274 = vrot.lane.b32.xlu1 %v4273_v18, %s7738_s23 }
 0x79b   : > { %4269 = vrot.lane.b32.xlu0 %v4268_v7, %s7738_s23 }
 0x79e   : > { %4284 = vrot.lane.b32.xlu1 %v4273_v18, %s7739_s27 }
 0x79f   : > { %4279 = vrot.lane.b32.xlu0 %v4268_v7, %s7739_s27 }
 0x7a2   : > { %4294 = vrot.lane.b32.xlu1 %v4293_v2, %s7738_s23 }
 0x7a3   : > { %4289 = vrot.lane.b32.xlu0 %v4288_v42, %s7738_s23 }
 0x7a6   : > { %4304 = vrot.lane.b32.xlu1 %v4293_v2, %s7739_s27 }
 0x7a7   : > { %4299 = vrot.lane.b32.xlu0 %v4288_v42, %s7739_s27 }
 0x7aa   : > { %2502 = vperm.xlu1 %3827, %v2492_v23  }
 0x7ab   : > { %2497 = vperm.xlu0 %3786, %v2491_v32  }
 0x7ae   : > { %2512 = vperm.xlu1 %3827, %v2494_v1  }
 0x7af   : > { %2507 = vperm.xlu0 %3786, %v2493_v9  }
 0x7bb   : > { %v4075_v37 = vpop.permute.xlu1 %4074 }
 0x7bc   : > { %v4077_v51 = vunpack.i.h.bf16 %v4075_v37  ;;  %v4076_v27 = vunpack.i.l.bf16 %v4075_v37 }
 0x7bd   : > { %v4070_v10 = vpop.permute.xlu0 %4069 }
 0x7be   : > { %v4072_v30 = vunpack.i.h.bf16 %v4070_v10  ;;  %v4071_v59 = vunpack.i.l.bf16 %v4070_v10 }
 0x7bf   : > { %v4085_v45 = vpop.permute.xlu1 %4084 }
 0x7c0   : > { %v4087_v53 = vunpack.i.h.bf16 %v4085_v45  ;;  %v4086_v13 = vunpack.i.l.bf16 %v4085_v45  ;;  %v6219_v58 = vsel %vm629_vm2, %v4072_v30, %v4077_v51  ;;  %v6223_v41 = vsel %vm629_vm2, %v4077_v51, %v4072_v30 }
 0x7c1   : > { %v4080_v29 = vpop.permute.xlu0 %4079  ;;  %v6227_v5 = vsel %vm629_vm2, %v4071_v59, %v4076_v27  ;;  %v6231_v39 = vsel %vm629_vm2, %v4076_v27, %v4071_v59 }
 0x7c2   : > { %v4082_v52 = vunpack.i.h.bf16 %v4080_v29  ;;  %v4081_v15 = vunpack.i.l.bf16 %v4080_v29 }
 0x7c3   : > { %v4095_v49 = vpop.permute.xlu1 %4094 }
 0x7c4   : > { %v6235_v31 = vsel %vm543_vm1, %v4082_v52, %v4087_v53  ;;  %v6239_v4 = vsel %vm543_vm1, %v4087_v53, %v4082_v52  ;;  %v6243_v60 = vsel %vm543_vm1, %v4081_v15, %v4086_v13  ;;  %v6247_v56 = vsel %vm543_vm1, %v4086_v13, %v4081_v15 }
 0x7c5   : > { %v1975_v47 = vsel %vm655_vm3, %v6227_v5, %v6247_v56  ;;  %v1976_v28 = vsel %vm5141_vm5, %v6231_v39, %v6243_v60  ;;  %v1977_v12 = vsel %vm655_vm3, %v6219_v58, %v6239_v4  ;;  %v1978_v2 = vsel %vm5141_vm5, %v6223_v41, %v6235_v31  ;;  %v4090_v42 = vpop.permute.xlu0 %4089 }
 0x7c6   : > { %v2007_v61 = vpack.c.bf16 %v1977_v12, %v1975_v47  ;;  %v2008_v0 = vpack.c.bf16 %v1978_v2, %v1976_v28  ;;  %v4097_v18 = vunpack.i.h.bf16 %v4095_v49  ;;  %v4096_v7 = vunpack.i.l.bf16 %v4095_v49 }
 0x7c7   : > { %v4105_v36 = vpop.permute.xlu1 %4104  ;;  %v4092_v40 = vunpack.i.h.bf16 %v4090_v42  ;;  %v4091_v23 = vunpack.i.l.bf16 %v4090_v42 }
 0x7c8   : > { %v4107_v32 = vunpack.i.h.bf16 %v4105_v36  ;;  %v4106_v1 = vunpack.i.l.bf16 %v4105_v36  ;;  %2572 = vmatprep.subr.bf16.mxu1 %v2008_v0 }
 0x7c9   : > { %v4100_v9 = vpop.permute.xlu0 %4099  ;;  %2573 = vmatpush1.bf16.msra.mxu1 %v2007_v61  ;;  %v6267_v51 = vsel %vm629_vm2, %v4092_v40, %v4097_v18  ;;  %v6271_v27 = vsel %vm629_vm2, %v4097_v18, %v4092_v40  ;;  %v6275_v30 = vsel %vm629_vm2, %v4091_v23, %v4096_v7  ;;  %v6279_v59 = vsel %vm629_vm2, %v4096_v7, %v4091_v23 }
 0x7ca   : > { %v4102_v10 = vunpack.i.h.bf16 %v4100_v9  ;;  %v4101_v45 = vunpack.i.l.bf16 %v4100_v9 }
 0x7cb   : > { %v4115_v37 = vpop.permute.xlu1 %4114 }
 0x7cc   : > { %v6283_v53 = vsel %vm543_vm1, %v4102_v10, %v4107_v32  ;;  %v6287_v13 = vsel %vm543_vm1, %v4107_v32, %v4102_v10  ;;  %v6291_v29 = vsel %vm543_vm1, %v4101_v45, %v4106_v1  ;;  %v6295_v52 = vsel %vm543_vm1, %v4106_v1, %v4101_v45 }
 0x7cd   : > { %v4110_v15 = vpop.permute.xlu0 %4109  ;;  %v1979_v49 = vsel %vm655_vm3, %v6275_v30, %v6295_v52  ;;  %v1980_v47 = vsel %vm5141_vm5, %v6279_v59, %v6291_v29  ;;  %v1981_v28 = vsel %vm655_vm3, %v6267_v51, %v6287_v13  ;;  %v1982_v12 = vsel %vm5141_vm5, %v6271_v27, %v6283_v53 }
 0x7ce   : > { %v4117_v42 = vunpack.i.h.bf16 %v4115_v37  ;;  %v4116_v36 = vunpack.i.l.bf16 %v4115_v37  ;;  %v2009_v61 = vpack.c.bf16 %v1981_v28, %v1979_v49  ;;  %v2010_v0 = vpack.c.bf16 %v1982_v12, %v1980_v47 }
 0x7cf   : > { %v4125_v2 = vpop.permute.xlu1 %4124  ;;  %v4112_v18 = vunpack.i.h.bf16 %v4110_v15  ;;  %v4111_v7 = vunpack.i.l.bf16 %v4110_v15 }
 0x7d0   : > { %v4127_v40 = vunpack.i.h.bf16 %v4125_v2  ;;  %v4126_v23 = vunpack.i.l.bf16 %v4125_v2  ;;  %2574 = vmatprep.subr.bf16.mxu1 %v2010_v0 }
 0x7d1   : > { %v4120_v32 = vpop.permute.xlu0 %4119  ;;  %v6315_v10 = vsel %vm629_vm2, %v4112_v18, %v4117_v42  ;;  %v6319_v45 = vsel %vm629_vm2, %v4117_v42, %v4112_v18  ;;  %v6323_v37 = vsel %vm629_vm2, %v4111_v7, %v4116_v36  ;;  %v6327_v15 = vsel %vm629_vm2, %v4116_v36, %v4111_v7  ;;  %2575 = vmatpush1.bf16.msra.mxu1 %v2009_v61 }
 0x7d2   : > { %v4122_v1 = vunpack.i.h.bf16 %v4120_v32  ;;  %v4121_v9 = vunpack.i.l.bf16 %v4120_v32 }
 0x7d4   : > { %v4135_v49 = vpop.permute.xlu1 %4134  ;;  %v6331_v47 = vsel %vm543_vm1, %v4122_v1, %v4127_v40  ;;  %v6335_v28 = vsel %vm543_vm1, %v4127_v40, %v4122_v1  ;;  %v6339_v12 = vsel %vm543_vm1, %v4121_v9, %v4126_v23  ;;  %v6343_v2 = vsel %vm543_vm1, %v4126_v23, %v4121_v9 }
 0x7d5   : > { %v1983_v42 = vsel %vm655_vm3, %v6323_v37, %v6343_v2  ;;  %v1984_v36 = vsel %vm5141_vm5, %v6327_v15, %v6339_v12  ;;  %v1985_v61 = vsel %vm655_vm3, %v6315_v10, %v6335_v28  ;;  %v1986_v0 = vsel %vm5141_vm5, %v6319_v45, %v6331_v47  ;;  %v4130_v18 = vpop.permute.xlu0 %4129 }
 0x7d6   : > { %v2011_v7 = vpack.c.bf16 %v1985_v61, %v1983_v42  ;;  %v2012_v40 = vpack.c.bf16 %v1986_v0, %v1984_v36  ;;  %v4137_v32 = vunpack.i.h.bf16 %v4135_v49  ;;  %v4136_v1 = vunpack.i.l.bf16 %v4135_v49 }
 0x7d7   : > { %v4132_v9 = vunpack.i.h.bf16 %v4130_v18  ;;  %v4131_v33 = vunpack.i.l.bf16 %v4130_v18 }
 0x7d8   : > { %v4145_v23 = vpop.permute.xlu1 %4144  ;;  %2576 = vmatprep.subr.bf16.mxu1 %v2012_v40  ;;  %v6419_v40 = vsel %vm676_vm6, %v6239_v4, %v6219_v58  ;;  %v1994_v58 = vsel %vm5150_vm8, %v6235_v31, %v6223_v41  ;;  %v6435_v4 = vsel %vm676_vm6, %v6295_v52, %v6275_v30 }
 0x7d9   : > { %v4147_v22 = vunpack.i.h.bf16 %v4145_v23  ;;  %v4146_v57 = vunpack.i.l.bf16 %v4145_v23  ;;  %v4140_v50 = vpop.permute.xlu0 %4139  ;;  %2577 = vmatpush1.bf16.msra.mxu1 %v2011_v7  ;;  %v6363_v25 = vsel %vm629_vm2, %v4132_v9, %v4137_v32  ;;  %v6367_v42 = vsel %vm629_vm2, %v4137_v32, %v4132_v9 }
 0x7da   : > { %v4142_v54 = vunpack.i.h.bf16 %v4140_v50  ;;  %v4141_v46 = vunpack.i.l.bf16 %v4140_v50  ;;  %7744 = vst [vmem:[#allocation29_spill] sm:$0xff] %v6367_v42  ;;  %v6371_v49 = vsel %vm629_vm2, %v4131_v33, %v4136_v1  ;;  %v6375_v36 = vsel %vm629_vm2, %v4136_v1, %v4131_v33 }
 0x7dc   : > { %v4155_v6 = vpop.permute.xlu1 %4154  ;;  %v6379_v50 = vsel %vm543_vm1, %v4142_v54, %v4147_v22  ;;  %v6383_v61 = vsel %vm543_vm1, %v4147_v22, %v4142_v54  ;;  %v6387_v0 = vsel %vm543_vm1, %v4141_v46, %v4146_v57  ;;  %v6391_v18 = vsel %vm543_vm1, %v4146_v57, %v4141_v46 }
 0x7dd   : > { %7745 = vst [vmem:[#allocation30_spill] sm:$0xff] %v6379_v50  ;;  %v4150_v7 = vpop.permute.xlu0 %4149  ;;  %v1987_v33 = vsel %vm655_vm3, %v6371_v49, %v6391_v18  ;;  %v1988_v54 = vsel %vm5141_vm5, %v6375_v36, %v6387_v0  ;;  %v1989_v22 = vsel %vm655_vm3, %v6363_v25, %v6383_v61  ;;  %v1990_v46 = vsel %vm5141_vm5, %v6367_v42, %v6379_v50 }
 0x7de   : > { %v6413_v57 = vsel %vm676_vm6, %v6247_v56, %v6227_v5  ;;  %v2013_v32 = vpack.c.bf16 %v1989_v22, %v1987_v33  ;;  %v2014_v1 = vpack.c.bf16 %v1990_v46, %v1988_v54  ;;  %v4157_v9 = vunpack.i.h.bf16 %v4155_v6 }
 0x7df   : > { %v4156_v63 = vunpack.i.l.bf16 %v4155_v6  ;;  %v4152_v55 = vunpack.i.h.bf16 %v4150_v7  ;;  %v4151_v11 = vunpack.i.l.bf16 %v4150_v7  ;;  %v1992_v5 = vsel %vm5150_vm8, %v6243_v60, %v6231_v39 }
 0x7e0   : > { %v4165_v23 = vpop.permute.xlu1 %4164  ;;  %2578 = vmatprep.subr.bf16.mxu1 %v2014_v1  ;;  %v2039_v6 = vpack.c.bf16 %v6419_v40, %v6413_v57  ;;  %v1996_v7 = vsel %vm5150_vm8, %v6291_v29, %v6279_v59  ;;  %v7747_v46 = vpack.c.bf16 %v5908_v48, %v5904_v43  ;;  %v6521_v59 = vsel %vm676_vm6, %v6343_v2, %v6323_v37 }
 0x7e1   : > { %v4167_v50 = vunpack.i.h.bf16 %v4165_v23  ;;  %v4166_v42 = vunpack.i.l.bf16 %v4165_v23  ;;  %v4160_v44 = vpop.permute.xlu0 %4159  ;;  %2579 = vmatpush1.bf16.msra.mxu1 %v2013_v32  ;;  %v6468_v52 = vsel %vm629_vm2, %v4157_v9, %v4152_v55  ;;  %v1998_v23 = vsel %vm5150_vm8, %v6283_v53, %v6271_v27 }
 0x7e2   : > { %v4162_v56 = vunpack.i.h.bf16 %v4160_v44  ;;  %v4161_v19 = vunpack.i.l.bf16 %v4160_v44  ;;  %v6441_v44 = vsel %vm676_vm6, %v6287_v13, %v6267_v51  ;;  %v7746_v51 = vpack.c.bf16 %v5896_v21, %v5892_v38 }
 0x7e3   : > { %v6464_v13 = vsel %vm629_vm2, %v4152_v55, %v4157_v9  ;;  %v2041_v32 = vpack.c.bf16 %v6441_v44, %v6435_v4  ;;  %v6527_v43 = vsel %vm676_vm6, %v6335_v28, %v6315_v10  ;;  %v7748_v48 = vpack.c.bf16 %v5951_v20, %v5947_v3 }
 0x7e4   : > { %v4175_v39 = vpop.permute.xlu1 %4174  ;;  %v6445_v41 = vsel %vm543_vm1, %v4162_v56, %v4167_v50  ;;  %v6449_v31 = vsel %vm543_vm1, %v4167_v50, %v4162_v56  ;;  %v6453_v60 = vsel %vm543_vm1, %v4161_v19, %v4166_v42  ;;  %v6457_v30 = vsel %vm543_vm1, %v4166_v42, %v4161_v19  ;;  %2580 = vmatprep.subr.bf16.mxu1 %v7746_v51 }
 0x7e5   : > { %v6472_v50 = vsel %vm629_vm2, %v4151_v11, %v4156_v63  ;;  %v6476_v19 = vsel %vm629_vm2, %v4156_v63, %v4151_v11  ;;  %v4170_v42 = vpop.permute.xlu0 %4169  ;;  %v6492_v21 = vsel %vm676_vm6, %v6449_v31, %v6464_v13  ;;  %v2170_v11 = vsel %vm5150_vm8, %v6445_v41, %v6468_v52  ;;  %2581 = vmatpush1.bf16.msra.mxu1 %v7747_v46 }
 0x7e6   : > { %v6482_v38 = vsel %vm676_vm6, %v6457_v30, %v6472_v50  ;;  %v2168_v55 = vsel %vm5150_vm8, %v6453_v60, %v6476_v19  ;;  %v6498_v63 = vpack.c.bf16 %v1994_v58, %v1992_v5  ;;  %2582 = vmatprep.subr.bf16.mxu1 %v7748_v48  ;;  %v2000_v27 = vsel %vm5150_vm8, %v6339_v12, %v6327_v15 }
 0x7e7   : > { %v2215_v33 = vpack.c.bf16 %v6492_v21, %v6482_v38  ;;  %v6506_v54 = vpack.c.bf16 %v2170_v11, %v2168_v55  ;;  %v2002_v53 = vsel %vm5150_vm8, %v6331_v47, %v6319_v45  ;;  %v4177_v1 = vunpack.i.h.bf16 %v4175_v39 }
 0x7e8   : > { %v4185_v22 = vpop.permute.xlu1 %4184  ;;  %v4176_v10 = vunpack.i.l.bf16 %v4175_v39  ;;  %v4172_v28 = vunpack.i.h.bf16 %v4170_v42  ;;  %v4171_v9 = vunpack.i.l.bf16 %v4170_v42  ;;  %v6540_v5 = vpack.c.bf16 %v1998_v23, %v1996_v7 }
 0x7e9   : > { %v4187_v29 = vunpack.i.h.bf16 %v4185_v22  ;;  %v4186_v37 = vunpack.i.l.bf16 %v4185_v22  ;;  %v4180_v2 = vpop.permute.xlu0 %4179  ;;  %v2043_v3 = vpack.c.bf16 %v6527_v43, %v6521_v59  ;;  %v7749_v12 = vpack.c.bf16 %v5968_v8, %v5962_v34 }
 0x7ea   : > { %v4182_v20 = vunpack.i.h.bf16 %v4180_v2  ;;  %v4181_v56 = vunpack.i.l.bf16 %v4180_v2  ;;  %v6547_v45 = vpack.c.bf16 %v2002_v53, %v2000_v27  ;;  %v6553_v47 = vsel %vm676_vm6, %v6391_v18, %v6371_v49  ;;  %v7752_v53 = vld [vmem:[#allocation26_spill] sm:$0xff] }
 0x7eb   : > { %2583 = vmatpush1.bf16.msra.mxu1 %v7749_v12  ;;  %v2004_v58 = vsel %vm5150_vm8, %v6387_v0, %v6375_v36  ;;  %v6563_v39 = vsel %vm676_vm6, %v6383_v61, %v6363_v25  ;;  %v7750_v34 = vpack.c.bf16 %v6025_v16, %v6019_v26  ;;  %v2090_v26 = vsel %vm629_vm2, %v4172_v28, %v4177_v1 }
 0x7ec   : > { %v4195_v15 = vpop.permute.xlu1 %4194  ;;  %v6570_v8 = vsel %vm543_vm1, %v4182_v20, %v4187_v29  ;;  %v6574_v49 = vsel %vm543_vm1, %v4187_v29, %v4182_v20  ;;  %v6578_v36 = vsel %vm543_vm1, %v4181_v56, %v4186_v37  ;;  %v2145_v25 = vsel %vm543_vm1, %v4186_v37, %v4181_v56  ;;  %v7753_v29 = vld [vmem:[#allocation25_spill] sm:$0xff]  ;;  %v7756_v56 = vld [vmem:[#allocation30_spill] sm:$0xff] }
 0x7ed   : > { %2584 = vmatprep.subr.bf16.mxu1 %v7750_v34  ;;  %v4190_v61 = vpop.permute.xlu0 %4189  ;;  %v2098_v16 = vsel %vm629_vm2, %v4177_v1, %v4172_v28  ;;  %v2089_v0 = vsel %vm629_vm2, %v4171_v9, %v4176_v10  ;;  %v2097_v18 = vsel %vm629_vm2, %v4176_v10, %v4171_v9  ;;  %v6600_v55 = vsel %vm676_vm6, %v6574_v49, %v2090_v26  ;;  %v7755_v20 = vld [vmem:[#allocation29_spill] sm:$0xff] }
 0x7ee   : > { %v6592_v51 = vsel %vm676_vm6, %v2145_v25, %v2089_v0  ;;  %v2172_v42 = vsel %vm5150_vm8, %v6578_v36, %v2097_v18  ;;  %v2174_v11 = vsel %vm5150_vm8, %v6570_v8, %v2098_v16  ;;  %v7751_v22 = vpack.c.bf16 %v6042_v14, %v6036_v35 }
 0x7ef   : > { %v2217_v46 = vpack.c.bf16 %v6600_v55, %v6592_v51  ;;  %v6610_v23 = vpack.c.bf16 %v2174_v11, %v2172_v42  ;;  %v4197_v48 = vunpack.i.h.bf16 %v4195_v15  ;;  %v4196_v27 = vunpack.i.l.bf16 %v4195_v15  ;;  %v2478_v51 = vld [vmem:[#allocation2 + $0x1d8] sm:$0xff]  ;;  %v2477_v55 = vld [vmem:[#allocation2 + $0x1d0] sm:$0xff] }
 0x7f0   : > { %v4205_v7 = vpop.permute.xlu1 %4204  ;;  %2585 = vmatpush1.bf16.msra.mxu1 %v7751_v22  ;;  %v7754_v37 = vpack.c.bf16 %v7752_v53, %v7753_v29  ;;  %v4192_v2 = vunpack.i.h.bf16 %v4190_v61  ;;  %v4191_v1 = vunpack.i.l.bf16 %v4190_v61  ;;  %v2006_v35 = vsel %vm5150_vm8, %v7756_v56, %v7755_v20  ;;  %v7759_v29 = vld [vmem:[#allocation28_spill] sm:$0xff] }
 0x7f1   : > { %v4207_v10 = vunpack.i.h.bf16 %v4205_v7  ;;  %v4206_v28 = vunpack.i.l.bf16 %v4205_v7  ;;  %v4200_v9 = vpop.permute.xlu0 %4199  ;;  %v2045_v14 = vpack.c.bf16 %v6563_v39, %v6553_v47  ;;  %v6625_v42 = vsel %vm655_vm3, %v6472_v50, %v6457_v30  ;;  %v7760_v30 = vld [vmem:[#allocation27_spill] sm:$0xff] }
 0x7f2   : > { %2586 = vmatprep.subr.bf16.mxu1 %v7754_v37  ;;  %v4202_v12 = vunpack.i.h.bf16 %v4200_v9  ;;  %v4201_v34 = vunpack.i.l.bf16 %v4200_v9  ;;  %v2152_v11 = vsel %vm5141_vm5, %v6476_v19, %v6453_v60  ;;  %v6635_v7 = vsel %vm655_vm3, %v6464_v13, %v6449_v31 }
 0x7f3   : > { %v2154_v22 = vsel %vm5141_vm5, %v6468_v52, %v6445_v41  ;;  %v7761_v50 = vpack.c.bf16 %v7759_v29, %v7760_v30  ;;  %v2092_v41 = vsel %vm629_vm2, %v4192_v2, %v4197_v48  ;;  %v6661_v52 = vsel %vm629_vm2, %v4197_v48, %v4192_v2 }
 0x7f4   : > { %v4215_v53 = vpop.permute.xlu1 %4214  ;;  %v6646_v37 = vsel %vm543_vm1, %v4202_v12, %v4207_v10  ;;  %v2148_v60 = vsel %vm543_vm1, %v4207_v10, %v4202_v12  ;;  %v6652_v31 = vsel %vm543_vm1, %v4201_v34, %v4206_v28  ;;  %v2147_v13 = vsel %vm543_vm1, %v4206_v28, %v4201_v34 }
 0x7f5   : > { %2587 = vmatpush1.bf16.msra.mxu1 %v7761_v50  ;;  %v2091_v19 = vsel %vm629_vm2, %v4191_v1, %v4196_v27  ;;  %v6667_v10 = vsel %vm629_vm2, %v4196_v27, %v4191_v1  ;;  %v4210_v9 = vpop.permute.xlu0 %4209  ;;  %v6679_v48 = vsel %vm676_vm6, %v2148_v60, %v2092_v41  ;;  %v2178_v27 = vsel %vm5150_vm8, %v6646_v37, %v6661_v52 }
 0x7f6   : > { %2588 = vmatprep.subr.bf16.mxu1 %v6498_v63  ;;  %v6671_v28 = vsel %vm676_vm6, %v2147_v13, %v2091_v19  ;;  %v2176_v63 = vsel %vm5150_vm8, %v6652_v31, %v6667_v10  ;;  %v2156_v2 = vsel %vm5141_vm5, %v2097_v18, %v6578_v36  ;;  %v2158_v1 = vsel %vm5141_vm5, %v2098_v16, %v6570_v8 }
 0x7f7   : > { %v2219_v20 = vpack.c.bf16 %v6679_v48, %v6671_v28  ;;  %v6693_v56 = vpack.c.bf16 %v2178_v27, %v2176_v63  ;;  %v2046_v34 = vpack.c.bf16 %v2006_v35, %v2004_v58  ;;  %v2183_v29 = vpack.c.bf16 %v6635_v7, %v6625_v42  ;;  %v2482_v28 = vld [vmem:[#allocation2 + $0x1f8] sm:$0xff]  ;;  %v2481_v48 = vld [vmem:[#allocation2 + $0x1f0] sm:$0xff] }
 0x7f8   : > { %v4225_v12 = vpop.permute.xlu1 %4224  ;;  %v4217_v30 = vunpack.i.h.bf16 %v4215_v53  ;;  %v4212_v36 = vunpack.i.h.bf16 %v4210_v9  ;;  %v2184_v18 = vpack.c.bf16 %v2154_v22, %v2152_v11  ;;  %v6703_v8 = vsel %vm655_vm3, %v2089_v0, %v2145_v25 }
 0x7f9   : > { %2589 = vmatpush1.bf16.msra.mxu1 %v2039_v6  ;;  %v4227_v16 = vunpack.i.h.bf16 %v4225_v12  ;;  %v4226_v50 = vunpack.i.l.bf16 %v4225_v12  ;;  %v4220_v63 = vpop.permute.xlu0 %4219  ;;  %v6708_v57 = vsel %vm655_vm3, %v2090_v26, %v6574_v49  ;;  %v6710_v40 = vpack.c.bf16 %v2158_v1, %v2156_v2 }
 0x7fa   : > { %2590 = vmatprep.subr.bf16.mxu1 %v6540_v5  ;;  %v4216_v6 = vunpack.i.l.bf16 %v4215_v53  ;;  %v4211_v58 = vunpack.i.l.bf16 %v4210_v9  ;;  %v6714_v5 = vsel %vm655_vm3, %v2091_v19, %v2147_v13  ;;  %v2160_v25 = vsel %vm5141_vm5, %v6667_v10, %v6652_v31 }
 0x7fb   : > { %v4222_v0 = vunpack.i.h.bf16 %v4220_v63  ;;  %v4221_v35 = vunpack.i.l.bf16 %v4220_v63  ;;  %v6725_v49 = vsel %vm655_vm3, %v2092_v41, %v2148_v60  ;;  %v2162_v26 = vsel %vm5141_vm5, %v6661_v52, %v6646_v37 }
 0x7fc   : > { %v4235_v11 = vpop.permute.xlu1 %4234  ;;  %v2094_v22 = vsel %vm629_vm2, %v4212_v36, %v4217_v30  ;;  %v6735_v53 = vsel %vm629_vm2, %v4217_v30, %v4212_v36  ;;  %v2093_v41 = vsel %vm629_vm2, %v4211_v58, %v4216_v6  ;;  %v2188_v42 = vpack.c.bf16 %v2162_v26, %v2160_v25 }
 0x7fd   : > { %2591 = vmatpush1.bf16.msra.mxu1 %v2041_v32  ;;  %v6740_v4 = vsel %vm543_vm1, %v4222_v0, %v4227_v16  ;;  %v2150_v44 = vsel %vm543_vm1, %v4227_v16, %v4222_v0  ;;  %v6746_v32 = vsel %vm543_vm1, %v4221_v35, %v4226_v50  ;;  %v2149_v60 = vsel %vm543_vm1, %v4226_v50, %v4221_v35  ;;  %v4230_v13 = vpop.permute.xlu0 %4229 }
 0x7fe   : > { %2592 = vmatprep.subr.bf16.mxu1 %v6547_v45  ;;  %v2101_v45 = vsel %vm629_vm2, %v4216_v6, %v4211_v58  ;;  %v4237_v19 = vunpack.i.h.bf16 %v4235_v11  ;;  %v4236_v9 = vunpack.i.l.bf16 %v4235_v11  ;;  %v6756_v27 = vsel %vm676_vm6, %v2149_v60, %v2093_v41 }
 0x7ff   : > { %v2180_v2 = vsel %vm5150_vm8, %v6746_v32, %v2101_v45  ;;  %v6763_v1 = vsel %vm676_vm6, %v2150_v44, %v2094_v22  ;;  %v2182_v12 = vsel %vm5150_vm8, %v6740_v4, %v6735_v53  ;;  %v6774_v36 = vsel %vm655_vm3, %v2093_v41, %v2149_v60 }
 0x800   : > { %v4245_v30 = vpop.permute.xlu1 %4244  ;;  %v2164_v16 = vsel %vm5141_vm5, %v2101_v45, %v6746_v32  ;;  %v2221_v50 = vpack.c.bf16 %v6763_v1, %v6756_v27  ;;  %v6781_v63 = vpack.c.bf16 %v2182_v12, %v2180_v2  ;;  %v4232_v6 = vunpack.i.h.bf16 %v4230_v13  ;;  %v4537_v1 = vld [vmem:[%s7651_s8 + $0x30] ss:$20 sps:$4 sm:$0xff]  }
 0x801   : > { %2593 = vmatpush1.bf16.msra.mxu1 %v2043_v3  ;;  %v4231_v58 = vunpack.i.l.bf16 %v4230_v13  ;;  %v4247_v0 = vunpack.i.h.bf16 %v4245_v30  ;;  %v4246_v35 = vunpack.i.l.bf16 %v4245_v30  ;;  %v4240_v59 = vpop.permute.xlu0 %4239  ;;  %v6785_v43 = vsel %vm655_vm3, %v2094_v22, %v2150_v44 }
 0x802   : > { %2594 = vmatprep.subr.bf16.mxu1 %v2046_v34  ;;  %v2166_v3 = vsel %vm5141_vm5, %v6735_v53, %v6740_v4  ;;  %v4242_v11 = vunpack.i.h.bf16 %v4240_v59  ;;  %v4241_v32 = vunpack.i.l.bf16 %v4240_v59  ;;  %v2264_v60 = vsel %vm629_vm2, %v4232_v6, %v4237_v19 }
 0x803   : > { %v2272_v34 = vsel %vm629_vm2, %v4237_v19, %v4232_v6  ;;  %v2263_v13 = vsel %vm629_vm2, %v4231_v58, %v4236_v9  ;;  %v2271_v22 = vsel %vm629_vm2, %v4236_v9, %v4231_v58  ;;  %v2189_v7 = vpack.c.bf16 %v6785_v43, %v6774_v36 }
 0x804   : > { %v4255_v44 = vpop.permute.xlu1 %4254  ;;  %v2312_v53 = vsel %vm543_vm1, %v4242_v11, %v4247_v0  ;;  %v2320_v4 = vsel %vm543_vm1, %v4247_v0, %v4242_v11  ;;  %v2311_v41 = vsel %vm543_vm1, %v4241_v32, %v4246_v35  ;;  %v2319_v45 = vsel %vm543_vm1, %v4246_v35, %v4241_v32 }
 0x805   : > { %2595 = vmatpush1.bf16.msra.mxu1 %v2045_v14  ;;  %v6812_v19 = vsel %vm655_vm3, %v2263_v13, %v2319_v45  ;;  %v2328_v47 = vsel %vm5141_vm5, %v2271_v22, %v2311_v41  ;;  %v6818_v39 = vsel %vm655_vm3, %v2264_v60, %v2320_v4  ;;  %v2330_v14 = vsel %vm5141_vm5, %v2272_v34, %v2312_v53  ;;  %v4250_v9 = vpop.permute.xlu0 %4249 }
 0x806   : > { %2596 = vmatprep.subr.bf16.mxu1 %v2184_v18  ;;  %v6824_v2 = vsel %vm676_vm6, %v2319_v45, %v2263_v13  ;;  %v2344_v18 = vsel %vm5150_vm8, %v2311_v41, %v2271_v22  ;;  %v6830_v12 = vsel %vm676_vm6, %v2320_v4, %v2264_v60  ;;  %v2346_v30 = vsel %vm5150_vm8, %v2312_v53, %v2272_v34 }
 0x807   : > { %v2359_v6 = vpack.c.bf16 %v6818_v39, %v6812_v19  ;;  %v6836_v58 = vpack.c.bf16 %v2330_v14, %v2328_v47  ;;  %v6840_v35 = vpack.c.bf16 %v2346_v30, %v2344_v18  ;;  %v4257_v11 = vunpack.i.h.bf16 %v4255_v44  ;;  %v4538_v39 = vld [vmem:[%s7651_s8 + $0x10] ss:$20 sps:$4 sm:$0xff]  }
 0x808   : > { %v4265_v59 = vpop.permute.xlu1 %4264  ;;  %v4256_v32 = vunpack.i.l.bf16 %v4255_v44  ;;  %v4252_v60 = vunpack.i.h.bf16 %v4250_v9  ;;  %v4251_v13 = vunpack.i.l.bf16 %v4250_v9  ;;  %v2185_v34 = vpack.c.bf16 %v6708_v57, %v6703_v8 }
 0x809   : > { %2597 = vmatpush1.bf16.msra.mxu1 %v2183_v29  ;;  %v4267_v22 = vunpack.i.h.bf16 %v4265_v59  ;;  %v4266_v53 = vunpack.i.l.bf16 %v4265_v59  ;;  %v4260_v4 = vpop.permute.xlu0 %4259  ;;  %v2187_v41 = vpack.c.bf16 %v6725_v49, %v6714_v5  ;;  %v2190_v29 = vpack.c.bf16 %v2166_v3, %v2164_v16 }
 0x80a   : > { %2598 = vmatprep.subr.bf16.mxu1 %v6710_v40  ;;  %v2266_v8 = vsel %vm629_vm2, %v4252_v60, %v4257_v11  ;;  %v2274_v57 = vsel %vm629_vm2, %v4257_v11, %v4252_v60  ;;  %v4262_v40 = vunpack.i.h.bf16 %v4260_v4  ;;  %v4261_v5 = vunpack.i.l.bf16 %v4260_v4 }
 0x80b   : > { %v2265_v31 = vsel %vm629_vm2, %v4251_v13, %v4256_v32  ;;  %v2273_v37 = vsel %vm629_vm2, %v4256_v32, %v4251_v13  ;;  %v7764_v27 = vpack.c.bf16 %v6830_v12, %v6824_v2  ;;  %v7767_v19 = vmov 0   ;;  %v4539_v2 = vld [vmem:[%s7651_s8 + $0x38] ss:$20 sps:$4 sm:$0xff]  }
 0x80c   : > { %v4275_v49 = vpop.permute.xlu1 %4274  ;;  %v2314_v25 = vsel %vm543_vm1, %v4262_v40, %v4267_v22  ;;  %v2322_v26 = vsel %vm543_vm1, %v4267_v22, %v4262_v40  ;;  %v2313_v36 = vsel %vm543_vm1, %v4261_v5, %v4266_v53  ;;  %v2321_v16 = vsel %vm543_vm1, %v4266_v53, %v4261_v5 }
 0x80d   : > { %2599 = vmatpush1.bf16.msra.mxu1 %v2185_v34  ;;  %v4277_v52 = vunpack.i.h.bf16 %v4275_v49  ;;  %v4276_v10 = vunpack.i.l.bf16 %v4275_v49  ;;  %v4270_v43 = vpop.permute.xlu0 %4269  ;;  %v6880_v3 = vsel %vm655_vm3, %v2265_v31, %v2321_v16  ;;  %v2332_v44 = vsel %vm5141_vm5, %v2273_v37, %v2313_v36 }
 0x80e   : > { %2600 = vmatprep.subr.bf16.mxu1 %v2188_v42  ;;  %v6886_v45 = vsel %vm655_vm3, %v2266_v8, %v2322_v26  ;;  %v2334_v47 = vsel %vm5141_vm5, %v2274_v57, %v2314_v25  ;;  %v6892_v14 = vsel %vm676_vm6, %v2321_v16, %v2265_v31  ;;  %v2348_v9 = vsel %vm5150_vm8, %v2313_v36, %v2273_v37  ;;  %v2452_v37 = vld [vmem:[#allocation2 + $0x108] sm:$0xff] }
 0x80f   : > { %v6898_v18 = vsel %vm676_vm6, %v2322_v26, %v2266_v8  ;;  %v2350_v30 = vsel %vm5150_vm8, %v2314_v25, %v2274_v57  ;;  %v6904_v32 = vpack.c.bf16 %v2334_v47, %v2332_v44  ;;  %v4272_v34 = vunpack.i.h.bf16 %v4270_v43 }
 0x810   : > { %v4285_v59 = vpop.permute.xlu1 %4284  ;;  %v6908_v13 = vpack.c.bf16 %v2350_v30, %v2348_v9  ;;  %v4271_v22 = vunpack.i.l.bf16 %v4270_v43  ;;  %v7762_v38 = vpack.c.bf16 %v6886_v45, %v6880_v3 }
 0x811   : > { %2601 = vmatpush1.bf16.msra.mxu1 %v2187_v41  ;;  %v4287_v53 = vunpack.i.h.bf16 %v4285_v59  ;;  %v4286_v4 = vunpack.i.l.bf16 %v4285_v59  ;;  %v4280_v42 = vpop.permute.xlu0 %4279  ;;  %v4526_v41 = vld [vmem:[%s7651_s8] ss:$20 sps:$4 sm:$0xff]   ;;  %v2268_v40 = vsel %vm629_vm2, %v4272_v34, %v4277_v52  ;;  %v2276_v5 = vsel %vm629_vm2, %v4277_v52, %v4272_v34 }
 0x812   : > { %2602 = vmatprep.subr.bf16.mxu1 %v2190_v29  ;;  %v4282_v8 = vunpack.i.h.bf16 %v4280_v42  ;;  %v4281_v57 = vunpack.i.l.bf16 %v4280_v42  ;;  %v2267_v29 = vsel %vm629_vm2, %v4271_v22, %v4276_v10  ;;  %v2275_v49 = vsel %vm629_vm2, %v4276_v10, %v4271_v22  ;;  %v4529_v10 = vld [vmem:[%s7651_s8 + $0x2c] ss:$20 sps:$4 sm:$0xff]   ;;  %v2458_v42 = vld [vmem:[#allocation2 + $0x138] sm:$0xff] }
 0x813   : > { %v2451_v22 = vld [vmem:[#allocation2 + $0x100] sm:$0xff] }
 0x814   : > { %v4295_v31 = vpop.permute.xlu1 %4294  ;;  %v2316_v25 = vsel %vm543_vm1, %v4282_v8, %v4287_v53  ;;  %v2324_v26 = vsel %vm543_vm1, %v4287_v53, %v4282_v8  ;;  %v2315_v36 = vsel %vm543_vm1, %v4281_v57, %v4286_v4  ;;  %v2323_v52 = vsel %vm543_vm1, %v4286_v4, %v4281_v57 }
 0x815   : > { %2603 = vmatpush1.bf16.msra.mxu1 %v2189_v7  ;;  %v6934_v7 = vsel %vm655_vm3, %v2267_v29, %v2323_v52  ;;  %v2336_v16 = vsel %vm5141_vm5, %v2275_v49, %v2315_v36  ;;  %v6940_v43 = vsel %vm655_vm3, %v2268_v40, %v2324_v26  ;;  %v2338_v44 = vsel %vm5141_vm5, %v2276_v5, %v2316_v25  ;;  %v4290_v47 = vpop.permute.xlu0 %4289 }
 0x816   : > { %2625 = vmatprep.subr.bf16.mxu1 %v2452_v37  ;;  %v6946_v9 = vsel %vm676_vm6, %v2323_v52, %v2267_v29  ;;  %v2352_v30 = vsel %vm5150_vm8, %v2315_v36, %v2275_v49  ;;  %v6952_v59 = vsel %vm676_vm6, %v2324_v26, %v2268_v40  ;;  %v2354_v34 = vsel %vm5150_vm8, %v2316_v25, %v2276_v5  ;;  %v2454_v29 = vld [vmem:[#allocation2 + $0x118] sm:$0xff]  ;;  %v2453_v36 = vld [vmem:[#allocation2 + $0x110] sm:$0xff] }
 0x817   : > { %v2364_v4 = vpack.c.bf16 %v2338_v44, %v2336_v16  ;;  %v6960_v8 = vpack.c.bf16 %v2354_v34, %v2352_v30  ;;  %v4297_v49 = vunpack.i.h.bf16 %v4295_v31  ;;  %v4296_v40 = vunpack.i.l.bf16 %v4295_v31  ;;  %v4531_v52 = vld [vmem:[%s7651_s8 + $0x28] ss:$20 sps:$4 sm:$0xff]  }
 0x818   : > { %2605 = vmatmul.mubr.bf16.vlgmr.msra.gmra.mrb[8].mxu1 %v4526_v41  ;;  %v4305_v57 = vpop.permute.xlu1 %4304  ;;  %v4292_v37 = vunpack.i.h.bf16 %v4290_v47  ;;  %v4291_v26 = vunpack.i.l.bf16 %v4290_v47  ;;  %v2456_v30 = vld [vmem:[#allocation2 + $0x128] sm:$0xff]  ;;  %v7763_v21 = vpack.c.bf16 %v6940_v43, %v6934_v7 }
 0x819   : > { %2626 = vmatpush1.bf16.msra.mxu1 %v2451_v22  ;;  %2614 = vmatprep.mubr.bf16.mxu1 %v4529_v10  ;;  %v4307_v41 = vunpack.i.h.bf16 %v4305_v57  ;;  %v4306_v5 = vunpack.i.l.bf16 %v4305_v57  ;;  %v4300_v25 = vpop.permute.xlu0 %4299 }
 0x81a   : > { %2627 = vmatprep.subr.bf16.mxu1 %v2454_v29  ;;  %v4302_v16 = vunpack.i.h.bf16 %v4300_v25  ;;  %v4301_v44 = vunpack.i.l.bf16 %v4300_v25  ;;  %v2270_v34 = vsel %vm629_vm2, %v4292_v37, %v4297_v49  ;;  %v2278_v31 = vsel %vm629_vm2, %v4297_v49, %v4292_v37  ;;  %v4534_v49 = vld [vmem:[%s7651_s8 + $0xc] ss:$20 sps:$4 sm:$0xff]  }
 0x81b   : > { %v2269_v10 = vsel %vm629_vm2, %v4291_v26, %v4296_v40  ;;  %v2277_v47 = vsel %vm629_vm2, %v4296_v40, %v4291_v26 }
 0x81c   : > { %v2318_v22 = vsel %vm543_vm1, %v4302_v16, %v4307_v41  ;;  %v2326_v57 = vsel %vm543_vm1, %v4307_v41, %v4302_v16  ;;  %v2317_v29 = vsel %vm543_vm1, %v4301_v44, %v4306_v5  ;;  %v2325_v25 = vsel %vm543_vm1, %v4306_v5, %v4301_v44 }
 0x81d   : > { %2628 = vmatpush1.bf16.msra.mxu1 %v2453_v36  ;;  %v2339_v40 = vsel %vm655_vm3, %v2269_v10, %v2325_v25  ;;  %v2340_v37 = vsel %vm5141_vm5, %v2277_v47, %v2317_v29  ;;  %v2341_v26 = vsel %vm655_vm3, %v2270_v34, %v2326_v57  ;;  %v2342_v41 = vsel %vm5141_vm5, %v2278_v31, %v2318_v22  ;;  %v2455_v36 = vld [vmem:[#allocation2 + $0x120] sm:$0xff] }
 0x81e   : > { %2629 = vmatprep.subr.bf16.mxu1 %v2456_v30  ;;  %v2355_v5 = vsel %vm676_vm6, %v2325_v25, %v2269_v10  ;;  %v2356_v16 = vsel %vm5150_vm8, %v2317_v29, %v2277_v47  ;;  %v2357_v44 = vsel %vm676_vm6, %v2326_v57, %v2270_v34  ;;  %v2358_v30 = vsel %vm5150_vm8, %v2318_v22, %v2278_v31 }
 0x81f   : > { %v2365_v60 = vpack.c.bf16 %v2341_v26, %v2339_v40  ;;  %v2366_v0 = vpack.c.bf16 %v2342_v41, %v2340_v37  ;;  %v2397_v53 = vpack.c.bf16 %v2357_v44, %v2355_v5  ;;  %v2398_v11 = vpack.c.bf16 %v2358_v30, %v2356_v16 }
 0x820   : > { %2615 = vmatmul.mubr.bf16.gmra.mrb[12].mxu1 %v4531_v52  ;;  %v2457_v52 = vld [vmem:[#allocation2 + $0x130] sm:$0xff] }
 0x821   : > { %2630 = vmatpush1.bf16.msra.mxu1 %v2455_v36  ;;  %2657 = vmatprep.mubr.bf16.mxu1 %v4534_v49 }
 0x822   : > { %2631 = vmatprep.subr.bf16.mxu1 %v2458_v42 }
 0x825   : > { %2632 = vmatpush1.bf16.msra.mxu1 %v2457_v52 }
 0x826   : > { %2633 = vmatprep.subr.bf16.mxu1 %v6506_v54  ;;  %v2475_v54 = vld [vmem:[#allocation2 + $0x1c0] sm:$0xff] }
 0x829   : > { %2634 = vmatpush1.bf16.msra.mxu1 %v2215_v33  ;;  %v2476_v33 = vld [vmem:[#allocation2 + $0x1c8] sm:$0xff] }
 0x82a   : > { %2635 = vmatprep.subr.bf16.mxu1 %v6610_v23  ;;  %v2479_v23 = vld [vmem:[#allocation2 + $0x1e0] sm:$0xff]  ;;  %v2498_v12 = vpop.permute.xlu0 %2497 }
 0x82d   : > { %2636 = vmatpush1.bf16.msra.mxu1 %v2217_v46  ;;  %v2480_v46 = vld [vmem:[#allocation2 + $0x1e8] sm:$0xff] }
 0x82e   : > { %2637 = vmatprep.subr.bf16.mxu1 %v6693_v56  ;;  %v4535_v56 = vld [vmem:[%s7651_s8 + $0x34] ss:$20 sps:$4 sm:$0xff]  }
 0x831   : > { %2638 = vmatpush1.bf16.msra.mxu1 %v2219_v20  ;;  %v4532_v20 = vld [vmem:[%s7651_s8 + $0x8] ss:$20 sps:$4 sm:$0xff]  }
 0x832   : > { %2639 = vmatprep.subr.bf16.mxu1 %v6781_v63  ;;  %v7766_v63 = vpack.c.bf16 %v6952_v59, %v6946_v9  ;;  %v2508_v59 = vpop.permute.xlu0 %2507 }
 0x835   : > { %2640 = vmatpush1.bf16.msra.mxu1 %v2221_v50  ;;  %v7765_v50 = vpack.c.bf16 %v6898_v18, %v6892_v14 }
 0x836   : > { %2641 = vmatprep.subr.bf16.mxu1 %v6836_v58 }
 0x839   : > { %2642 = vmatpush1.bf16.msra.mxu1 %v2359_v6 }
 0x83a   : > { %2643 = vmatprep.subr.bf16.mxu1 %v6904_v32 }
 0x83d   : > { %2644 = vmatpush1.bf16.msra.mxu1 %v7762_v38 }
 0x83e   : > { %2645 = vmatprep.subr.bf16.mxu1 %v2364_v4 }
 0x841   : > { %2646 = vmatpush1.bf16.msra.mxu1 %v7763_v21 }
 0x842   : > { %2647 = vmatprep.subr.bf16.mxu1 %v2366_v0 }
 0x845   : > { %2648 = vmatpush1.bf16.msra.mxu1 %v2365_v60 }
 0x846   : > { %2649 = vmatprep.subr.bf16.mxu1 %v2476_v33 }
 0x849   : > { %2650 = vmatpush1.bf16.msra.mxu1 %v2475_v54 }
 0x84a   : > { %2651 = vmatprep.subr.bf16.mxu1 %v2478_v51 }
 0x84d   : > { %2652 = vmatpush1.bf16.msra.mxu1 %v2477_v55 }
 0x84e   : > { %2653 = vmatprep.subr.bf16.mxu1 %v2480_v46 }
 0x851   : > { %2654 = vmatpush1.bf16.msra.mxu1 %v2479_v23 }
 0x852   : > { %2655 = vmatprep.subr.bf16.mxu1 %v2482_v28 }
 0x855   : > { %2656 = vmatpush1.bf16.msra.mxu1 %v2481_v48 }
 0x856   : > { %2678 = vmatprep.subr.bf16.mxu1 %v6840_v35  ;;  %v2503_v35 = vpop.permute.xlu1 %2502 }
 0x858   : > { %2658 = vmatmul.mubr.bf16.vlgmr.msra.gmra.mrb[8].mxu1 %v4532_v20 }
 0x859   : > { %2679 = vmatpush1.bf16.msra.mxu1 %v7764_v27  ;;  %2667 = vmatprep.mubr.bf16.mxu1 %v4535_v56 }
 0x85a   : > { %2680 = vmatprep.subr.bf16.mxu1 %v6908_v13  ;;  %v2513_v31 = vpop.permute.xlu1 %2512 }
 0x85d   : > { %2681 = vmatpush1.bf16.msra.mxu1 %v7765_v50 }
 0x85e   : > { %2682 = vmatprep.subr.bf16.mxu1 %v6960_v8 }
 0x860   : > { %2668 = vmatmul.mubr.bf16.gmra.mrb[12].mxu1 %v4537_v1 }
 0x861   : > { %2683 = vmatpush1.bf16.msra.mxu1 %v7766_v63  ;;  %2710 = vmatprep.mubr.bf16.mxu1 %v7767_v19 }
 0x862   : > { %2684 = vmatprep.subr.bf16.mxu1 %v2398_v11 }
 0x865   : > { %2685 = vmatpush1.bf16.msra.mxu1 %v2397_v53 }
 0x868   : > { %3583 = vmatmul.mubr.msk.bf16.vlgmr.msra.gmra.mrb[8].mxu1 %vm2565_vm12, %v4538_v39 }
 0x869   : > { %2720 = vmatprep.mubr.bf16.mxu1 %v7767_v19 }
 0x870   : > { %3584 = vmatmul.mubr.msk.bf16.gmra.mrb[12].mxu1 %vm2565_vm12, %v4539_v2 }
 0x871   : > { %3390 = vmatprep.mubr.bf16.mxu1 %v7767_v19 }
 0x93b   : > { %v2712_v6 = vpop.f32.mrb[8].mxu1 }
 0x93c   : > { %v3616_v58 = vadd.f32 %v2712_v6, %v2498_v12  ;;  %v2714_v0 = vpop.f32.mrb[9].mxu1  ;;  %v3343_v6 = vld [vmem:[%s7775_s13] sm:$0xf]  ;;  %s3419_s13 = scalar_lea.sflag [#allocation5], %s5027_s25 }
 0x93d   : > { %v3617_v3 = vadd.f32 %v2714_v0, %v2498_v12  ;;  %v2716_v45 = vpop.f32.mrb[10].mxu1 }
 0x93e   : > { %v3618_v14 = vadd.f32 %v2716_v45, %v2503_v35  ;;  %v2718_v18 = vpop.f32.mrb[11].mxu1  ;;  %v2731_v32 = vmax.f32 %v3616_v58, 0.0 }
 0x93f   : > { %v3619_v11 = vadd.f32 %v2718_v18, %v2503_v35  ;;  %v2732_v13 = vmax.f32 %v3617_v3, 0.0 }
 0x940   : > { %v2733_v60 = vmax.f32 %v3618_v14, 0.0 }
 0x941   : > { %v2734_v7 = vmax.f32 %v3619_v11, 0.0 }
 0x942   : > { %v7057_v43 = vpack.c.bf16 %v2733_v60, %v2731_v32  ;;  %v7059_v9 = vpack.i.bf16 %v2733_v60, %v2731_v32 }
 0x943   : > { %v7061_v53 = vpack.c.bf16 %v2734_v7, %v2732_v13  ;;  %v2722_v4 = vpop.f32.mrb[12].mxu1  ;;  %v7063_v42 = vpack.i.bf16 %v2734_v7, %v2732_v13 }
 0x944   : > { %v3620_v8 = vadd.f32 %v2722_v4, %v2508_v59  ;;  %v2724_v34 = vpop.f32.mrb[13].mxu1  ;;  %4309 = vrot.lane.b32.xlu0 %v7059_v9, %s7737_s28 }
 0x945   : > { %v3621_v10 = vadd.f32 %v2724_v34, %v2508_v59  ;;  %v2726_v47 = vpop.f32.mrb[14].mxu1  ;;  %4319 = vrot.lane.b32.xlu1 %v7063_v42, %s7737_s28 }
 0x946   : > { %v3622_v22 = vadd.f32 %v2726_v47, %v2513_v31  ;;  %v2728_v57 = vpop.f32.mrb[15].mxu1  ;;  %v2735_v25 = vmax.f32 %v3620_v8, 0.0 }
 0x947   : > { %v3623_v29 = vadd.f32 %v2728_v57, %v2513_v31  ;;  %v2736_v40 = vmax.f32 %v3621_v10, 0.0 }
 0x948   : > { %v2737_v49 = vmax.f32 %v3622_v22, 0.0  ;;  %4314 = vrot.lane.b32.xlu0 %v7059_v9, %s7732_s24 }
 0x949   : > { %v2738_v37 = vmax.f32 %v3623_v29, 0.0  ;;  %4324 = vrot.lane.b32.xlu1 %v7063_v42, %s7732_s24 }
 0x94a   : > { %v7073_v26 = vpack.c.bf16 %v2737_v49, %v2735_v25  ;;  %v7075_v41 = vpack.i.bf16 %v2737_v49, %v2735_v25 }
 0x94b   : > { %v7077_v36 = vpack.c.bf16 %v2738_v37, %v2736_v40  ;;  %v7079_v5 = vpack.i.bf16 %v2738_v37, %v2736_v40 }
 0x94c   : > { %4329 = vrot.lane.b32.xlu0 %v7075_v41, %s7737_s28 }
 0x94d   : > { %4339 = vrot.lane.b32.xlu1 %v7079_v5, %s7737_s28 }
 0x950   : > { %4334 = vrot.lane.b32.xlu0 %v7075_v41, %s7732_s24 }
 0x951   : > { %4344 = vrot.lane.b32.xlu1 %v7079_v5, %s7732_s24 }
 0x9b6   : > { %v4310_v16 = vpop.permute.xlu0 %4309 }
 0x9b7   : > { %v4320_v44 = vpop.permute.xlu1 %4319  ;;  %v4312_v30 = vunpack.i.h.bf16 %v4310_v16  ;;  %v4311_v52 = vunpack.i.l.bf16 %v4310_v16 }
 0x9b8   : > { %v4322_v38 = vunpack.i.h.bf16 %v4320_v44  ;;  %v4321_v21 = vunpack.i.l.bf16 %v4320_v44 }
 0x9ba   : > { %v4315_v33 = vpop.permute.xlu0 %4314  ;;  %v2755_v28 = vsel %vm573_vm4, %v4311_v52, %v4321_v21  ;;  %v2756_v48 = vsel %vm573_vm4, %v4312_v30, %v4322_v38  ;;  %v2759_v20 = vsel %vm573_vm4, %v4321_v21, %v4311_v52  ;;  %v2760_v56 = vsel %vm573_vm4, %v4322_v38, %v4312_v30 }
 0x9bb   : > { %v4317_v54 = vunpack.i.h.bf16 %v4315_v33  ;;  %v4316_v51 = vunpack.i.l.bf16 %v4315_v33  ;;  %v4325_v55 = vpop.permute.xlu1 %4324 }
 0x9bc   : > { %v4327_v46 = vunpack.i.h.bf16 %v4325_v55  ;;  %v4326_v23 = vunpack.i.l.bf16 %v4325_v55 }
 0x9be   : > { %v2779_v27 = vsel %vm580_vm7, %v4316_v51, %v4326_v23  ;;  %v2780_v1 = vsel %vm580_vm7, %v4317_v54, %v4327_v46  ;;  %v2783_v50 = vsel %vm580_vm7, %v4326_v23, %v4316_v51  ;;  %v2784_v63 = vsel %vm580_vm7, %v4327_v46, %v4317_v54  ;;  %v4330_v39 = vpop.permute.xlu0 %4329 }
 0x9bf   : > { %v2787_v12 = vsel %vm600_vm13, %v2755_v28, %v2783_v50  ;;  %v2788_v58 = vsel %vm5102_vm14, %v2759_v20, %v2779_v27  ;;  %v2789_v0 = vsel %vm600_vm13, %v2756_v48, %v2784_v63  ;;  %v2790_v35 = vsel %vm5102_vm14, %v2760_v56, %v2780_v1  ;;  %v4340_v3 = vpop.permute.xlu1 %4339 }
 0x9c0   : > { %v7115_v14 = vsel %vm621_vm15, %v2783_v50, %v2755_v28  ;;  %v7119_v11 = vsel %vm5111_vm0, %v2779_v27, %v2759_v20  ;;  %v7123_v32 = vsel %vm621_vm15, %v2784_v63, %v2756_v48  ;;  %v7127_v60 = vsel %vm5111_vm0, %v2780_v1, %v2760_v56 }
 0x9c1   : > { %v7129_v13 = vpack.c.bf16 %v2789_v0, %v2787_v12  ;;  %v7131_v7 = vpack.c.bf16 %v2790_v35, %v2788_v58  ;;  %v3051_v59 = vpack.c.bf16 %v7123_v32, %v7115_v14  ;;  %v3052_v4 = vpack.c.bf16 %v7127_v60, %v7119_v11 }
 0x9c2   : > { %v4332_v8 = vunpack.i.h.bf16 %v4330_v39  ;;  %v4331_v34 = vunpack.i.l.bf16 %v4330_v39  ;;  %v4342_v31 = vunpack.i.h.bf16 %v4340_v3  ;;  %v4341_v10 = vunpack.i.l.bf16 %v4340_v3  ;;  %v4335_v47 = vpop.permute.xlu0 %4334 }
 0x9c3   : > { %2879 = vst [vmem:[#allocation2 + $0x20] sm:$0xff] %v7129_v13  ;;  %2880 = vst [vmem:[#allocation2 + $0x28] sm:$0xff] %v7131_v7  ;;  %v4337_v22 = vunpack.i.h.bf16 %v4335_v47  ;;  %v4336_v57 = vunpack.i.l.bf16 %v4335_v47  ;;  %v4353_v29 = vpack.i.bf16 %v2790_v35, %v2788_v58  ;;  %v4348_v25 = vpack.i.bf16 %v2789_v0, %v2787_v12  ;;  %v4345_v49 = vpop.permute.xlu1 %4344  ;;  %v7235_v0 = vld [vmem:[%s7772_s29] sm:$0xff]  ;;  %s523_s29 = scalar_lea.vmem [#allocation11], %s3548_s19 }
 0x9c4   : > { %v2757_v40 = vsel %vm573_vm4, %v4331_v34, %v4341_v10  ;;  %v2758_v37 = vsel %vm573_vm4, %v4332_v8, %v4342_v31  ;;  %v4347_v16 = vunpack.i.h.bf16 %v4345_v49  ;;  %v4346_v44 = vunpack.i.l.bf16 %v4345_v49  ;;  %s3433_s0 = sshll.u32 %s523_s29, 4  ;;  %s7601_s0 = int_to_ptr.vmem [resolvable:$true] %s3433_s0 }
 0x9c5   : > { %4354 = vrot.lane.b32.xlu1 %v4353_v29, %s7738_s23  ;;  %4349 = vrot.lane.b32.xlu0 %v4348_v25, %s7738_s23  ;;  %v2761_v30 = vsel %vm573_vm4, %v4341_v10, %v4331_v34  ;;  %v2762_v52 = vsel %vm573_vm4, %v4342_v31, %v4332_v8  ;;  %v4433_v58 = vpack.i.bf16 %v7127_v60, %v7119_v11 }
 0x9c6   : > { %v2781_v38 = vsel %vm580_vm7, %v4336_v57, %v4346_v44  ;;  %v2782_v21 = vsel %vm580_vm7, %v4337_v22, %v4347_v16  ;;  %v2785_v33 = vsel %vm580_vm7, %v4346_v44, %v4336_v57  ;;  %v2786_v54 = vsel %vm580_vm7, %v4347_v16, %v4337_v22 }
 0x9c7   : > { %v2791_v51 = vsel %vm600_vm13, %v2757_v40, %v2785_v33  ;;  %v2792_v55 = vsel %vm5102_vm14, %v2761_v30, %v2781_v38  ;;  %v2793_v46 = vsel %vm600_vm13, %v2758_v37, %v2786_v54  ;;  %v2794_v23 = vsel %vm5102_vm14, %v2762_v52, %v2782_v21 }
 0x9c8   : > { %v7167_v28 = vsel %vm621_vm15, %v2785_v33, %v2757_v40  ;;  %v7171_v48 = vsel %vm5111_vm0, %v2781_v38, %v2761_v30  ;;  %v7175_v20 = vsel %vm621_vm15, %v2786_v54, %v2758_v37  ;;  %v7179_v56 = vsel %vm5111_vm0, %v2782_v21, %v2762_v52 }
 0x9c9   : > { %4364 = vrot.lane.b32.xlu1 %v4353_v29, %s7739_s27  ;;  %v7182_v27 = vpack.c.bf16 %v2793_v46, %v2791_v51  ;;  %v7184_v1 = vpack.c.bf16 %v2794_v23, %v2792_v55  ;;  %v3054_v63 = vpack.c.bf16 %v7179_v56, %v7171_v48  ;;  %4359 = vrot.lane.b32.xlu0 %v4348_v25, %s7739_s27 }
 0x9ca   : > { %v4373_v39 = vpack.i.bf16 %v2794_v23, %v2792_v55  ;;  %v4368_v12 = vpack.i.bf16 %v2793_v46, %v2791_v51  ;;  %v3586_v35 = vcombine.high %v7235_v0, %v7235_v0 }
 0x9cb   : > { %2881 = vst [vmem:[#allocation2 + $0x30] sm:$0xff] %v7182_v27  ;;  %2882 = vst [vmem:[#allocation2 + $0x38] sm:$0xff] %v7184_v1 }
 0x9cc   : > { %3156 = vmatprep.mubr.bf16.mxu0 %v3586_v35 }
 0x9cd   : > { %4374 = vrot.lane.b32.xlu1 %v4373_v39, %s7738_s23  ;;  %4369 = vrot.lane.b32.xlu0 %v4368_v12, %s7738_s23 }
 0x9d1   : > { %4384 = vrot.lane.b32.xlu1 %v4373_v39, %s7739_s27  ;;  %4379 = vrot.lane.b32.xlu0 %v4368_v12, %s7739_s27 }
 0x9d5   : > { %4394 = vrot.lane.b32.xlu1 %v7063_v42, %s7738_s23  ;;  %4389 = vrot.lane.b32.xlu0 %v7059_v9, %s7738_s23 }
 0x9d9   : > { %4404 = vrot.lane.b32.xlu1 %v7063_v42, %s7739_s27  ;;  %4399 = vrot.lane.b32.xlu0 %v7059_v9, %s7739_s27  ;;  %v4428_v42 = vpack.i.bf16 %v7123_v32, %v7115_v14  ;;  %v4453_v9 = vpack.i.bf16 %v7179_v56, %v7171_v48 }
 0x9dd   : > { %4414 = vrot.lane.b32.xlu1 %v7079_v5, %s7738_s23  ;;  %4409 = vrot.lane.b32.xlu0 %v7075_v41, %s7738_s23 }
 0x9e1   : > { %4424 = vrot.lane.b32.xlu1 %v7079_v5, %s7739_s27  ;;  %4419 = vrot.lane.b32.xlu0 %v7075_v41, %s7739_s27  ;;  %v4448_v41 = vpack.i.bf16 %v7175_v20, %v7167_v28  ;;  %v3105_v5 = vld [vmem:[%s7654_s11] sm:$0xff] }
 0x9e5   : > { %4434 = vrot.lane.b32.xlu1 %v4433_v58, %s7738_s23  ;;  %4429 = vrot.lane.b32.xlu0 %v4428_v42, %s7738_s23 }
 0x9e9   : > { %4444 = vrot.lane.b32.xlu1 %v4433_v58, %s7739_s27  ;;  %4439 = vrot.lane.b32.xlu0 %v4428_v42, %s7739_s27 }
 0x9ed   : > { %4454 = vrot.lane.b32.xlu1 %v4453_v9, %s7738_s23  ;;  %4449 = vrot.lane.b32.xlu0 %v4448_v41, %s7738_s23 }
 0x9f1   : > { %4464 = vrot.lane.b32.xlu1 %v4453_v9, %s7739_s27  ;;  %4459 = vrot.lane.b32.xlu0 %v4448_v41, %s7739_s27 }
 0x9f5   : > { %3108 = vperm.xlu0 %3786, %v3105_v5  }
 0xa37   : > { %v4355_v3 = vpop.permute.xlu1 %4354  ;;  %v4350_v8 = vpop.permute.xlu0 %4349 }
 0xa38   : > { %v4357_v34 = vunpack.i.h.bf16 %v4355_v3  ;;  %v4356_v31 = vunpack.i.l.bf16 %v4355_v3  ;;  %v4352_v10 = vunpack.i.h.bf16 %v4350_v8  ;;  %v4351_v47 = vunpack.i.l.bf16 %v4350_v8 }
 0xa3a   : > { %v2820_v37 = vsel %vm629_vm2, %v4352_v10, %v4357_v34  ;;  %v2824_v16 = vsel %vm629_vm2, %v4357_v34, %v4352_v10  ;;  %v2819_v44 = vsel %vm629_vm2, %v4351_v47, %v4356_v31  ;;  %v2823_v30 = vsel %vm629_vm2, %v4356_v31, %v4351_v47 }
 0xa3b   : > { %v4365_v22 = vpop.permute.xlu1 %4364  ;;  %v4360_v25 = vpop.permute.xlu0 %4359 }
 0xa3c   : > { %v4367_v57 = vunpack.i.h.bf16 %v4365_v22  ;;  %v4366_v29 = vunpack.i.l.bf16 %v4365_v22  ;;  %v4362_v49 = vunpack.i.h.bf16 %v4360_v25  ;;  %v4361_v40 = vunpack.i.l.bf16 %v4360_v25 }
 0xa3e   : > { %v2844_v52 = vsel %vm543_vm1, %v4362_v49, %v4367_v57  ;;  %v2848_v38 = vsel %vm543_vm1, %v4367_v57, %v4362_v49  ;;  %v2843_v21 = vsel %vm543_vm1, %v4361_v40, %v4366_v29  ;;  %v2847_v33 = vsel %vm543_vm1, %v4366_v29, %v4361_v40 }
 0xa3f   : > { %v4375_v54 = vpop.permute.xlu1 %4374  ;;  %v2851_v51 = vsel %vm655_vm3, %v2819_v44, %v2847_v33  ;;  %v2852_v55 = vsel %vm5141_vm5, %v2823_v30, %v2843_v21  ;;  %v2853_v46 = vsel %vm655_vm3, %v2820_v37, %v2848_v38  ;;  %v2854_v23 = vsel %vm5141_vm5, %v2824_v16, %v2844_v52  ;;  %v4370_v39 = vpop.permute.xlu0 %4369 }
 0xa40   : > { %v2859_v12 = vsel %vm676_vm6, %v2847_v33, %v2819_v44  ;;  %v2860_v58 = vsel %vm5150_vm8, %v2843_v21, %v2823_v30  ;;  %v2861_v42 = vsel %vm676_vm6, %v2848_v38, %v2820_v37  ;;  %v2862_v9 = vsel %vm5150_vm8, %v2844_v52, %v2824_v16 }
 0xa41   : > { %v2867_v41 = vpack.c.bf16 %v2853_v46, %v2851_v51  ;;  %v2868_v5 = vpack.c.bf16 %v2854_v23, %v2852_v55  ;;  %v7271_v35 = vpack.c.bf16 %v2861_v42, %v2859_v12  ;;  %v7273_v3 = vpack.c.bf16 %v2862_v9, %v2860_v58 }
 0xa42   : > { %v4377_v8 = vunpack.i.h.bf16 %v4375_v54  ;;  %v4376_v34 = vunpack.i.l.bf16 %v4375_v54  ;;  %v4372_v31 = vunpack.i.h.bf16 %v4370_v39  ;;  %v4371_v10 = vunpack.i.l.bf16 %v4370_v39 }
 0xa43   : > { %v4385_v47 = vpop.permute.xlu1 %4384  ;;  %2871 = vst [vmem:[#allocation2] sm:$0xff] %v2867_v41  ;;  %2872 = vst [vmem:[#allocation2 + $0x8] sm:$0xff] %v2868_v5  ;;  %v4380_v29 = vpop.permute.xlu0 %4379  ;;  %3124 = vmatprep.subr.bf16.mxu0 %v2868_v5 }
 0xa44   : > { %2887 = vst [vmem:[#allocation2 + $0x40] sm:$0xff] %v7271_v35  ;;  %2888 = vst [vmem:[#allocation2 + $0x48] sm:$0xff] %v7273_v3  ;;  %v4387_v22 = vunpack.i.h.bf16 %v4385_v47  ;;  %v4386_v57 = vunpack.i.l.bf16 %v4385_v47  ;;  %3125 = vmatpush1.bf16.msra.mxu0 %v2867_v41  ;;  %v4382_v25 = vunpack.i.h.bf16 %v4380_v29  ;;  %v4381_v49 = vunpack.i.l.bf16 %v4380_v29 }
 0xa45   : > { %v2822_v40 = vsel %vm629_vm2, %v4372_v31, %v4377_v8  ;;  %v2826_v37 = vsel %vm629_vm2, %v4377_v8, %v4372_v31  ;;  %v2821_v16 = vsel %vm629_vm2, %v4371_v10, %v4376_v34  ;;  %v2825_v44 = vsel %vm629_vm2, %v4376_v34, %v4371_v10 }
 0xa46   : > { %v2846_v52 = vsel %vm543_vm1, %v4382_v25, %v4387_v22  ;;  %v2850_v38 = vsel %vm543_vm1, %v4387_v22, %v4382_v25  ;;  %v2845_v21 = vsel %vm543_vm1, %v4381_v49, %v4386_v57  ;;  %v2849_v33 = vsel %vm543_vm1, %v4386_v57, %v4381_v49 }
 0xa47   : > { %v4395_v30 = vpop.permute.xlu1 %4394  ;;  %v4390_v54 = vpop.permute.xlu0 %4389  ;;  %v2855_v51 = vsel %vm655_vm3, %v2821_v16, %v2849_v33  ;;  %v2856_v55 = vsel %vm5141_vm5, %v2825_v44, %v2845_v21  ;;  %v2857_v46 = vsel %vm655_vm3, %v2822_v40, %v2850_v38  ;;  %v2858_v23 = vsel %vm5141_vm5, %v2826_v37, %v2846_v52 }
 0xa48   : > { %v7303_v39 = vsel %vm676_vm6, %v2849_v33, %v2821_v16  ;;  %v2864_v12 = vsel %vm5150_vm8, %v2845_v21, %v2825_v44  ;;  %v7309_v58 = vsel %vm676_vm6, %v2850_v38, %v2822_v40  ;;  %v2866_v42 = vsel %vm5150_vm8, %v2846_v52, %v2826_v37 }
 0xa49   : > { %v2869_v9 = vpack.c.bf16 %v2857_v46, %v2855_v51  ;;  %v2870_v41 = vpack.c.bf16 %v2858_v23, %v2856_v55  ;;  %v2885_v5 = vpack.c.bf16 %v7309_v58, %v7303_v39  ;;  %v7315_v8 = vpack.c.bf16 %v2866_v42, %v2864_v12 }
 0xa4a   : > { %v4397_v31 = vunpack.i.h.bf16 %v4395_v30  ;;  %v4396_v10 = vunpack.i.l.bf16 %v4395_v30  ;;  %v4392_v47 = vunpack.i.h.bf16 %v4390_v54  ;;  %v4391_v22 = vunpack.i.l.bf16 %v4390_v54 }
 0xa4b   : > { %v4405_v34 = vpop.permute.xlu1 %4404  ;;  %v4400_v57 = vpop.permute.xlu0 %4399  ;;  %2873 = vst [vmem:[#allocation2 + $0x10] sm:$0xff] %v2869_v9  ;;  %2874 = vst [vmem:[#allocation2 + $0x18] sm:$0xff] %v2870_v41  ;;  %3126 = vmatprep.subr.bf16.mxu0 %v2870_v41 }
 0xa4c   : > { %v4407_v29 = vunpack.i.h.bf16 %v4405_v34  ;;  %v4406_v25 = vunpack.i.l.bf16 %v4405_v34  ;;  %v4402_v49 = vunpack.i.h.bf16 %v4400_v57  ;;  %v4401_v40 = vunpack.i.l.bf16 %v4400_v57  ;;  %3127 = vmatpush1.bf16.msra.mxu0 %v2869_v9 }
 0xa4d   : > { %v2908_v37 = vsel %vm629_vm2, %v4392_v47, %v4397_v31  ;;  %v2912_v16 = vsel %vm629_vm2, %v4397_v31, %v4392_v47  ;;  %v2907_v44 = vsel %vm629_vm2, %v4391_v22, %v4396_v10  ;;  %v2911_v30 = vsel %vm629_vm2, %v4396_v10, %v4391_v22  ;;  %3128 = vmatprep.subr.bf16.mxu0 %v7131_v7 }
 0xa4e   : > { %v2932_v52 = vsel %vm543_vm1, %v4402_v49, %v4407_v29  ;;  %v2936_v38 = vsel %vm543_vm1, %v4407_v29, %v4402_v49  ;;  %v2931_v21 = vsel %vm543_vm1, %v4401_v40, %v4406_v25  ;;  %v2935_v33 = vsel %vm543_vm1, %v4406_v25, %v4401_v40 }
 0xa4f   : > { %v4415_v54 = vpop.permute.xlu1 %4414  ;;  %v7336_v51 = vsel %vm655_vm3, %v2907_v44, %v2935_v33  ;;  %v2940_v55 = vsel %vm5141_vm5, %v2911_v30, %v2931_v21  ;;  %v7342_v46 = vsel %vm655_vm3, %v2908_v37, %v2936_v38  ;;  %v2942_v23 = vsel %vm5141_vm5, %v2912_v16, %v2932_v52  ;;  %v4410_v12 = vpop.permute.xlu0 %4409 }
 0xa50   : > { %v7348_v42 = vsel %vm676_vm6, %v2935_v33, %v2907_v44  ;;  %v2948_v7 = vsel %vm5150_vm8, %v2931_v21, %v2911_v30  ;;  %v7354_v9 = vsel %vm676_vm6, %v2936_v38, %v2908_v37  ;;  %v2950_v41 = vsel %vm5150_vm8, %v2932_v52, %v2912_v16  ;;  %3129 = vmatpush1.bf16.msra.mxu0 %v7129_v13 }
 0xa51   : > { %v2955_v34 = vpack.c.bf16 %v7342_v46, %v7336_v51  ;;  %v2956_v31 = vpack.c.bf16 %v2942_v23, %v2940_v55  ;;  %v2971_v10 = vpack.c.bf16 %v7354_v9, %v7348_v42  ;;  %v7362_v47 = vpack.c.bf16 %v2950_v41, %v2948_v7  ;;  %3130 = vmatprep.subr.bf16.mxu0 %v7184_v1 }
 0xa52   : > { %v4417_v22 = vunpack.i.h.bf16 %v4415_v54  ;;  %v4416_v57 = vunpack.i.l.bf16 %v4415_v54  ;;  %v4412_v29 = vunpack.i.h.bf16 %v4410_v12  ;;  %v4411_v25 = vunpack.i.l.bf16 %v4410_v12 }
 0xa53   : > { %v4425_v49 = vpop.permute.xlu1 %4424  ;;  %v4420_v16 = vpop.permute.xlu0 %4419 }
 0xa54   : > { %v4427_v40 = vunpack.i.h.bf16 %v4425_v49  ;;  %v4426_v37 = vunpack.i.l.bf16 %v4425_v49  ;;  %v4422_v44 = vunpack.i.h.bf16 %v4420_v16  ;;  %v4421_v30 = vunpack.i.l.bf16 %v4420_v16  ;;  %3131 = vmatpush1.bf16.msra.mxu0 %v7182_v27 }
 0xa55   : > { %v2910_v52 = vsel %vm629_vm2, %v4412_v29, %v4417_v22  ;;  %v2914_v13 = vsel %vm629_vm2, %v4417_v22, %v4412_v29  ;;  %v2909_v38 = vsel %vm629_vm2, %v4411_v25, %v4416_v57  ;;  %v2913_v21 = vsel %vm629_vm2, %v4416_v57, %v4411_v25  ;;  %3132 = vmatprep.subr.bf16.mxu0 %v7273_v3 }
 0xa56   : > { %v2934_v33 = vsel %vm543_vm1, %v4422_v44, %v4427_v40  ;;  %v2938_v27 = vsel %vm543_vm1, %v4427_v40, %v4422_v44  ;;  %v2933_v54 = vsel %vm543_vm1, %v4421_v30, %v4426_v37  ;;  %v2937_v55 = vsel %vm543_vm1, %v4426_v37, %v4421_v30 }
 0xa57   : > { %v4435_v1 = vpop.permute.xlu1 %4434  ;;  %v4430_v23 = vpop.permute.xlu0 %4429  ;;  %v2943_v12 = vsel %vm655_vm3, %v2909_v38, %v2937_v55  ;;  %v2944_v7 = vsel %vm5141_vm5, %v2913_v21, %v2933_v54  ;;  %v2945_v3 = vsel %vm655_vm3, %v2910_v52, %v2938_v27  ;;  %v2946_v41 = vsel %vm5141_vm5, %v2914_v13, %v2934_v33 }
 0xa58   : > { %v7394_v22 = vsel %vm676_vm6, %v2937_v55, %v2909_v38  ;;  %v2952_v57 = vsel %vm5150_vm8, %v2933_v54, %v2913_v21  ;;  %v7400_v29 = vsel %vm676_vm6, %v2938_v27, %v2910_v52  ;;  %v2954_v25 = vsel %vm5150_vm8, %v2934_v33, %v2914_v13  ;;  %3133 = vmatpush1.bf16.msra.mxu0 %v7271_v35 }
 0xa59   : > { %v2957_v49 = vpack.c.bf16 %v2945_v3, %v2943_v12  ;;  %v2958_v40 = vpack.c.bf16 %v2946_v41, %v2944_v7  ;;  %v2973_v37 = vpack.c.bf16 %v7400_v29, %v7394_v22  ;;  %v7407_v16 = vpack.c.bf16 %v2954_v25, %v2952_v57  ;;  %3134 = vmatprep.subr.bf16.mxu0 %v7315_v8 }
 0xa5a   : > { %v4437_v30 = vunpack.i.h.bf16 %v4435_v1  ;;  %v4436_v38 = vunpack.i.l.bf16 %v4435_v1  ;;  %v4432_v21 = vunpack.i.h.bf16 %v4430_v23  ;;  %v4431_v52 = vunpack.i.l.bf16 %v4430_v23 }
 0xa5b   : > { %v4445_v44 = vpop.permute.xlu1 %4444  ;;  %v4440_v27 = vpop.permute.xlu0 %4439 }
 0xa5c   : > { %v4447_v54 = vunpack.i.h.bf16 %v4445_v44  ;;  %v4446_v55 = vunpack.i.l.bf16 %v4445_v44  ;;  %v4442_v13 = vunpack.i.h.bf16 %v4440_v27  ;;  %v4441_v33 = vunpack.i.l.bf16 %v4440_v27  ;;  %3135 = vmatpush1.bf16.msra.mxu0 %v2885_v5 }
 0xa5d   : > { %v2996_v35 = vsel %vm629_vm2, %v4432_v21, %v4437_v30  ;;  %v3000_v12 = vsel %vm629_vm2, %v4437_v30, %v4432_v21  ;;  %v2995_v7 = vsel %vm629_vm2, %v4431_v52, %v4436_v38  ;;  %v2999_v8 = vsel %vm629_vm2, %v4436_v38, %v4431_v52  ;;  %3136 = vmatprep.subr.bf16.mxu0 %v2956_v31 }
 0xa5e   : > { %v3020_v1 = vsel %vm543_vm1, %v4442_v13, %v4447_v54  ;;  %v3024_v23 = vsel %vm543_vm1, %v4447_v54, %v4442_v13  ;;  %v3019_v3 = vsel %vm543_vm1, %v4441_v33, %v4446_v55  ;;  %v3023_v41 = vsel %vm543_vm1, %v4446_v55, %v4441_v33 }
 0xa5f   : > { %v4455_v57 = vpop.permute.xlu1 %4454  ;;  %v3027_v25 = vsel %vm655_vm3, %v2995_v7, %v3023_v41  ;;  %v3028_v39 = vsel %vm5141_vm5, %v2999_v8, %v3019_v3  ;;  %v3029_v58 = vsel %vm655_vm3, %v2996_v35, %v3024_v23  ;;  %v3030_v5 = vsel %vm5141_vm5, %v3000_v12, %v3020_v1  ;;  %v4450_v44 = vpop.permute.xlu0 %4449 }
 0xa60   : > { %v3035_v30 = vsel %vm676_vm6, %v3023_v41, %v2995_v7  ;;  %v3036_v38 = vsel %vm5150_vm8, %v3019_v3, %v2999_v8  ;;  %v3037_v31 = vsel %vm676_vm6, %v3024_v23, %v2996_v35  ;;  %v3038_v21 = vsel %vm5150_vm8, %v3020_v1, %v3000_v12  ;;  %3137 = vmatpush1.bf16.msra.mxu0 %v2955_v34 }
 0xa61   : > { %v3043_v52 = vpack.c.bf16 %v3029_v58, %v3027_v25  ;;  %v3044_v27 = vpack.c.bf16 %v3030_v5, %v3028_v39  ;;  %v3059_v54 = vpack.c.bf16 %v3037_v31, %v3035_v30  ;;  %v3060_v55 = vpack.c.bf16 %v3038_v21, %v3036_v38  ;;  %3138 = vmatprep.subr.bf16.mxu0 %v2958_v40 }
 0xa62   : > { %v4457_v13 = vunpack.i.h.bf16 %v4455_v57  ;;  %v4456_v33 = vunpack.i.l.bf16 %v4455_v57  ;;  %v4452_v7 = vunpack.i.h.bf16 %v4450_v44  ;;  %v4451_v41 = vunpack.i.l.bf16 %v4450_v44 }
 0xa63   : > { %v4465_v50 = vpop.permute.xlu1 %4464  ;;  %3063 = vst [vmem:[#allocation2 + $0x100] sm:$0xff] %v3059_v54  ;;  %3064 = vst [vmem:[#allocation2 + $0x108] sm:$0xff] %v3060_v55  ;;  %v4460_v23 = vpop.permute.xlu0 %4459 }
 0xa64   : > { %v4467_v35 = vunpack.i.h.bf16 %v4465_v50  ;;  %v4466_v8 = vunpack.i.l.bf16 %v4465_v50  ;;  %v4462_v12 = vunpack.i.h.bf16 %v4460_v23  ;;  %v4461_v1 = vunpack.i.l.bf16 %v4460_v23  ;;  %3139 = vmatpush1.bf16.msra.mxu0 %v2957_v49 }
 0xa65   : > { %v2998_v3 = vsel %vm629_vm2, %v4452_v7, %v4457_v13  ;;  %v3002_v51 = vsel %vm629_vm2, %v4457_v13, %v4452_v7  ;;  %v2997_v46 = vsel %vm629_vm2, %v4451_v41, %v4456_v33  ;;  %v3001_v34 = vsel %vm629_vm2, %v4456_v33, %v4451_v41  ;;  %3140 = vmatprep.subr.bf16.mxu0 %v7061_v53 }
 0xa66   : > { %v3022_v50 = vsel %vm543_vm1, %v4462_v12, %v4467_v35  ;;  %v3026_v49 = vsel %vm543_vm1, %v4467_v35, %v4462_v12  ;;  %v3021_v40 = vsel %vm543_vm1, %v4461_v1, %v4466_v8  ;;  %v3025_v57 = vsel %vm543_vm1, %v4466_v8, %v4461_v1 }
 0xa67   : > { %v3031_v25 = vsel %vm655_vm3, %v2997_v46, %v3025_v57  ;;  %v3032_v39 = vsel %vm5141_vm5, %v3001_v34, %v3021_v40  ;;  %v3033_v53 = vsel %vm655_vm3, %v2998_v3, %v3026_v49  ;;  %v3034_v58 = vsel %vm5141_vm5, %v3002_v51, %v3022_v50 }
 0xa68   : > { %v3039_v5 = vsel %vm676_vm6, %v3025_v57, %v2997_v46  ;;  %v3040_v44 = vsel %vm5150_vm8, %v3021_v40, %v3001_v34  ;;  %v3041_v30 = vsel %vm676_vm6, %v3026_v49, %v2998_v3  ;;  %v3042_v38 = vsel %vm5150_vm8, %v3022_v50, %v3002_v51  ;;  %3141 = vmatpush1.bf16.msra.mxu0 %v7057_v43 }
 0xa69   : > { %v3045_v31 = vpack.c.bf16 %v3033_v53, %v3031_v25  ;;  %v3046_v21 = vpack.c.bf16 %v3034_v58, %v3032_v39  ;;  %v3061_v13 = vpack.c.bf16 %v3041_v30, %v3039_v5  ;;  %v3062_v33 = vpack.c.bf16 %v3042_v38, %v3040_v44  ;;  %3142 = vmatprep.subr.bf16.mxu0 %v7077_v36  ;;  %v4542_v36 = vld [vmem:[%s7773_s10 + $0x8] ss:$0 sps:$4 sm:$0xff]  }
 0xa6a   : > { %v3585_v43 = vcombine.low %v7235_v0, %v7235_v0 }
 0xa6b   : > { %3065 = vst [vmem:[#allocation2 + $0x110] sm:$0xff] %v3061_v13  ;;  %3066 = vst [vmem:[#allocation2 + $0x118] sm:$0xff] %v3062_v33 }
 0xa6c   : > { %3143 = vmatpush1.bf16.msra.mxu0 %v7073_v26  ;;  %v7774_v26 = vpack.c.bf16 %v7175_v20, %v7167_v28 }
 0xa6d   : > { %3144 = vmatprep.subr.bf16.mxu0 %v7362_v47 }
 0xa70   : > { %3145 = vmatpush1.bf16.msra.mxu0 %v2971_v10 }
 0xa71   : > { %3146 = vmatprep.subr.bf16.mxu0 %v7407_v16 }
 0xa74   : > { %3147 = vmatpush1.bf16.msra.mxu0 %v2973_v37  ;;  %v3109_v14 = vpop.permute.xlu0 %3108 }
 0xa75   : > { %3148 = vmatprep.subr.bf16.mxu0 %v3044_v27 }
 0xa78   : > { %3149 = vmatpush1.bf16.msra.mxu0 %v3043_v52 }
 0xa79   : > { %3150 = vmatprep.subr.bf16.mxu0 %v3046_v21 }
 0xa7c   : > { %3151 = vmatpush1.bf16.msra.mxu0 %v3045_v31 }
 0xa7d   : > { %3152 = vmatprep.subr.bf16.mxu0 %v3052_v4 }
 0xa80   : > { %3153 = vmatpush1.bf16.msra.mxu0 %v3051_v59 }
 0xa81   : > { %3154 = vmatprep.subr.bf16.mxu0 %v3054_v63 }
 0xa84   : > { %3155 = vmatpush1.bf16.msra.mxu0 %v7774_v26 }
 0xa85   : > { %3165 = vmatprep.subr.bf16.mxu0 %v3060_v55 }
 0xa87   : > { %3157 = vmatmul.mubr.bf16.vlgmr.msra.gmra.mrb[20].mxu0 %v3585_v43 }
 0xa88   : > { %3166 = vmatpush1.bf16.msra.mxu0 %v3059_v54  ;;  %3197 = vmatprep.mubr.bf16.mxu0 %v7767_v19 }
 0xa89   : > { %3167 = vmatprep.subr.bf16.mxu0 %v3062_v33 }
 0xa8c   : > { %3168 = vmatpush1.bf16.msra.mxu0 %v3061_v13 }
 0xa93   : > { %3588 = vmatmul.mubr.msk.bf16.vlgmr.msra.gmra.mrb[20].mxu0 %vm1576_vm11, %v4542_v36 }
 0xb66   : > { %v3199_v11 = vpop.f32.mrb[20].mxu0 }
 0xb67   : > { %v3624_v32 = vadd.f32 %v3199_v11, %v3109_v14  ;;  %v3201_v60 = vpop.f32.mrb[21].mxu0 }
 0xb68   : > { %v3625_v59 = vadd.f32 %v3201_v60, %v3109_v14  ;;  %v3203_v4 = vpop.f32.mrb[22].mxu0 }
 0xb69   : > { %v3206_v28 = vmax.f32 %v3624_v32, 0.0  ;;  %v3204_v48 = vpop.f32.mrb[23].mxu0 }
 0xb6a   : > { %v3207_v20 = vmax.f32 %v3625_v59, 0.0 }
 0xb6b   : > { %v3284_v56 = vpack.c.bf16 %v3206_v28, %v3206_v28 }
 0xb6c   : > { %v3285_v63 = vpack.c.bf16 %v3207_v20, %v3207_v20  ;;  %v4473_v19 = vpack.i.bf16 %v3207_v20, %v3206_v28 }
 0xb6d   : > { %3286 = vst [vmem:[#allocation2 + $0x20] sm:$0xf] %v3284_v56 }
 0xb6e   : > { %3287 = vst [vmem:[#allocation2 + $0x28] sm:$0xf] %v3285_v63  ;;  %4474 = vrot.lane.b32.xlu0 %v4473_v19, %s7732_s24  ;;  %4469 = vrot.lane.b32.xlu1 %v4473_v19, %s7737_s28  ;;  %s7777_s24 = sld [smem:[#allocation35_spill]] }
 0xb74   : > { %s7599_s28 = scalar_lea.hbm %s7777_s24, %s3599_s18 }
 0xbe0   : > { %v4475_v0 = vpop.permute.xlu0 %4474  ;;  %v4470_v42 = vpop.permute.xlu1 %4469 }
 0xbe1   : > { %v4477_v9 = vunpack.i.h.bf16 %v4475_v0  ;;  %v4476_v10 = vunpack.i.l.bf16 %v4475_v0  ;;  %v4472_v47 = vunpack.i.h.bf16 %v4470_v42  ;;  %v4471_v22 = vunpack.i.l.bf16 %v4470_v42 }
 0xbe3   : > { %v3218_v29 = vsel %vm580_vm7, %v4476_v10, %v4477_v9  ;;  %v3219_v37 = vsel %vm580_vm7, %v4477_v9, %v4476_v10  ;;  %v3212_v16 = vsel %vm573_vm4, %v4471_v22, %v4472_v47  ;;  %v3213_v52 = vsel %vm573_vm4, %v4472_v47, %v4471_v22 }
 0xbe4   : > { %v3220_v27 = vsel %vm600_vm13, %v3212_v16, %v3219_v37  ;;  %v3221_v54 = vsel %vm5102_vm14, %v3213_v52, %v3218_v29  ;;  %v3222_v55 = vsel %vm621_vm15, %v3219_v37, %v3212_v16  ;;  %v3223_v7 = vsel %vm5111_vm0, %v3218_v29, %v3213_v52 }
 0xbe5   : > { %v3244_v41 = vpack.c.bf16 %v3220_v27, %v3220_v27  ;;  %v3245_v35 = vpack.c.bf16 %v3221_v54, %v3221_v54  ;;  %v3318_v8 = vpack.c.bf16 %v3222_v55, %v3222_v55  ;;  %v3319_v23 = vpack.c.bf16 %v3223_v7, %v3223_v7 }
 0xbe6   : > { %v4488_v12 = vpack.i.bf16 %v3221_v54, %v3220_v27  ;;  %v4503_v2 = vpack.i.bf16 %v3223_v7, %v3222_v55 }
 0xbe7   : > { %v3248_v1 = vrot.slane %v3244_v41, 4  ;;  %v3249_v3 = vrot.slane %v3245_v35, 4  ;;  %v3322_v51 = vrot.slane %v3318_v8, 4  ;;  %v3323_v46 = vrot.slane %v3319_v23, 4 }
 0xbe8   : > { %4489 = vrot.lane.b32.xlu0 %v4488_v12, %s7739_s27  ;;  %4479 = vrot.lane.b32.xlu1 %v4488_v12, %s7738_s23 }
 0xbe9   : > { %3252 = vst [vmem:[#allocation2] sm:$0xf0] %v3248_v1  ;;  %3253 = vst [vmem:[#allocation2 + $0x8] sm:$0xf0] %v3249_v3 }
 0xbea   : > { %3326 = vst [vmem:[#allocation2 + $0x30] sm:$0xf0] %v3322_v51  ;;  %3327 = vst [vmem:[#allocation2 + $0x38] sm:$0xf0] %v3323_v46 }
 0xbec   : > { %4494 = vrot.lane.b32.xlu0 %v4473_v19, %s7739_s27  ;;  %4484 = vrot.lane.b32.xlu1 %v4473_v19, %s7738_s23 }
 0xbf0   : > { %4504 = vrot.lane.b32.xlu0 %v4503_v2, %s7739_s27  ;;  %4499 = vrot.lane.b32.xlu1 %v4503_v2, %s7738_s23  ;;  %s4667_s23 = scalar_lea.vmem %s7601_s0, 128  ;;  %s4671_s27 = sshll.u32 %s4758_s17, 4  ;;  %s4672_s27 = int_to_ptr.vmem [resolvable:$false] %s4671_s27 }
 0xbf1   : > { %p4668_p8 = scmp.ne.s32.totalorder %s7601_s0, %s4667_s23  ;;  %p4674_p10 = scmp.lt.s32.totalorder %s7601_s0, %s4672_s27 }
 0xbf3   : > { %p4669_p3 = pnand %p4668_p8, %p4976_p6 }
 0xbf4   : > { %3346 = vperm.xlu1 %3827, %v3343_v6  }
 0xbf5   : > { %p4670_p7 = pneg %p4669_p3 }
 0xc5a   : > { %v4490_v45 = vpop.permute.xlu0 %4489  ;;  %v4480_v18 = vpop.permute.xlu1 %4479 }
 0xc5b   : > { %v4492_v34 = vunpack.i.h.bf16 %v4490_v45  ;;  %v4491_v50 = vunpack.i.l.bf16 %v4490_v45  ;;  %v4482_v49 = vunpack.i.h.bf16 %v4480_v18  ;;  %v4481_v40 = vunpack.i.l.bf16 %v4480_v18 }
 0xc5d   : > { %v3234_v57 = vsel %vm543_vm1, %v4491_v50, %v4492_v34  ;;  %v3235_v25 = vsel %vm543_vm1, %v4492_v34, %v4491_v50  ;;  %v3228_v39 = vsel %vm629_vm2, %v4481_v40, %v4482_v49  ;;  %v3229_v53 = vsel %vm629_vm2, %v4482_v49, %v4481_v40  ;;  %v3332_v40 = vld [vmem:[%s7776_s21] sm:$0x3]  ;;  %s4673_s21 = scalar_lea.vmem %s4672_s27, 256 }
 0xc5e   : > { %v3236_v58 = vsel %vm655_vm3, %v3228_v39, %v3235_v25  ;;  %v3237_v5 = vsel %vm5141_vm5, %v3229_v53, %v3234_v57  ;;  %v3238_v44 = vsel %vm676_vm6, %v3235_v25, %v3228_v39  ;;  %v3239_v30 = vsel %vm5150_vm8, %v3234_v57, %v3229_v53  ;;  %v4495_v38 = vpop.permute.xlu0 %4494  ;;  %v4485_v31 = vpop.permute.xlu1 %4484  ;;  %p4675_p13 = scmp.lt.s32.totalorder %s4673_s21, %s4667_s23 }
 0xc5f   : > { %v3240_v21 = vpack.c.bf16 %v3236_v58, %v3236_v58  ;;  %v3241_v13 = vpack.c.bf16 %v3237_v5, %v3237_v5  ;;  %v3254_v33 = vpack.c.bf16 %v3238_v44, %v3238_v44  ;;  %v3255_v43 = vpack.c.bf16 %v3239_v30, %v3239_v30  ;;  %v4551_v44 = vld [vmem:[%s5030_s26] sm:$0xff] }
 0xc60   : > { %v4497_v26 = vunpack.i.h.bf16 %v4495_v38  ;;  %v4496_v36 = vunpack.i.l.bf16 %v4495_v38  ;;  %v4487_v14 = vunpack.i.h.bf16 %v4485_v31  ;;  %v4486_v11 = vunpack.i.l.bf16 %v4485_v31  ;;  %v4552_v31 = vld [vmem:[%s5030_s26 + $0x8] sm:$0xff]  ;;  %p4676_p5 = por %p4675_p13, %p4674_p10 }
 0xc61   : > { %3242 = vst [vmem:[#allocation2] sm:$0xf] %v3240_v21  ;;  %3243 = vst [vmem:[#allocation2 + $0x8] sm:$0xf] %v3241_v13 }
 0xc62   : > { %3256 = vst [vmem:[#allocation2 + $0x10] sm:$0xf] %v3254_v33  ;;  %3257 = vst [vmem:[#allocation2 + $0x18] sm:$0xf] %v3255_v43  ;;  %v3268_v32 = vsel %vm543_vm1, %v4496_v36, %v4497_v26  ;;  %v3269_v60 = vsel %vm543_vm1, %v4497_v26, %v4496_v36  ;;  %v3262_v59 = vsel %vm629_vm2, %v4486_v11, %v4487_v14  ;;  %v4505_v28 = vpop.permute.xlu0 %4504  ;;  %v4500_v48 = vpop.permute.xlu1 %4499  ;;  %p4677_p0 = pnand %p4676_p5, %p4670_p7 }
 0xc63   : > { %v3263_v4 = vsel %vm629_vm2, %v4487_v14, %v4486_v11  ;;  %v3270_v20 = vsel %vm655_vm3, %v3262_v59, %v3269_v60  ;;  %v3272_v63 = vsel %vm676_vm6, %v3269_v60, %v3262_v59  ;;  %v4507_v47 = vunpack.i.h.bf16 %v4505_v28 }
 0xc64   : > { %v3271_v56 = vsel %vm5141_vm5, %v3263_v4, %v3268_v32  ;;  %v3273_v19 = vsel %vm5150_vm8, %v3268_v32, %v3263_v4  ;;  %v3274_v0 = vpack.c.bf16 %v3270_v20, %v3270_v20  ;;  %v3288_v9 = vpack.c.bf16 %v3272_v63, %v3272_v63 }
 0xc65   : > { %v3275_v42 = vpack.c.bf16 %v3271_v56, %v3271_v56  ;;  %v3289_v10 = vpack.c.bf16 %v3273_v19, %v3273_v19  ;;  %v4506_v22 = vunpack.i.l.bf16 %v4505_v28  ;;  %v4502_v29 = vunpack.i.h.bf16 %v4500_v48 }
 0xc66   : > { %v4501_v37 = vunpack.i.l.bf16 %v4500_v48  ;;  %v3278_v16 = vrot.slane %v3274_v0, 4  ;;  %v3292_v27 = vrot.slane %v3288_v9, 4 }
 0xc67   : > { %v3279_v52 = vrot.slane %v3275_v42, 4  ;;  %v3293_v54 = vrot.slane %v3289_v10, 4  ;;  %v3308_v55 = vsel %vm543_vm1, %v4506_v22, %v4507_v47  ;;  %v3309_v7 = vsel %vm543_vm1, %v4507_v47, %v4506_v22 }
 0xc68   : > { %v3302_v41 = vsel %vm629_vm2, %v4501_v37, %v4502_v29  ;;  %v3303_v35 = vsel %vm629_vm2, %v4502_v29, %v4501_v37  ;;  %3282 = vst [vmem:[#allocation2 + $0x10] sm:$0xf0] %v3278_v16  ;;  %3296 = vst [vmem:[#allocation2 + $0x20] sm:$0xf0] %v3292_v27  ;;  %v3334_v3 = vld [vmem:[#allocation2 + $0x8] sm:$0xff]  ;;  %v3333_v51 = vld [vmem:[#allocation2] sm:$0xff] }
 0xc69   : > { %3283 = vst [vmem:[#allocation2 + $0x18] sm:$0xf0] %v3279_v52  ;;  %3297 = vst [vmem:[#allocation2 + $0x28] sm:$0xf0] %v3293_v54  ;;  %v3310_v8 = vsel %vm655_vm3, %v3302_v41, %v3309_v7  ;;  %v3311_v23 = vsel %vm5141_vm5, %v3303_v35, %v3308_v55  ;;  %v3312_v12 = vsel %vm676_vm6, %v3309_v7, %v3302_v41  ;;  %3358 = vmatprep.subr.bf16.mxu1 %v3334_v3 }
 0xc6a   : > { %v3313_v1 = vsel %vm5150_vm8, %v3308_v55, %v3303_v35  ;;  %v3314_v17 = vpack.c.bf16 %v3310_v8, %v3310_v8  ;;  %v3315_v46 = vpack.c.bf16 %v3311_v23, %v3311_v23  ;;  %v3328_v2 = vpack.c.bf16 %v3312_v12, %v3312_v12  ;;  %3359 = vmatpush1.bf16.msra.mxu1 %v3333_v51 }
 0xc6b   : > { %v3329_v6 = vpack.c.bf16 %v3313_v1, %v3313_v1 }
 0xc6c   : > { %3316 = vst [vmem:[#allocation2 + $0x30] sm:$0xf] %v3314_v17  ;;  %3317 = vst [vmem:[#allocation2 + $0x38] sm:$0xf] %v3315_v46 }
 0xc6d   : > { %3330 = vst [vmem:[#allocation2 + $0x40] sm:$0xf] %v3328_v2  ;;  %3331 = vst [vmem:[#allocation2 + $0x48] sm:$0xf] %v3329_v6 }
 0xc6f   : > { %v3335_v61 = vld [vmem:[#allocation2 + $0x10] sm:$0xff]  ;;  %v3337_v24 = vld [vmem:[#allocation2 + $0x20] sm:$0xff] }
 0xc70   : > { %v3336_v15 = vld [vmem:[#allocation2 + $0x18] sm:$0xff]  ;;  %v3338_v62 = vld [vmem:[#allocation2 + $0x28] sm:$0xff] }
 0xc71   : > { %3360 = vmatprep.subr.bf16.mxu1 %v3336_v15 }
 0xc72   : > { %3361 = vmatpush1.bf16.msra.mxu1 %v3335_v61 }
 0xc73   : > { %3362 = vmatprep.subr.bf16.mxu1 %v3338_v62  ;;  %v3340_v45 = vld [vmem:[#allocation2 + $0x38] sm:$0xff]  ;;  %v3339_v18 = vld [vmem:[#allocation2 + $0x30] sm:$0xff]  ;;  %v3347_v57 = vpop.permute.xlu1 %3346 }
 0xc74   : > { %v3342_v34 = vld [vmem:[#allocation2 + $0x48] sm:$0xf]  ;;  %v3341_v50 = vld [vmem:[#allocation2 + $0x40] sm:$0xf] }
 0xc75   : > { %v3353_v49 = vsel %vm793_vm9, %v3341_v50, 0 }
 0xc76   : > { %3363 = vmatpush1.bf16.msra.mxu1 %v3337_v24 }
 0xc77   : > { %3364 = vmatprep.subr.bf16.mxu1 %v3340_v45 }
 0xc7a   : > { %3365 = vmatpush1.bf16.msra.mxu1 %v3339_v18 }
 0xc7b   : > { %3589 = vmatprep.subr.msk.bf16.mxu1 %vm793_vm9, %v3342_v34 }
 0xc7e   : > { %3367 = vmatpush1.bf16.msra.mxu1 %v3353_v49 }
 0xc81   : > { %3590 = vmatmul.mubr.msk.bf16.vlgmr.msra.gmra.mrb[16].mxu1 %vm789_vm10, %v3332_v40 }
 0xd54   : > { %v3392_v25 = vpop.f32.mrb[16].mxu1 }
 0xd55   : > { %v3393_v39 = vadd.f32 %v3392_v25, %v3347_v57  ;;  %v3394_v53 = vpop.f32.mrb[17].mxu1 }
 0xd56   : > { %v3395_v58 = vadd.f32 %v3394_v53, %v3347_v57  ;;  %v3396_v5 = vpop.f32.mrb[18].mxu1 }
 0xd57   : > { %v3399_v30 = vadd.f32 %v4551_v44, %v3393_v39  ;;  %v3397_v38 = vpop.f32.mrb[19].mxu1 }
 0xd58   : > { %v3400_v21 = vadd.f32 %v4552_v31, %v3395_v58 }
 0xd59   : > { %v3591_v13 = vmul.f32 -1.442695, %v3399_v30 }
 0xd5a   : > { %v3592_v33 = vmul.f32 -1.442695, %v3400_v21 }
 0xd5b   : > { %4543 = vpow2.f32 %v3591_v13 }
 0xd5c   : > { %4545 = vpow2.f32 %v3592_v33 }
 0xd65   : > { %v4544_v43 = vpop.eup %4543 }
 0xd66   : > { %v4546_v26 = vpop.eup %4545  ;;  %v3407_v36 = vadd.f32 1.0, %v4544_v43 }
 0xd67   : > { %v3408_v14 = vadd.f32 1.0, %v4546_v26 }
 0xd68   : > { %4547 = vrcp.f32 %v3407_v36 }
 0xd69   : > { %4549 = vrcp.f32 %v3408_v14 }
 0xd72   : > { %v4548_v11 = vpop.eup %4547 }
 0xd73   : > { %v4550_v32 = vpop.eup %4549 }
 0xd74   : > { %v3415_v60 = vcombine.low %v4548_v11, %v4550_v32 }
 0xd76   : > { %3417 = vst [vmem:[%s523_s29] sm:$0xff] %v3415_v60 }
 0xd77   : > { %4680 = shalt.err (!%p4677_p0)
}
 0xd78   : > { %s4681_s25 = scalar_lea.hbm %s7599_s28, 128  ;;  %s4685_s29 = scalar_lea.hbm %s7777_s24, 256 }
 0xd79   : > { %p4682_p9 = scmp.ne.s32.totalorder %s7599_s28, %s4681_s25  ;;  %p4686_p2 = scmp.lt.u32.totalorder %s7599_s28, %s7777_s24 }
 0xd7a   : > { %p4687_p1 = scmp.lt.u32.totalorder %s4685_s29, %s4681_s25  ;;  %p4689_p8 = scmp.lt.u32.totalorder %s4681_s25, %s7599_s28 }
 0xd7b   : > { %p4683_p11 = pnand %p4682_p9, %p4976_p6 }
 0xd7c   : > { %p4688_p4 = por %p4687_p1, %p4686_p2 }
 0xd7d   : > { %p4684_p12 = pneg %p4683_p11 }
 0xd7e   : > { %p4690_p3 = por %p4689_p8, %p4688_p4 }
 0xd80   : > { %p4691_p7 = pnand %p4690_p3, %p4684_p12 }
 0xd82   : > { %4694 = shalt.err (!%p4691_p7)
}
 0xd83   : > { %3676 = dma.vmem_to_hbm [thread:$0]  (%p4976_p6), %s7601_s0, 128, %s7599_s28, %s3419_s13  }
 0xd84 PF: > { %s7778_s23 = sld [smem:[#allocation17_spill]]  ;;  %s7779_s17 = sld [smem:[#allocation18_spill]] }
 0xd85   : > { %p7781_p13 = scmp.ge.s32.totalorder %s4745_s16, 2 }
 0xd8a   : > { %s3445_s27 = sand.u32 1, %s7778_s23   ;;  %p7780_p10 = scmp.ne.s32.totalorder %s7779_s17, 0 }
 0xd8b   : > { %s3446_s21 = scalar_lea.sflag [#allocation5], %s3445_s27 }
 0xd8c   : > { %p3693_p5 = pnand %p7781_p13, %p7780_p10 }
 0xd8e   : > { %4728 = dma.done.wait (!%p3693_p5), %s3446_s21, 128  }
 0xd8f   : > { %4730 = vsyncadd (!%p3693_p5), %s3446_s21, 4294967168  ;;  %p29_p0 = scmp.ge.s32.totalorder %s4962_s14, 4   ;;  %s7782_s29 = smov %s4737_s30 }
 0xd90   : > { %s7783_s30 = smov %s4741_s15  ;;  %s7784_s15 = smov %s4972_s20 }
 0xd91   : > { %s7785_s16 = smov %s4962_s14  ;;  %31 = sbr.rel (!%p29_p0) target bundleno = 13 (0xd), region = 134 }
 0xd98   :  { %3451 = vsyncpa [#allocation4], 1 }
 0xd99   :  { %3453 = vsyncpa [#allocation4 + $0x1], 1 }
 0xd9a   :  { %3454 = vsyncpa [#allocation7], 1 }
 0xd9b   :  { %3456 = vsyncpa [#allocation7 + $0x1], 1 }
 0xd9c   :  { %3457 = vsyncpa [#allocation10], 1 }
 0xd9d   :  { %3458 = vsyncpa [#allocation5], 1 }
 0xd9e   :  { %3460 = vsyncpa [#allocation5 + $0x1], 1 }

</bundles_post_ra>
